<compile_context>
chip_gen: v7x
topology: tpu7x:2x2x1
jax: 0.10.0
libtpu: 0.0.40
codegen_flags: <defaults>
</compile_context>

<pallas_src>
import functools

import jax
import jax.numpy as jnp
from jax.experimental import pallas as pl
from jax.experimental.pallas import tpu as pltpu


def _round_up(x, m):
    return ((x + m - 1) // m) * m


# ----------------------------- Pallas kernel -----------------------------

def transe_score_kernel(obj_ref, ent_ref, out_ref, *, gamma):
    # obj_ref: (TB, D)  query embeddings  (sub_emb + rel_emb), f32
    # ent_ref: (D, TE)  transposed entity tile, entities on lanes (f32 or bf16)
    # out_ref: (TB, TE) sigmoid(gamma - ||obj - ent||_1)
    d_model = obj_ref.shape[1]
    dist = jnp.zeros(out_ref.shape, jnp.float32)          # (TB, TE) in vregs
    # Fully-unrolled static loop over the embedding dim: per d we do a
    # lane-broadcast of the query column and a sublane-broadcast of the
    # entity row, then sub/abs/add on the lane-dense (TB, TE) accumulator.
    for d in range(d_model):
        o_col = obj_ref[:, d:d + 1]                        # (TB, 1)
        e_row = ent_ref[d:d + 1, :].astype(jnp.float32)    # (1, TE)
        dist = dist + jnp.abs(o_col - e_row)               # (TB, TE), pure VPU
    out_ref[...] = jax.nn.sigmoid(gamma - dist)


def transe_score(obj, ent_t, gamma, *, tb=128, te=128):
    """score[b, e] = sigmoid(gamma - ||obj[b] - ent_t[:, e]||_1)."""
    B, D = obj.shape
    D2, E = ent_t.shape
    assert D == D2

    # Adapt tile sizes to small problems; pad to tile multiples otherwise.
    tb = min(tb, _round_up(B, 8))
    te = min(te, _round_up(E, 128))
    b_pad = _round_up(B, tb)
    e_pad = _round_up(E, te)
    if b_pad != B:
        obj = jnp.pad(obj, ((0, b_pad - B), (0, 0)))
    if e_pad != E:
        ent_t = jnp.pad(ent_t, ((0, 0), (0, e_pad - E)))

    grid = (b_pad // tb, e_pad // te)   # batch outer: obj tile stays resident
    out = pl.pallas_call(
        functools.partial(transe_score_kernel, gamma=float(gamma)),
        out_shape=jax.ShapeDtypeStruct((b_pad, e_pad), jnp.float32),
        grid_spec=pltpu.PrefetchScalarGridSpec(
            num_scalar_prefetch=0,
            grid=grid,
            in_specs=[
                pl.BlockSpec((tb, D), lambda i, j: (i, 0)),   # queries
                pl.BlockSpec((D, te), lambda i, j: (0, j)),   # entity tile (D, TE)
            ],
            out_specs=pl.BlockSpec((tb, te), lambda i, j: (i, j)),
        ),
        compiler_params=pltpu.CompilerParams(
            dimension_semantics=("parallel", "parallel")),
    )(obj, ent_t)
    return out[:B, :E]   # drop padded rows / entity columns


# ------------------------------ model glue ------------------------------

def xavier_normal(key, shape):
    fan_in = shape[-1]
    fan_out = shape[-2] if len(shape) > 1 else shape[-1]
    # torch xavier_normal_: std = gain * sqrt(2 / (fan_in + fan_out)), gain=1
    std = (2.0 / (fan_in + fan_out)) ** 0.5
    return std * jax.random.normal(key, shape, dtype=jnp.float32)


def transe_forward(params, sub, rel, gamma, *, ent_dtype=jnp.float32):
    """Eval-mode TransE.forward with x_ops = r_ops = '' (identity exop).

    loop_emb cancels in (sub_emb + rel_emb) - all_ent, so we gather from the
    raw entity table and stream the raw table (transposed) into the kernel.
    Set ent_dtype=jnp.bfloat16 on v6e/v7x to halve entity-table HBM traffic
    (accumulation stays f32 in-kernel).
    """
    x = params["init_embed"]                  # (num_ents, D)
    r = params["init_rel"]                    # (num_rels, D)

    obj = jnp.take(x, sub, axis=0) + jnp.take(r, rel, axis=0)   # (B, D)
    ent_t = x.T.astype(ent_dtype)             # (D, num_ents): one-time layout plumbing

    return transe_score(obj, ent_t, gamma)


# TODO(synk): training branch (BCELoss against e2_multi) and non-empty
# x_ops/r_ops (Linear/BatchNorm/Dropout/Tanh) paths are not exercised here;
# only the eval path returning `score` is implemented.


if __name__ == "__main__":
    num_ents, num_rels = 256, 16
    init_dim = 128
    batch = 8
    gamma = 9.0

    key = jax.random.PRNGKey(0)
    k_e, k_r, k_l, k_sub, k_rel = jax.random.split(key, 5)

    params = {
        "init_embed": xavier_normal(k_e, (num_ents, init_dim)),
        "init_rel": xavier_normal(k_r, (num_rels, init_dim)),
        "loop_emb": xavier_normal(k_l, (1, init_dim)),
    }

    sub = jax.random.randint(k_sub, (batch,), 0, num_ents, dtype=jnp.int32)
    rel = jax.random.randint(k_rel, (batch,), 0, num_rels, dtype=jnp.int32)

    score = transe_forward(params, sub, rel, gamma)
    score = jax.block_until_ready(score)
    assert score.shape == (batch, num_ents)

    # Reference 1: same algebra as the kernel (loop_emb cancelled) -- tight.
    obj = (jnp.take(params["init_embed"], sub, 0)
           + jnp.take(params["init_rel"], rel, 0))
    ref_cancel = jax.nn.sigmoid(
        gamma - jnp.sum(jnp.abs(obj[:, None, :]
                                - params["init_embed"][None, :, :]), axis=2))
    assert jnp.max(jnp.abs(score - ref_cancel)) < 1e-5

    # Reference 2: original module semantics (with the x - loop_emb pre-pass).
    # Differences are fp reassociation only.
    x_shift = params["init_embed"] - params["loop_emb"]
    obj_orig = jnp.take(x_shift, sub, 0) + jnp.take(params["init_rel"], rel, 0)
    ref_orig = jax.nn.sigmoid(
        gamma - jnp.sum(jnp.abs(obj_orig[:, None, :]
                                - x_shift[None, :, :]), axis=2))
    assert jnp.max(jnp.abs(score - ref_orig)) < 1e-4

    print("KERNEL_OK")
</pallas_src>

<mosaic_0001>
module attributes {stable_mosaic.version = 11 : i64} {
  func.func @transe_score_kernel(%arg0: i32, %arg1: i32, %arg2: memref<8x128xf32, #tpu.memory_space<vmem>>, %arg3: memref<128x128xf32, #tpu.memory_space<vmem>>, %arg4: memref<8x128xf32, #tpu.memory_space<vmem>>) attributes {dimension_semantics = [#tpu.dimension_semantics<parallel>, #tpu.dimension_semantics<parallel>], iteration_bounds = array<i64: 1, 2>, scalar_prefetch = 0 : i64, scratch_operands = 0 : i64, tpu.core_type = #tpu.core_type<tc>, window_params = [{transform_indices = @transform_0, window_bounds = array<i64: 8, 128>}, {transform_indices = @transform_1, window_bounds = array<i64: 128, 128>}, {transform_indices = @transform_2, window_bounds = array<i64: 8, 128>}]} {
    %cst = arith.constant 0.000000e+00 : f32
    %0 = vector.broadcast %cst : f32 to vector<8x128xf32>
    %c0 = arith.constant 0 : index
    %c0_0 = arith.constant 0 : index
    %1 = vector.load %arg2[%c0, %c0_0] : memref<8x128xf32, #tpu.memory_space<vmem>>, vector<8x1xf32>
    %c0_1 = arith.constant 0 : index
    %c0_2 = arith.constant 0 : index
    %2 = vector.load %arg3[%c0_1, %c0_2] : memref<128x128xf32, #tpu.memory_space<vmem>>, vector<1x128xf32>
    %3 = vector.broadcast %1 : vector<8x1xf32> to vector<8x128xf32>
    %4 = vector.broadcast %2 : vector<1x128xf32> to vector<8x128xf32>
    %5 = arith.subf %3, %4 : vector<8x128xf32>
    %6 = math.absf %5 : vector<8x128xf32>
    %7 = arith.addf %0, %6 : vector<8x128xf32>
    %c0_3 = arith.constant 0 : index
    %c1 = arith.constant 1 : index
    %8 = vector.load %arg2[%c0_3, %c1] : memref<8x128xf32, #tpu.memory_space<vmem>>, vector<8x1xf32>
    %c1_4 = arith.constant 1 : index
    %c0_5 = arith.constant 0 : index
    %9 = vector.load %arg3[%c1_4, %c0_5] : memref<128x128xf32, #tpu.memory_space<vmem>>, vector<1x128xf32>
    %10 = vector.broadcast %8 : vector<8x1xf32> to vector<8x128xf32>
    %11 = vector.broadcast %9 : vector<1x128xf32> to vector<8x128xf32>
    %12 = arith.subf %10, %11 : vector<8x128xf32>
    %13 = math.absf %12 : vector<8x128xf32>
    %14 = arith.addf %7, %13 : vector<8x128xf32>
    %c0_6 = arith.constant 0 : index
    %c2 = arith.constant 2 : index
    %15 = vector.load %arg2[%c0_6, %c2] : memref<8x128xf32, #tpu.memory_space<vmem>>, vector<8x1xf32>
    %c2_7 = arith.constant 2 : index
    %c0_8 = arith.constant 0 : index
    %16 = vector.load %arg3[%c2_7, %c0_8] : memref<128x128xf32, #tpu.memory_space<vmem>>, vector<1x128xf32>
    %17 = vector.broadcast %15 : vector<8x1xf32> to vector<8x128xf32>
    %18 = vector.broadcast %16 : vector<1x128xf32> to vector<8x128xf32>
    %19 = arith.subf %17, %18 : vector<8x128xf32>
    %20 = math.absf %19 : vector<8x128xf32>
    %21 = arith.addf %14, %20 : vector<8x128xf32>
    %c0_9 = arith.constant 0 : index
    %c3 = arith.constant 3 : index
    %22 = vector.load %arg2[%c0_9, %c3] : memref<8x128xf32, #tpu.memory_space<vmem>>, vector<8x1xf32>
    %c3_10 = arith.constant 3 : index
    %c0_11 = arith.constant 0 : index
    %23 = vector.load %arg3[%c3_10, %c0_11] : memref<128x128xf32, #tpu.memory_space<vmem>>, vector<1x128xf32>
    %24 = vector.broadcast %22 : vector<8x1xf32> to vector<8x128xf32>
    %25 = vector.broadcast %23 : vector<1x128xf32> to vector<8x128xf32>
    %26 = arith.subf %24, %25 : vector<8x128xf32>
    %27 = math.absf %26 : vector<8x128xf32>
    %28 = arith.addf %21, %27 : vector<8x128xf32>
    %c0_12 = arith.constant 0 : index
    %c4 = arith.constant 4 : index
    %29 = vector.load %arg2[%c0_12, %c4] : memref<8x128xf32, #tpu.memory_space<vmem>>, vector<8x1xf32>
    %c4_13 = arith.constant 4 : index
    %c0_14 = arith.constant 0 : index
    %30 = vector.load %arg3[%c4_13, %c0_14] : memref<128x128xf32, #tpu.memory_space<vmem>>, vector<1x128xf32>
    %31 = vector.broadcast %29 : vector<8x1xf32> to vector<8x128xf32>
    %32 = vector.broadcast %30 : vector<1x128xf32> to vector<8x128xf32>
    %33 = arith.subf %31, %32 : vector<8x128xf32>
    %34 = math.absf %33 : vector<8x128xf32>
    %35 = arith.addf %28, %34 : vector<8x128xf32>
    %c0_15 = arith.constant 0 : index
    %c5 = arith.constant 5 : index
    %36 = vector.load %arg2[%c0_15, %c5] : memref<8x128xf32, #tpu.memory_space<vmem>>, vector<8x1xf32>
    %c5_16 = arith.constant 5 : index
    %c0_17 = arith.constant 0 : index
    %37 = vector.load %arg3[%c5_16, %c0_17] : memref<128x128xf32, #tpu.memory_space<vmem>>, vector<1x128xf32>
    %38 = vector.broadcast %36 : vector<8x1xf32> to vector<8x128xf32>
    %39 = vector.broadcast %37 : vector<1x128xf32> to vector<8x128xf32>
    %40 = arith.subf %38, %39 : vector<8x128xf32>
    %41 = math.absf %40 : vector<8x128xf32>
    %42 = arith.addf %35, %41 : vector<8x128xf32>
    %c0_18 = arith.constant 0 : index
    %c6 = arith.constant 6 : index
    %43 = vector.load %arg2[%c0_18, %c6] : memref<8x128xf32, #tpu.memory_space<vmem>>, vector<8x1xf32>
    %c6_19 = arith.constant 6 : index
    %c0_20 = arith.constant 0 : index
    %44 = vector.load %arg3[%c6_19, %c0_20] : memref<128x128xf32, #tpu.memory_space<vmem>>, vector<1x128xf32>
    %45 = vector.broadcast %43 : vector<8x1xf32> to vector<8x128xf32>
    %46 = vector.broadcast %44 : vector<1x128xf32> to vector<8x128xf32>
    %47 = arith.subf %45, %46 : vector<8x128xf32>
    %48 = math.absf %47 : vector<8x128xf32>
    %49 = arith.addf %42, %48 : vector<8x128xf32>
    %c0_21 = arith.constant 0 : index
    %c7 = arith.constant 7 : index
    %50 = vector.load %arg2[%c0_21, %c7] : memref<8x128xf32, #tpu.memory_space<vmem>>, vector<8x1xf32>
    %c7_22 = arith.constant 7 : index
    %c0_23 = arith.constant 0 : index
    %51 = vector.load %arg3[%c7_22, %c0_23] : memref<128x128xf32, #tpu.memory_space<vmem>>, vector<1x128xf32>
    %52 = vector.broadcast %50 : vector<8x1xf32> to vector<8x128xf32>
    %53 = vector.broadcast %51 : vector<1x128xf32> to vector<8x128xf32>
    %54 = arith.subf %52, %53 : vector<8x128xf32>
    %55 = math.absf %54 : vector<8x128xf32>
    %56 = arith.addf %49, %55 : vector<8x128xf32>
    %c0_24 = arith.constant 0 : index
    %c8 = arith.constant 8 : index
    %57 = vector.load %arg2[%c0_24, %c8] : memref<8x128xf32, #tpu.memory_space<vmem>>, vector<8x1xf32>
    %c8_25 = arith.constant 8 : index
    %c0_26 = arith.constant 0 : index
    %58 = vector.load %arg3[%c8_25, %c0_26] : memref<128x128xf32, #tpu.memory_space<vmem>>, vector<1x128xf32>
    %59 = vector.broadcast %57 : vector<8x1xf32> to vector<8x128xf32>
    %60 = vector.broadcast %58 : vector<1x128xf32> to vector<8x128xf32>
    %61 = arith.subf %59, %60 : vector<8x128xf32>
    %62 = math.absf %61 : vector<8x128xf32>
    %63 = arith.addf %56, %62 : vector<8x128xf32>
    %c0_27 = arith.constant 0 : index
    %c9 = arith.constant 9 : index
    %64 = vector.load %arg2[%c0_27, %c9] : memref<8x128xf32, #tpu.memory_space<vmem>>, vector<8x1xf32>
    %c9_28 = arith.constant 9 : index
    %c0_29 = arith.constant 0 : index
    %65 = vector.load %arg3[%c9_28, %c0_29] : memref<128x128xf32, #tpu.memory_space<vmem>>, vector<1x128xf32>
    %66 = vector.broadcast %64 : vector<8x1xf32> to vector<8x128xf32>
    %67 = vector.broadcast %65 : vector<1x128xf32> to vector<8x128xf32>
    %68 = arith.subf %66, %67 : vector<8x128xf32>
    %69 = math.absf %68 : vector<8x128xf32>
    %70 = arith.addf %63, %69 : vector<8x128xf32>
    %c0_30 = arith.constant 0 : index
    %c10 = arith.constant 10 : index
    %71 = vector.load %arg2[%c0_30, %c10] : memref<8x128xf32, #tpu.memory_space<vmem>>, vector<8x1xf32>
    %c10_31 = arith.constant 10 : index
    %c0_32 = arith.constant 0 : index
    %72 = vector.load %arg3[%c10_31, %c0_32] : memref<128x128xf32, #tpu.memory_space<vmem>>, vector<1x128xf32>
    %73 = vector.broadcast %71 : vector<8x1xf32> to vector<8x128xf32>
    %74 = vector.broadcast %72 : vector<1x128xf32> to vector<8x128xf32>
    %75 = arith.subf %73, %74 : vector<8x128xf32>
    %76 = math.absf %75 : vector<8x128xf32>
    %77 = arith.addf %70, %76 : vector<8x128xf32>
    %c0_33 = arith.constant 0 : index
    %c11 = arith.constant 11 : index
    %78 = vector.load %arg2[%c0_33, %c11] : memref<8x128xf32, #tpu.memory_space<vmem>>, vector<8x1xf32>
    %c11_34 = arith.constant 11 : index
    %c0_35 = arith.constant 0 : index
    %79 = vector.load %arg3[%c11_34, %c0_35] : memref<128x128xf32, #tpu.memory_space<vmem>>, vector<1x128xf32>
    %80 = vector.broadcast %78 : vector<8x1xf32> to vector<8x128xf32>
    %81 = vector.broadcast %79 : vector<1x128xf32> to vector<8x128xf32>
    %82 = arith.subf %80, %81 : vector<8x128xf32>
    %83 = math.absf %82 : vector<8x128xf32>
    %84 = arith.addf %77, %83 : vector<8x128xf32>
    %c0_36 = arith.constant 0 : index
    %c12 = arith.constant 12 : index
    %85 = vector.load %arg2[%c0_36, %c12] : memref<8x128xf32, #tpu.memory_space<vmem>>, vector<8x1xf32>
    %c12_37 = arith.constant 12 : index
    %c0_38 = arith.constant 0 : index
    %86 = vector.load %arg3[%c12_37, %c0_38] : memref<128x128xf32, #tpu.memory_space<vmem>>, vector<1x128xf32>
    %87 = vector.broadcast %85 : vector<8x1xf32> to vector<8x128xf32>
    %88 = vector.broadcast %86 : vector<1x128xf32> to vector<8x128xf32>
    %89 = arith.subf %87, %88 : vector<8x128xf32>
    %90 = math.absf %89 : vector<8x128xf32>
    %91 = arith.addf %84, %90 : vector<8x128xf32>
    %c0_39 = arith.constant 0 : index
    %c13 = arith.constant 13 : index
    %92 = vector.load %arg2[%c0_39, %c13] : memref<8x128xf32, #tpu.memory_space<vmem>>, vector<8x1xf32>
    %c13_40 = arith.constant 13 : index
    %c0_41 = arith.constant 0 : index
    %93 = vector.load %arg3[%c13_40, %c0_41] : memref<128x128xf32, #tpu.memory_space<vmem>>, vector<1x128xf32>
    %94 = vector.broadcast %92 : vector<8x1xf32> to vector<8x128xf32>
    %95 = vector.broadcast %93 : vector<1x128xf32> to vector<8x128xf32>
    %96 = arith.subf %94, %95 : vector<8x128xf32>
    %97 = math.absf %96 : vector<8x128xf32>
    %98 = arith.addf %91, %97 : vector<8x128xf32>
    %c0_42 = arith.constant 0 : index
    %c14 = arith.constant 14 : index
    %99 = vector.load %arg2[%c0_42, %c14] : memref<8x128xf32, #tpu.memory_space<vmem>>, vector<8x1xf32>
    %c14_43 = arith.constant 14 : index
    %c0_44 = arith.constant 0 : index
    %100 = vector.load %arg3[%c14_43, %c0_44] : memref<128x128xf32, #tpu.memory_space<vmem>>, vector<1x128xf32>
    %101 = vector.broadcast %99 : vector<8x1xf32> to vector<8x128xf32>
    %102 = vector.broadcast %100 : vector<1x128xf32> to vector<8x128xf32>
    %103 = arith.subf %101, %102 : vector<8x128xf32>
    %104 = math.absf %103 : vector<8x128xf32>
    %105 = arith.addf %98, %104 : vector<8x128xf32>
    %c0_45 = arith.constant 0 : index
    %c15 = arith.constant 15 : index
    %106 = vector.load %arg2[%c0_45, %c15] : memref<8x128xf32, #tpu.memory_space<vmem>>, vector<8x1xf32>
    %c15_46 = arith.constant 15 : index
    %c0_47 = arith.constant 0 : index
    %107 = vector.load %arg3[%c15_46, %c0_47] : memref<128x128xf32, #tpu.memory_space<vmem>>, vector<1x128xf32>
    %108 = vector.broadcast %106 : vector<8x1xf32> to vector<8x128xf32>
    %109 = vector.broadcast %107 : vector<1x128xf32> to vector<8x128xf32>
    %110 = arith.subf %108, %109 : vector<8x128xf32>
    %111 = math.absf %110 : vector<8x128xf32>
    %112 = arith.addf %105, %111 : vector<8x128xf32>
    %c0_48 = arith.constant 0 : index
    %c16 = arith.constant 16 : index
    %113 = vector.load %arg2[%c0_48, %c16] : memref<8x128xf32, #tpu.memory_space<vmem>>, vector<8x1xf32>
    %c16_49 = arith.constant 16 : index
    %c0_50 = arith.constant 0 : index
    %114 = vector.load %arg3[%c16_49, %c0_50] : memref<128x128xf32, #tpu.memory_space<vmem>>, vector<1x128xf32>
    %115 = vector.broadcast %113 : vector<8x1xf32> to vector<8x128xf32>
    %116 = vector.broadcast %114 : vector<1x128xf32> to vector<8x128xf32>
    %117 = arith.subf %115, %116 : vector<8x128xf32>
    %118 = math.absf %117 : vector<8x128xf32>
    %119 = arith.addf %112, %118 : vector<8x128xf32>
    %c0_51 = arith.constant 0 : index
    %c17 = arith.constant 17 : index
    %120 = vector.load %arg2[%c0_51, %c17] : memref<8x128xf32, #tpu.memory_space<vmem>>, vector<8x1xf32>
    %c17_52 = arith.constant 17 : index
    %c0_53 = arith.constant 0 : index
    %121 = vector.load %arg3[%c17_52, %c0_53] : memref<128x128xf32, #tpu.memory_space<vmem>>, vector<1x128xf32>
    %122 = vector.broadcast %120 : vector<8x1xf32> to vector<8x128xf32>
    %123 = vector.broadcast %121 : vector<1x128xf32> to vector<8x128xf32>
    %124 = arith.subf %122, %123 : vector<8x128xf32>
    %125 = math.absf %124 : vector<8x128xf32>
    %126 = arith.addf %119, %125 : vector<8x128xf32>
    %c0_54 = arith.constant 0 : index
    %c18 = arith.constant 18 : index
    %127 = vector.load %arg2[%c0_54, %c18] : memref<8x128xf32, #tpu.memory_space<vmem>>, vector<8x1xf32>
    %c18_55 = arith.constant 18 : index
    %c0_56 = arith.constant 0 : index
    %128 = vector.load %arg3[%c18_55, %c0_56] : memref<128x128xf32, #tpu.memory_space<vmem>>, vector<1x128xf32>
    %129 = vector.broadcast %127 : vector<8x1xf32> to vector<8x128xf32>
    %130 = vector.broadcast %128 : vector<1x128xf32> to vector<8x128xf32>
    %131 = arith.subf %129, %130 : vector<8x128xf32>
    %132 = math.absf %131 : vector<8x128xf32>
    %133 = arith.addf %126, %132 : vector<8x128xf32>
    %c0_57 = arith.constant 0 : index
    %c19 = arith.constant 19 : index
    %134 = vector.load %arg2[%c0_57, %c19] : memref<8x128xf32, #tpu.memory_space<vmem>>, vector<8x1xf32>
    %c19_58 = arith.constant 19 : index
    %c0_59 = arith.constant 0 : index
    %135 = vector.load %arg3[%c19_58, %c0_59] : memref<128x128xf32, #tpu.memory_space<vmem>>, vector<1x128xf32>
    %136 = vector.broadcast %134 : vector<8x1xf32> to vector<8x128xf32>
    %137 = vector.broadcast %135 : vector<1x128xf32> to vector<8x128xf32>
    %138 = arith.subf %136, %137 : vector<8x128xf32>
    %139 = math.absf %138 : vector<8x128xf32>
    %140 = arith.addf %133, %139 : vector<8x128xf32>
    %c0_60 = arith.constant 0 : index
    %c20 = arith.constant 20 : index
    %141 = vector.load %arg2[%c0_60, %c20] : memref<8x128xf32, #tpu.memory_space<vmem>>, vector<8x1xf32>
    %c20_61 = arith.constant 20 : index
    %c0_62 = arith.constant 0 : index
    %142 = vector.load %arg3[%c20_61, %c0_62] : memref<128x128xf32, #tpu.memory_space<vmem>>, vector<1x128xf32>
    %143 = vector.broadcast %141 : vector<8x1xf32> to vector<8x128xf32>
    %144 = vector.broadcast %142 : vector<1x128xf32> to vector<8x128xf32>
    %145 = arith.subf %143, %144 : vector<8x128xf32>
    %146 = math.absf %145 : vector<8x128xf32>
    %147 = arith.addf %140, %146 : vector<8x128xf32>
    %c0_63 = arith.constant 0 : index
    %c21 = arith.constant 21 : index
    %148 = vector.load %arg2[%c0_63, %c21] : memref<8x128xf32, #tpu.memory_space<vmem>>, vector<8x1xf32>
    %c21_64 = arith.constant 21 : index
    %c0_65 = arith.constant 0 : index
    %149 = vector.load %arg3[%c21_64, %c0_65] : memref<128x128xf32, #tpu.memory_space<vmem>>, vector<1x128xf32>
    %150 = vector.broadcast %148 : vector<8x1xf32> to vector<8x128xf32>
    %151 = vector.broadcast %149 : vector<1x128xf32> to vector<8x128xf32>
    %152 = arith.subf %150, %151 : vector<8x128xf32>
    %153 = math.absf %152 : vector<8x128xf32>
    %154 = arith.addf %147, %153 : vector<8x128xf32>
    %c0_66 = arith.constant 0 : index
    %c22 = arith.constant 22 : index
    %155 = vector.load %arg2[%c0_66, %c22] : memref<8x128xf32, #tpu.memory_space<vmem>>, vector<8x1xf32>
    %c22_67 = arith.constant 22 : index
    %c0_68 = arith.constant 0 : index
    %156 = vector.load %arg3[%c22_67, %c0_68] : memref<128x128xf32, #tpu.memory_space<vmem>>, vector<1x128xf32>
    %157 = vector.broadcast %155 : vector<8x1xf32> to vector<8x128xf32>
    %158 = vector.broadcast %156 : vector<1x128xf32> to vector<8x128xf32>
    %159 = arith.subf %157, %158 : vector<8x128xf32>
    %160 = math.absf %159 : vector<8x128xf32>
    %161 = arith.addf %154, %160 : vector<8x128xf32>
    %c0_69 = arith.constant 0 : index
    %c23 = arith.constant 23 : index
    %162 = vector.load %arg2[%c0_69, %c23] : memref<8x128xf32, #tpu.memory_space<vmem>>, vector<8x1xf32>
    %c23_70 = arith.constant 23 : index
    %c0_71 = arith.constant 0 : index
    %163 = vector.load %arg3[%c23_70, %c0_71] : memref<128x128xf32, #tpu.memory_space<vmem>>, vector<1x128xf32>
    %164 = vector.broadcast %162 : vector<8x1xf32> to vector<8x128xf32>
    %165 = vector.broadcast %163 : vector<1x128xf32> to vector<8x128xf32>
    %166 = arith.subf %164, %165 : vector<8x128xf32>
    %167 = math.absf %166 : vector<8x128xf32>
    %168 = arith.addf %161, %167 : vector<8x128xf32>
    %c0_72 = arith.constant 0 : index
    %c24 = arith.constant 24 : index
    %169 = vector.load %arg2[%c0_72, %c24] : memref<8x128xf32, #tpu.memory_space<vmem>>, vector<8x1xf32>
    %c24_73 = arith.constant 24 : index
    %c0_74 = arith.constant 0 : index
    %170 = vector.load %arg3[%c24_73, %c0_74] : memref<128x128xf32, #tpu.memory_space<vmem>>, vector<1x128xf32>
    %171 = vector.broadcast %169 : vector<8x1xf32> to vector<8x128xf32>
    %172 = vector.broadcast %170 : vector<1x128xf32> to vector<8x128xf32>
    %173 = arith.subf %171, %172 : vector<8x128xf32>
    %174 = math.absf %173 : vector<8x128xf32>
    %175 = arith.addf %168, %174 : vector<8x128xf32>
    %c0_75 = arith.constant 0 : index
    %c25 = arith.constant 25 : index
    %176 = vector.load %arg2[%c0_75, %c25] : memref<8x128xf32, #tpu.memory_space<vmem>>, vector<8x1xf32>
    %c25_76 = arith.constant 25 : index
    %c0_77 = arith.constant 0 : index
    %177 = vector.load %arg3[%c25_76, %c0_77] : memref<128x128xf32, #tpu.memory_space<vmem>>, vector<1x128xf32>
    %178 = vector.broadcast %176 : vector<8x1xf32> to vector<8x128xf32>
    %179 = vector.broadcast %177 : vector<1x128xf32> to vector<8x128xf32>
    %180 = arith.subf %178, %179 : vector<8x128xf32>
    %181 = math.absf %180 : vector<8x128xf32>
    %182 = arith.addf %175, %181 : vector<8x128xf32>
    %c0_78 = arith.constant 0 : index
    %c26 = arith.constant 26 : index
    %183 = vector.load %arg2[%c0_78, %c26] : memref<8x128xf32, #tpu.memory_space<vmem>>, vector<8x1xf32>
    %c26_79 = arith.constant 26 : index
    %c0_80 = arith.constant 0 : index
    %184 = vector.load %arg3[%c26_79, %c0_80] : memref<128x128xf32, #tpu.memory_space<vmem>>, vector<1x128xf32>
    %185 = vector.broadcast %183 : vector<8x1xf32> to vector<8x128xf32>
    %186 = vector.broadcast %184 : vector<1x128xf32> to vector<8x128xf32>
    %187 = arith.subf %185, %186 : vector<8x128xf32>
    %188 = math.absf %187 : vector<8x128xf32>
    %189 = arith.addf %182, %188 : vector<8x128xf32>
    %c0_81 = arith.constant 0 : index
    %c27 = arith.constant 27 : index
    %190 = vector.load %arg2[%c0_81, %c27] : memref<8x128xf32, #tpu.memory_space<vmem>>, vector<8x1xf32>
    %c27_82 = arith.constant 27 : index
    %c0_83 = arith.constant 0 : index
    %191 = vector.load %arg3[%c27_82, %c0_83] : memref<128x128xf32, #tpu.memory_space<vmem>>, vector<1x128xf32>
    %192 = vector.broadcast %190 : vector<8x1xf32> to vector<8x128xf32>
    %193 = vector.broadcast %191 : vector<1x128xf32> to vector<8x128xf32>
    %194 = arith.subf %192, %193 : vector<8x128xf32>
    %195 = math.absf %194 : vector<8x128xf32>
    %196 = arith.addf %189, %195 : vector<8x128xf32>
    %c0_84 = arith.constant 0 : index
    %c28 = arith.constant 28 : index
    %197 = vector.load %arg2[%c0_84, %c28] : memref<8x128xf32, #tpu.memory_space<vmem>>, vector<8x1xf32>
    %c28_85 = arith.constant 28 : index
    %c0_86 = arith.constant 0 : index
    %198 = vector.load %arg3[%c28_85, %c0_86] : memref<128x128xf32, #tpu.memory_space<vmem>>, vector<1x128xf32>
    %199 = vector.broadcast %197 : vector<8x1xf32> to vector<8x128xf32>
    %200 = vector.broadcast %198 : vector<1x128xf32> to vector<8x128xf32>
    %201 = arith.subf %199, %200 : vector<8x128xf32>
    %202 = math.absf %201 : vector<8x128xf32>
    %203 = arith.addf %196, %202 : vector<8x128xf32>
    %c0_87 = arith.constant 0 : index
    %c29 = arith.constant 29 : index
    %204 = vector.load %arg2[%c0_87, %c29] : memref<8x128xf32, #tpu.memory_space<vmem>>, vector<8x1xf32>
    %c29_88 = arith.constant 29 : index
    %c0_89 = arith.constant 0 : index
    %205 = vector.load %arg3[%c29_88, %c0_89] : memref<128x128xf32, #tpu.memory_space<vmem>>, vector<1x128xf32>
    %206 = vector.broadcast %204 : vector<8x1xf32> to vector<8x128xf32>
    %207 = vector.broadcast %205 : vector<1x128xf32> to vector<8x128xf32>
    %208 = arith.subf %206, %207 : vector<8x128xf32>
    %209 = math.absf %208 : vector<8x128xf32>
    %210 = arith.addf %203, %209 : vector<8x128xf32>
    %c0_90 = arith.constant 0 : index
    %c30 = arith.constant 30 : index
    %211 = vector.load %arg2[%c0_90, %c30] : memref<8x128xf32, #tpu.memory_space<vmem>>, vector<8x1xf32>
    %c30_91 = arith.constant 30 : index
    %c0_92 = arith.constant 0 : index
    %212 = vector.load %arg3[%c30_91, %c0_92] : memref<128x128xf32, #tpu.memory_space<vmem>>, vector<1x128xf32>
    %213 = vector.broadcast %211 : vector<8x1xf32> to vector<8x128xf32>
    %214 = vector.broadcast %212 : vector<1x128xf32> to vector<8x128xf32>
    %215 = arith.subf %213, %214 : vector<8x128xf32>
    %216 = math.absf %215 : vector<8x128xf32>
    %217 = arith.addf %210, %216 : vector<8x128xf32>
    %c0_93 = arith.constant 0 : index
    %c31 = arith.constant 31 : index
    %218 = vector.load %arg2[%c0_93, %c31] : memref<8x128xf32, #tpu.memory_space<vmem>>, vector<8x1xf32>
    %c31_94 = arith.constant 31 : index
    %c0_95 = arith.constant 0 : index
    %219 = vector.load %arg3[%c31_94, %c0_95] : memref<128x128xf32, #tpu.memory_space<vmem>>, vector<1x128xf32>
    %220 = vector.broadcast %218 : vector<8x1xf32> to vector<8x128xf32>
    %221 = vector.broadcast %219 : vector<1x128xf32> to vector<8x128xf32>
    %222 = arith.subf %220, %221 : vector<8x128xf32>
    %223 = math.absf %222 : vector<8x128xf32>
    %224 = arith.addf %217, %223 : vector<8x128xf32>
    %c0_96 = arith.constant 0 : index
    %c32 = arith.constant 32 : index
    %225 = vector.load %arg2[%c0_96, %c32] : memref<8x128xf32, #tpu.memory_space<vmem>>, vector<8x1xf32>
    %c32_97 = arith.constant 32 : index
    %c0_98 = arith.constant 0 : index
    %226 = vector.load %arg3[%c32_97, %c0_98] : memref<128x128xf32, #tpu.memory_space<vmem>>, vector<1x128xf32>
    %227 = vector.broadcast %225 : vector<8x1xf32> to vector<8x128xf32>
    %228 = vector.broadcast %226 : vector<1x128xf32> to vector<8x128xf32>
    %229 = arith.subf %227, %228 : vector<8x128xf32>
    %230 = math.absf %229 : vector<8x128xf32>
    %231 = arith.addf %224, %230 : vector<8x128xf32>
    %c0_99 = arith.constant 0 : index
    %c33 = arith.constant 33 : index
    %232 = vector.load %arg2[%c0_99, %c33] : memref<8x128xf32, #tpu.memory_space<vmem>>, vector<8x1xf32>
    %c33_100 = arith.constant 33 : index
    %c0_101 = arith.constant 0 : index
    %233 = vector.load %arg3[%c33_100, %c0_101] : memref<128x128xf32, #tpu.memory_space<vmem>>, vector<1x128xf32>
    %234 = vector.broadcast %232 : vector<8x1xf32> to vector<8x128xf32>
    %235 = vector.broadcast %233 : vector<1x128xf32> to vector<8x128xf32>
    %236 = arith.subf %234, %235 : vector<8x128xf32>
    %237 = math.absf %236 : vector<8x128xf32>
    %238 = arith.addf %231, %237 : vector<8x128xf32>
    %c0_102 = arith.constant 0 : index
    %c34 = arith.constant 34 : index
    %239 = vector.load %arg2[%c0_102, %c34] : memref<8x128xf32, #tpu.memory_space<vmem>>, vector<8x1xf32>
    %c34_103 = arith.constant 34 : index
    %c0_104 = arith.constant 0 : index
    %240 = vector.load %arg3[%c34_103, %c0_104] : memref<128x128xf32, #tpu.memory_space<vmem>>, vector<1x128xf32>
    %241 = vector.broadcast %239 : vector<8x1xf32> to vector<8x128xf32>
    %242 = vector.broadcast %240 : vector<1x128xf32> to vector<8x128xf32>
    %243 = arith.subf %241, %242 : vector<8x128xf32>
    %244 = math.absf %243 : vector<8x128xf32>
    %245 = arith.addf %238, %244 : vector<8x128xf32>
    %c0_105 = arith.constant 0 : index
    %c35 = arith.constant 35 : index
    %246 = vector.load %arg2[%c0_105, %c35] : memref<8x128xf32, #tpu.memory_space<vmem>>, vector<8x1xf32>
    %c35_106 = arith.constant 35 : index
    %c0_107 = arith.constant 0 : index
    %247 = vector.load %arg3[%c35_106, %c0_107] : memref<128x128xf32, #tpu.memory_space<vmem>>, vector<1x128xf32>
    %248 = vector.broadcast %246 : vector<8x1xf32> to vector<8x128xf32>
    %249 = vector.broadcast %247 : vector<1x128xf32> to vector<8x128xf32>
    %250 = arith.subf %248, %249 : vector<8x128xf32>
    %251 = math.absf %250 : vector<8x128xf32>
    %252 = arith.addf %245, %251 : vector<8x128xf32>
    %c0_108 = arith.constant 0 : index
    %c36 = arith.constant 36 : index
    %253 = vector.load %arg2[%c0_108, %c36] : memref<8x128xf32, #tpu.memory_space<vmem>>, vector<8x1xf32>
    %c36_109 = arith.constant 36 : index
    %c0_110 = arith.constant 0 : index
    %254 = vector.load %arg3[%c36_109, %c0_110] : memref<128x128xf32, #tpu.memory_space<vmem>>, vector<1x128xf32>
    %255 = vector.broadcast %253 : vector<8x1xf32> to vector<8x128xf32>
    %256 = vector.broadcast %254 : vector<1x128xf32> to vector<8x128xf32>
    %257 = arith.subf %255, %256 : vector<8x128xf32>
    %258 = math.absf %257 : vector<8x128xf32>
    %259 = arith.addf %252, %258 : vector<8x128xf32>
    %c0_111 = arith.constant 0 : index
    %c37 = arith.constant 37 : index
    %260 = vector.load %arg2[%c0_111, %c37] : memref<8x128xf32, #tpu.memory_space<vmem>>, vector<8x1xf32>
    %c37_112 = arith.constant 37 : index
    %c0_113 = arith.constant 0 : index
    %261 = vector.load %arg3[%c37_112, %c0_113] : memref<128x128xf32, #tpu.memory_space<vmem>>, vector<1x128xf32>
    %262 = vector.broadcast %260 : vector<8x1xf32> to vector<8x128xf32>
    %263 = vector.broadcast %261 : vector<1x128xf32> to vector<8x128xf32>
    %264 = arith.subf %262, %263 : vector<8x128xf32>
    %265 = math.absf %264 : vector<8x128xf32>
    %266 = arith.addf %259, %265 : vector<8x128xf32>
    %c0_114 = arith.constant 0 : index
    %c38 = arith.constant 38 : index
    %267 = vector.load %arg2[%c0_114, %c38] : memref<8x128xf32, #tpu.memory_space<vmem>>, vector<8x1xf32>
    %c38_115 = arith.constant 38 : index
    %c0_116 = arith.constant 0 : index
    %268 = vector.load %arg3[%c38_115, %c0_116] : memref<128x128xf32, #tpu.memory_space<vmem>>, vector<1x128xf32>
    %269 = vector.broadcast %267 : vector<8x1xf32> to vector<8x128xf32>
    %270 = vector.broadcast %268 : vector<1x128xf32> to vector<8x128xf32>
    %271 = arith.subf %269, %270 : vector<8x128xf32>
    %272 = math.absf %271 : vector<8x128xf32>
    %273 = arith.addf %266, %272 : vector<8x128xf32>
    %c0_117 = arith.constant 0 : index
    %c39 = arith.constant 39 : index
    %274 = vector.load %arg2[%c0_117, %c39] : memref<8x128xf32, #tpu.memory_space<vmem>>, vector<8x1xf32>
    %c39_118 = arith.constant 39 : index
    %c0_119 = arith.constant 0 : index
    %275 = vector.load %arg3[%c39_118, %c0_119] : memref<128x128xf32, #tpu.memory_space<vmem>>, vector<1x128xf32>
    %276 = vector.broadcast %274 : vector<8x1xf32> to vector<8x128xf32>
    %277 = vector.broadcast %275 : vector<1x128xf32> to vector<8x128xf32>
    %278 = arith.subf %276, %277 : vector<8x128xf32>
    %279 = math.absf %278 : vector<8x128xf32>
    %280 = arith.addf %273, %279 : vector<8x128xf32>
    %c0_120 = arith.constant 0 : index
    %c40 = arith.constant 40 : index
    %281 = vector.load %arg2[%c0_120, %c40] : memref<8x128xf32, #tpu.memory_space<vmem>>, vector<8x1xf32>
    %c40_121 = arith.constant 40 : index
    %c0_122 = arith.constant 0 : index
    %282 = vector.load %arg3[%c40_121, %c0_122] : memref<128x128xf32, #tpu.memory_space<vmem>>, vector<1x128xf32>
    %283 = vector.broadcast %281 : vector<8x1xf32> to vector<8x128xf32>
    %284 = vector.broadcast %282 : vector<1x128xf32> to vector<8x128xf32>
    %285 = arith.subf %283, %284 : vector<8x128xf32>
    %286 = math.absf %285 : vector<8x128xf32>
    %287 = arith.addf %280, %286 : vector<8x128xf32>
    %c0_123 = arith.constant 0 : index
    %c41 = arith.constant 41 : index
    %288 = vector.load %arg2[%c0_123, %c41] : memref<8x128xf32, #tpu.memory_space<vmem>>, vector<8x1xf32>
    %c41_124 = arith.constant 41 : index
    %c0_125 = arith.constant 0 : index
    %289 = vector.load %arg3[%c41_124, %c0_125] : memref<128x128xf32, #tpu.memory_space<vmem>>, vector<1x128xf32>
    %290 = vector.broadcast %288 : vector<8x1xf32> to vector<8x128xf32>
    %291 = vector.broadcast %289 : vector<1x128xf32> to vector<8x128xf32>
    %292 = arith.subf %290, %291 : vector<8x128xf32>
    %293 = math.absf %292 : vector<8x128xf32>
    %294 = arith.addf %287, %293 : vector<8x128xf32>
    %c0_126 = arith.constant 0 : index
    %c42 = arith.constant 42 : index
    %295 = vector.load %arg2[%c0_126, %c42] : memref<8x128xf32, #tpu.memory_space<vmem>>, vector<8x1xf32>
    %c42_127 = arith.constant 42 : index
    %c0_128 = arith.constant 0 : index
    %296 = vector.load %arg3[%c42_127, %c0_128] : memref<128x128xf32, #tpu.memory_space<vmem>>, vector<1x128xf32>
    %297 = vector.broadcast %295 : vector<8x1xf32> to vector<8x128xf32>
    %298 = vector.broadcast %296 : vector<1x128xf32> to vector<8x128xf32>
    %299 = arith.subf %297, %298 : vector<8x128xf32>
    %300 = math.absf %299 : vector<8x128xf32>
    %301 = arith.addf %294, %300 : vector<8x128xf32>
    %c0_129 = arith.constant 0 : index
    %c43 = arith.constant 43 : index
    %302 = vector.load %arg2[%c0_129, %c43] : memref<8x128xf32, #tpu.memory_space<vmem>>, vector<8x1xf32>
    %c43_130 = arith.constant 43 : index
    %c0_131 = arith.constant 0 : index
    %303 = vector.load %arg3[%c43_130, %c0_131] : memref<128x128xf32, #tpu.memory_space<vmem>>, vector<1x128xf32>
    %304 = vector.broadcast %302 : vector<8x1xf32> to vector<8x128xf32>
    %305 = vector.broadcast %303 : vector<1x128xf32> to vector<8x128xf32>
    %306 = arith.subf %304, %305 : vector<8x128xf32>
    %307 = math.absf %306 : vector<8x128xf32>
    %308 = arith.addf %301, %307 : vector<8x128xf32>
    %c0_132 = arith.constant 0 : index
    %c44 = arith.constant 44 : index
    %309 = vector.load %arg2[%c0_132, %c44] : memref<8x128xf32, #tpu.memory_space<vmem>>, vector<8x1xf32>
    %c44_133 = arith.constant 44 : index
    %c0_134 = arith.constant 0 : index
    %310 = vector.load %arg3[%c44_133, %c0_134] : memref<128x128xf32, #tpu.memory_space<vmem>>, vector<1x128xf32>
    %311 = vector.broadcast %309 : vector<8x1xf32> to vector<8x128xf32>
    %312 = vector.broadcast %310 : vector<1x128xf32> to vector<8x128xf32>
    %313 = arith.subf %311, %312 : vector<8x128xf32>
    %314 = math.absf %313 : vector<8x128xf32>
    %315 = arith.addf %308, %314 : vector<8x128xf32>
    %c0_135 = arith.constant 0 : index
    %c45 = arith.constant 45 : index
    %316 = vector.load %arg2[%c0_135, %c45] : memref<8x128xf32, #tpu.memory_space<vmem>>, vector<8x1xf32>
    %c45_136 = arith.constant 45 : index
    %c0_137 = arith.constant 0 : index
    %317 = vector.load %arg3[%c45_136, %c0_137] : memref<128x128xf32, #tpu.memory_space<vmem>>, vector<1x128xf32>
    %318 = vector.broadcast %316 : vector<8x1xf32> to vector<8x128xf32>
    %319 = vector.broadcast %317 : vector<1x128xf32> to vector<8x128xf32>
    %320 = arith.subf %318, %319 : vector<8x128xf32>
    %321 = math.absf %320 : vector<8x128xf32>
    %322 = arith.addf %315, %321 : vector<8x128xf32>
    %c0_138 = arith.constant 0 : index
    %c46 = arith.constant 46 : index
    %323 = vector.load %arg2[%c0_138, %c46] : memref<8x128xf32, #tpu.memory_space<vmem>>, vector<8x1xf32>
    %c46_139 = arith.constant 46 : index
    %c0_140 = arith.constant 0 : index
    %324 = vector.load %arg3[%c46_139, %c0_140] : memref<128x128xf32, #tpu.memory_space<vmem>>, vector<1x128xf32>
    %325 = vector.broadcast %323 : vector<8x1xf32> to vector<8x128xf32>
    %326 = vector.broadcast %324 : vector<1x128xf32> to vector<8x128xf32>
    %327 = arith.subf %325, %326 : vector<8x128xf32>
    %328 = math.absf %327 : vector<8x128xf32>
    %329 = arith.addf %322, %328 : vector<8x128xf32>
    %c0_141 = arith.constant 0 : index
    %c47 = arith.constant 47 : index
    %330 = vector.load %arg2[%c0_141, %c47] : memref<8x128xf32, #tpu.memory_space<vmem>>, vector<8x1xf32>
    %c47_142 = arith.constant 47 : index
    %c0_143 = arith.constant 0 : index
    %331 = vector.load %arg3[%c47_142, %c0_143] : memref<128x128xf32, #tpu.memory_space<vmem>>, vector<1x128xf32>
    %332 = vector.broadcast %330 : vector<8x1xf32> to vector<8x128xf32>
    %333 = vector.broadcast %331 : vector<1x128xf32> to vector<8x128xf32>
    %334 = arith.subf %332, %333 : vector<8x128xf32>
    %335 = math.absf %334 : vector<8x128xf32>
    %336 = arith.addf %329, %335 : vector<8x128xf32>
    %c0_144 = arith.constant 0 : index
    %c48 = arith.constant 48 : index
    %337 = vector.load %arg2[%c0_144, %c48] : memref<8x128xf32, #tpu.memory_space<vmem>>, vector<8x1xf32>
    %c48_145 = arith.constant 48 : index
    %c0_146 = arith.constant 0 : index
    %338 = vector.load %arg3[%c48_145, %c0_146] : memref<128x128xf32, #tpu.memory_space<vmem>>, vector<1x128xf32>
    %339 = vector.broadcast %337 : vector<8x1xf32> to vector<8x128xf32>
    %340 = vector.broadcast %338 : vector<1x128xf32> to vector<8x128xf32>
    %341 = arith.subf %339, %340 : vector<8x128xf32>
    %342 = math.absf %341 : vector<8x128xf32>
    %343 = arith.addf %336, %342 : vector<8x128xf32>
    %c0_147 = arith.constant 0 : index
    %c49 = arith.constant 49 : index
    %344 = vector.load %arg2[%c0_147, %c49] : memref<8x128xf32, #tpu.memory_space<vmem>>, vector<8x1xf32>
    %c49_148 = arith.constant 49 : index
    %c0_149 = arith.constant 0 : index
    %345 = vector.load %arg3[%c49_148, %c0_149] : memref<128x128xf32, #tpu.memory_space<vmem>>, vector<1x128xf32>
    %346 = vector.broadcast %344 : vector<8x1xf32> to vector<8x128xf32>
    %347 = vector.broadcast %345 : vector<1x128xf32> to vector<8x128xf32>
    %348 = arith.subf %346, %347 : vector<8x128xf32>
    %349 = math.absf %348 : vector<8x128xf32>
    %350 = arith.addf %343, %349 : vector<8x128xf32>
    %c0_150 = arith.constant 0 : index
    %c50 = arith.constant 50 : index
    %351 = vector.load %arg2[%c0_150, %c50] : memref<8x128xf32, #tpu.memory_space<vmem>>, vector<8x1xf32>
    %c50_151 = arith.constant 50 : index
    %c0_152 = arith.constant 0 : index
    %352 = vector.load %arg3[%c50_151, %c0_152] : memref<128x128xf32, #tpu.memory_space<vmem>>, vector<1x128xf32>
    %353 = vector.broadcast %351 : vector<8x1xf32> to vector<8x128xf32>
    %354 = vector.broadcast %352 : vector<1x128xf32> to vector<8x128xf32>
    %355 = arith.subf %353, %354 : vector<8x128xf32>
    %356 = math.absf %355 : vector<8x128xf32>
    %357 = arith.addf %350, %356 : vector<8x128xf32>
    %c0_153 = arith.constant 0 : index
    %c51 = arith.constant 51 : index
    %358 = vector.load %arg2[%c0_153, %c51] : memref<8x128xf32, #tpu.memory_space<vmem>>, vector<8x1xf32>
    %c51_154 = arith.constant 51 : index
    %c0_155 = arith.constant 0 : index
    %359 = vector.load %arg3[%c51_154, %c0_155] : memref<128x128xf32, #tpu.memory_space<vmem>>, vector<1x128xf32>
    %360 = vector.broadcast %358 : vector<8x1xf32> to vector<8x128xf32>
    %361 = vector.broadcast %359 : vector<1x128xf32> to vector<8x128xf32>
    %362 = arith.subf %360, %361 : vector<8x128xf32>
    %363 = math.absf %362 : vector<8x128xf32>
    %364 = arith.addf %357, %363 : vector<8x128xf32>
    %c0_156 = arith.constant 0 : index
    %c52 = arith.constant 52 : index
    %365 = vector.load %arg2[%c0_156, %c52] : memref<8x128xf32, #tpu.memory_space<vmem>>, vector<8x1xf32>
    %c52_157 = arith.constant 52 : index
    %c0_158 = arith.constant 0 : index
    %366 = vector.load %arg3[%c52_157, %c0_158] : memref<128x128xf32, #tpu.memory_space<vmem>>, vector<1x128xf32>
    %367 = vector.broadcast %365 : vector<8x1xf32> to vector<8x128xf32>
    %368 = vector.broadcast %366 : vector<1x128xf32> to vector<8x128xf32>
    %369 = arith.subf %367, %368 : vector<8x128xf32>
    %370 = math.absf %369 : vector<8x128xf32>
    %371 = arith.addf %364, %370 : vector<8x128xf32>
    %c0_159 = arith.constant 0 : index
    %c53 = arith.constant 53 : index
    %372 = vector.load %arg2[%c0_159, %c53] : memref<8x128xf32, #tpu.memory_space<vmem>>, vector<8x1xf32>
    %c53_160 = arith.constant 53 : index
    %c0_161 = arith.constant 0 : index
    %373 = vector.load %arg3[%c53_160, %c0_161] : memref<128x128xf32, #tpu.memory_space<vmem>>, vector<1x128xf32>
    %374 = vector.broadcast %372 : vector<8x1xf32> to vector<8x128xf32>
    %375 = vector.broadcast %373 : vector<1x128xf32> to vector<8x128xf32>
    %376 = arith.subf %374, %375 : vector<8x128xf32>
    %377 = math.absf %376 : vector<8x128xf32>
    %378 = arith.addf %371, %377 : vector<8x128xf32>
    %c0_162 = arith.constant 0 : index
    %c54 = arith.constant 54 : index
    %379 = vector.load %arg2[%c0_162, %c54] : memref<8x128xf32, #tpu.memory_space<vmem>>, vector<8x1xf32>
    %c54_163 = arith.constant 54 : index
    %c0_164 = arith.constant 0 : index
    %380 = vector.load %arg3[%c54_163, %c0_164] : memref<128x128xf32, #tpu.memory_space<vmem>>, vector<1x128xf32>
    %381 = vector.broadcast %379 : vector<8x1xf32> to vector<8x128xf32>
    %382 = vector.broadcast %380 : vector<1x128xf32> to vector<8x128xf32>
    %383 = arith.subf %381, %382 : vector<8x128xf32>
    %384 = math.absf %383 : vector<8x128xf32>
    %385 = arith.addf %378, %384 : vector<8x128xf32>
    %c0_165 = arith.constant 0 : index
    %c55 = arith.constant 55 : index
    %386 = vector.load %arg2[%c0_165, %c55] : memref<8x128xf32, #tpu.memory_space<vmem>>, vector<8x1xf32>
    %c55_166 = arith.constant 55 : index
    %c0_167 = arith.constant 0 : index
    %387 = vector.load %arg3[%c55_166, %c0_167] : memref<128x128xf32, #tpu.memory_space<vmem>>, vector<1x128xf32>
    %388 = vector.broadcast %386 : vector<8x1xf32> to vector<8x128xf32>
    %389 = vector.broadcast %387 : vector<1x128xf32> to vector<8x128xf32>
    %390 = arith.subf %388, %389 : vector<8x128xf32>
    %391 = math.absf %390 : vector<8x128xf32>
    %392 = arith.addf %385, %391 : vector<8x128xf32>
    %c0_168 = arith.constant 0 : index
    %c56 = arith.constant 56 : index
    %393 = vector.load %arg2[%c0_168, %c56] : memref<8x128xf32, #tpu.memory_space<vmem>>, vector<8x1xf32>
    %c56_169 = arith.constant 56 : index
    %c0_170 = arith.constant 0 : index
    %394 = vector.load %arg3[%c56_169, %c0_170] : memref<128x128xf32, #tpu.memory_space<vmem>>, vector<1x128xf32>
    %395 = vector.broadcast %393 : vector<8x1xf32> to vector<8x128xf32>
    %396 = vector.broadcast %394 : vector<1x128xf32> to vector<8x128xf32>
    %397 = arith.subf %395, %396 : vector<8x128xf32>
    %398 = math.absf %397 : vector<8x128xf32>
    %399 = arith.addf %392, %398 : vector<8x128xf32>
    %c0_171 = arith.constant 0 : index
    %c57 = arith.constant 57 : index
    %400 = vector.load %arg2[%c0_171, %c57] : memref<8x128xf32, #tpu.memory_space<vmem>>, vector<8x1xf32>
    %c57_172 = arith.constant 57 : index
    %c0_173 = arith.constant 0 : index
    %401 = vector.load %arg3[%c57_172, %c0_173] : memref<128x128xf32, #tpu.memory_space<vmem>>, vector<1x128xf32>
    %402 = vector.broadcast %400 : vector<8x1xf32> to vector<8x128xf32>
    %403 = vector.broadcast %401 : vector<1x128xf32> to vector<8x128xf32>
    %404 = arith.subf %402, %403 : vector<8x128xf32>
    %405 = math.absf %404 : vector<8x128xf32>
    %406 = arith.addf %399, %405 : vector<8x128xf32>
    %c0_174 = arith.constant 0 : index
    %c58 = arith.constant 58 : index
    %407 = vector.load %arg2[%c0_174, %c58] : memref<8x128xf32, #tpu.memory_space<vmem>>, vector<8x1xf32>
    %c58_175 = arith.constant 58 : index
    %c0_176 = arith.constant 0 : index
    %408 = vector.load %arg3[%c58_175, %c0_176] : memref<128x128xf32, #tpu.memory_space<vmem>>, vector<1x128xf32>
    %409 = vector.broadcast %407 : vector<8x1xf32> to vector<8x128xf32>
    %410 = vector.broadcast %408 : vector<1x128xf32> to vector<8x128xf32>
    %411 = arith.subf %409, %410 : vector<8x128xf32>
    %412 = math.absf %411 : vector<8x128xf32>
    %413 = arith.addf %406, %412 : vector<8x128xf32>
    %c0_177 = arith.constant 0 : index
    %c59 = arith.constant 59 : index
    %414 = vector.load %arg2[%c0_177, %c59] : memref<8x128xf32, #tpu.memory_space<vmem>>, vector<8x1xf32>
    %c59_178 = arith.constant 59 : index
    %c0_179 = arith.constant 0 : index
    %415 = vector.load %arg3[%c59_178, %c0_179] : memref<128x128xf32, #tpu.memory_space<vmem>>, vector<1x128xf32>
    %416 = vector.broadcast %414 : vector<8x1xf32> to vector<8x128xf32>
    %417 = vector.broadcast %415 : vector<1x128xf32> to vector<8x128xf32>
    %418 = arith.subf %416, %417 : vector<8x128xf32>
    %419 = math.absf %418 : vector<8x128xf32>
    %420 = arith.addf %413, %419 : vector<8x128xf32>
    %c0_180 = arith.constant 0 : index
    %c60 = arith.constant 60 : index
    %421 = vector.load %arg2[%c0_180, %c60] : memref<8x128xf32, #tpu.memory_space<vmem>>, vector<8x1xf32>
    %c60_181 = arith.constant 60 : index
    %c0_182 = arith.constant 0 : index
    %422 = vector.load %arg3[%c60_181, %c0_182] : memref<128x128xf32, #tpu.memory_space<vmem>>, vector<1x128xf32>
    %423 = vector.broadcast %421 : vector<8x1xf32> to vector<8x128xf32>
    %424 = vector.broadcast %422 : vector<1x128xf32> to vector<8x128xf32>
    %425 = arith.subf %423, %424 : vector<8x128xf32>
    %426 = math.absf %425 : vector<8x128xf32>
    %427 = arith.addf %420, %426 : vector<8x128xf32>
    %c0_183 = arith.constant 0 : index
    %c61 = arith.constant 61 : index
    %428 = vector.load %arg2[%c0_183, %c61] : memref<8x128xf32, #tpu.memory_space<vmem>>, vector<8x1xf32>
    %c61_184 = arith.constant 61 : index
    %c0_185 = arith.constant 0 : index
    %429 = vector.load %arg3[%c61_184, %c0_185] : memref<128x128xf32, #tpu.memory_space<vmem>>, vector<1x128xf32>
    %430 = vector.broadcast %428 : vector<8x1xf32> to vector<8x128xf32>
    %431 = vector.broadcast %429 : vector<1x128xf32> to vector<8x128xf32>
    %432 = arith.subf %430, %431 : vector<8x128xf32>
    %433 = math.absf %432 : vector<8x128xf32>
    %434 = arith.addf %427, %433 : vector<8x128xf32>
    %c0_186 = arith.constant 0 : index
    %c62 = arith.constant 62 : index
    %435 = vector.load %arg2[%c0_186, %c62] : memref<8x128xf32, #tpu.memory_space<vmem>>, vector<8x1xf32>
    %c62_187 = arith.constant 62 : index
    %c0_188 = arith.constant 0 : index
    %436 = vector.load %arg3[%c62_187, %c0_188] : memref<128x128xf32, #tpu.memory_space<vmem>>, vector<1x128xf32>
    %437 = vector.broadcast %435 : vector<8x1xf32> to vector<8x128xf32>
    %438 = vector.broadcast %436 : vector<1x128xf32> to vector<8x128xf32>
    %439 = arith.subf %437, %438 : vector<8x128xf32>
    %440 = math.absf %439 : vector<8x128xf32>
    %441 = arith.addf %434, %440 : vector<8x128xf32>
    %c0_189 = arith.constant 0 : index
    %c63 = arith.constant 63 : index
    %442 = vector.load %arg2[%c0_189, %c63] : memref<8x128xf32, #tpu.memory_space<vmem>>, vector<8x1xf32>
    %c63_190 = arith.constant 63 : index
    %c0_191 = arith.constant 0 : index
    %443 = vector.load %arg3[%c63_190, %c0_191] : memref<128x128xf32, #tpu.memory_space<vmem>>, vector<1x128xf32>
    %444 = vector.broadcast %442 : vector<8x1xf32> to vector<8x128xf32>
    %445 = vector.broadcast %443 : vector<1x128xf32> to vector<8x128xf32>
    %446 = arith.subf %444, %445 : vector<8x128xf32>
    %447 = math.absf %446 : vector<8x128xf32>
    %448 = arith.addf %441, %447 : vector<8x128xf32>
    %c0_192 = arith.constant 0 : index
    %c64 = arith.constant 64 : index
    %449 = vector.load %arg2[%c0_192, %c64] : memref<8x128xf32, #tpu.memory_space<vmem>>, vector<8x1xf32>
    %c64_193 = arith.constant 64 : index
    %c0_194 = arith.constant 0 : index
    %450 = vector.load %arg3[%c64_193, %c0_194] : memref<128x128xf32, #tpu.memory_space<vmem>>, vector<1x128xf32>
    %451 = vector.broadcast %449 : vector<8x1xf32> to vector<8x128xf32>
    %452 = vector.broadcast %450 : vector<1x128xf32> to vector<8x128xf32>
    %453 = arith.subf %451, %452 : vector<8x128xf32>
    %454 = math.absf %453 : vector<8x128xf32>
    %455 = arith.addf %448, %454 : vector<8x128xf32>
    %c0_195 = arith.constant 0 : index
    %c65 = arith.constant 65 : index
    %456 = vector.load %arg2[%c0_195, %c65] : memref<8x128xf32, #tpu.memory_space<vmem>>, vector<8x1xf32>
    %c65_196 = arith.constant 65 : index
    %c0_197 = arith.constant 0 : index
    %457 = vector.load %arg3[%c65_196, %c0_197] : memref<128x128xf32, #tpu.memory_space<vmem>>, vector<1x128xf32>
    %458 = vector.broadcast %456 : vector<8x1xf32> to vector<8x128xf32>
    %459 = vector.broadcast %457 : vector<1x128xf32> to vector<8x128xf32>
    %460 = arith.subf %458, %459 : vector<8x128xf32>
    %461 = math.absf %460 : vector<8x128xf32>
    %462 = arith.addf %455, %461 : vector<8x128xf32>
    %c0_198 = arith.constant 0 : index
    %c66 = arith.constant 66 : index
    %463 = vector.load %arg2[%c0_198, %c66] : memref<8x128xf32, #tpu.memory_space<vmem>>, vector<8x1xf32>
    %c66_199 = arith.constant 66 : index
    %c0_200 = arith.constant 0 : index
    %464 = vector.load %arg3[%c66_199, %c0_200] : memref<128x128xf32, #tpu.memory_space<vmem>>, vector<1x128xf32>
    %465 = vector.broadcast %463 : vector<8x1xf32> to vector<8x128xf32>
    %466 = vector.broadcast %464 : vector<1x128xf32> to vector<8x128xf32>
    %467 = arith.subf %465, %466 : vector<8x128xf32>
    %468 = math.absf %467 : vector<8x128xf32>
    %469 = arith.addf %462, %468 : vector<8x128xf32>
    %c0_201 = arith.constant 0 : index
    %c67 = arith.constant 67 : index
    %470 = vector.load %arg2[%c0_201, %c67] : memref<8x128xf32, #tpu.memory_space<vmem>>, vector<8x1xf32>
    %c67_202 = arith.constant 67 : index
    %c0_203 = arith.constant 0 : index
    %471 = vector.load %arg3[%c67_202, %c0_203] : memref<128x128xf32, #tpu.memory_space<vmem>>, vector<1x128xf32>
    %472 = vector.broadcast %470 : vector<8x1xf32> to vector<8x128xf32>
    %473 = vector.broadcast %471 : vector<1x128xf32> to vector<8x128xf32>
    %474 = arith.subf %472, %473 : vector<8x128xf32>
    %475 = math.absf %474 : vector<8x128xf32>
    %476 = arith.addf %469, %475 : vector<8x128xf32>
    %c0_204 = arith.constant 0 : index
    %c68 = arith.constant 68 : index
    %477 = vector.load %arg2[%c0_204, %c68] : memref<8x128xf32, #tpu.memory_space<vmem>>, vector<8x1xf32>
    %c68_205 = arith.constant 68 : index
    %c0_206 = arith.constant 0 : index
    %478 = vector.load %arg3[%c68_205, %c0_206] : memref<128x128xf32, #tpu.memory_space<vmem>>, vector<1x128xf32>
    %479 = vector.broadcast %477 : vector<8x1xf32> to vector<8x128xf32>
    %480 = vector.broadcast %478 : vector<1x128xf32> to vector<8x128xf32>
    %481 = arith.subf %479, %480 : vector<8x128xf32>
    %482 = math.absf %481 : vector<8x128xf32>
    %483 = arith.addf %476, %482 : vector<8x128xf32>
    %c0_207 = arith.constant 0 : index
    %c69 = arith.constant 69 : index
    %484 = vector.load %arg2[%c0_207, %c69] : memref<8x128xf32, #tpu.memory_space<vmem>>, vector<8x1xf32>
    %c69_208 = arith.constant 69 : index
    %c0_209 = arith.constant 0 : index
    %485 = vector.load %arg3[%c69_208, %c0_209] : memref<128x128xf32, #tpu.memory_space<vmem>>, vector<1x128xf32>
    %486 = vector.broadcast %484 : vector<8x1xf32> to vector<8x128xf32>
    %487 = vector.broadcast %485 : vector<1x128xf32> to vector<8x128xf32>
    %488 = arith.subf %486, %487 : vector<8x128xf32>
    %489 = math.absf %488 : vector<8x128xf32>
    %490 = arith.addf %483, %489 : vector<8x128xf32>
    %c0_210 = arith.constant 0 : index
    %c70 = arith.constant 70 : index
    %491 = vector.load %arg2[%c0_210, %c70] : memref<8x128xf32, #tpu.memory_space<vmem>>, vector<8x1xf32>
    %c70_211 = arith.constant 70 : index
    %c0_212 = arith.constant 0 : index
    %492 = vector.load %arg3[%c70_211, %c0_212] : memref<128x128xf32, #tpu.memory_space<vmem>>, vector<1x128xf32>
    %493 = vector.broadcast %491 : vector<8x1xf32> to vector<8x128xf32>
    %494 = vector.broadcast %492 : vector<1x128xf32> to vector<8x128xf32>
    %495 = arith.subf %493, %494 : vector<8x128xf32>
    %496 = math.absf %495 : vector<8x128xf32>
    %497 = arith.addf %490, %496 : vector<8x128xf32>
    %c0_213 = arith.constant 0 : index
    %c71 = arith.constant 71 : index
    %498 = vector.load %arg2[%c0_213, %c71] : memref<8x128xf32, #tpu.memory_space<vmem>>, vector<8x1xf32>
    %c71_214 = arith.constant 71 : index
    %c0_215 = arith.constant 0 : index
    %499 = vector.load %arg3[%c71_214, %c0_215] : memref<128x128xf32, #tpu.memory_space<vmem>>, vector<1x128xf32>
    %500 = vector.broadcast %498 : vector<8x1xf32> to vector<8x128xf32>
    %501 = vector.broadcast %499 : vector<1x128xf32> to vector<8x128xf32>
    %502 = arith.subf %500, %501 : vector<8x128xf32>
    %503 = math.absf %502 : vector<8x128xf32>
    %504 = arith.addf %497, %503 : vector<8x128xf32>
    %c0_216 = arith.constant 0 : index
    %c72 = arith.constant 72 : index
    %505 = vector.load %arg2[%c0_216, %c72] : memref<8x128xf32, #tpu.memory_space<vmem>>, vector<8x1xf32>
    %c72_217 = arith.constant 72 : index
    %c0_218 = arith.constant 0 : index
    %506 = vector.load %arg3[%c72_217, %c0_218] : memref<128x128xf32, #tpu.memory_space<vmem>>, vector<1x128xf32>
    %507 = vector.broadcast %505 : vector<8x1xf32> to vector<8x128xf32>
    %508 = vector.broadcast %506 : vector<1x128xf32> to vector<8x128xf32>
    %509 = arith.subf %507, %508 : vector<8x128xf32>
    %510 = math.absf %509 : vector<8x128xf32>
    %511 = arith.addf %504, %510 : vector<8x128xf32>
    %c0_219 = arith.constant 0 : index
    %c73 = arith.constant 73 : index
    %512 = vector.load %arg2[%c0_219, %c73] : memref<8x128xf32, #tpu.memory_space<vmem>>, vector<8x1xf32>
    %c73_220 = arith.constant 73 : index
    %c0_221 = arith.constant 0 : index
    %513 = vector.load %arg3[%c73_220, %c0_221] : memref<128x128xf32, #tpu.memory_space<vmem>>, vector<1x128xf32>
    %514 = vector.broadcast %512 : vector<8x1xf32> to vector<8x128xf32>
    %515 = vector.broadcast %513 : vector<1x128xf32> to vector<8x128xf32>
    %516 = arith.subf %514, %515 : vector<8x128xf32>
    %517 = math.absf %516 : vector<8x128xf32>
    %518 = arith.addf %511, %517 : vector<8x128xf32>
    %c0_222 = arith.constant 0 : index
    %c74 = arith.constant 74 : index
    %519 = vector.load %arg2[%c0_222, %c74] : memref<8x128xf32, #tpu.memory_space<vmem>>, vector<8x1xf32>
    %c74_223 = arith.constant 74 : index
    %c0_224 = arith.constant 0 : index
    %520 = vector.load %arg3[%c74_223, %c0_224] : memref<128x128xf32, #tpu.memory_space<vmem>>, vector<1x128xf32>
    %521 = vector.broadcast %519 : vector<8x1xf32> to vector<8x128xf32>
    %522 = vector.broadcast %520 : vector<1x128xf32> to vector<8x128xf32>
    %523 = arith.subf %521, %522 : vector<8x128xf32>
    %524 = math.absf %523 : vector<8x128xf32>
    %525 = arith.addf %518, %524 : vector<8x128xf32>
    %c0_225 = arith.constant 0 : index
    %c75 = arith.constant 75 : index
    %526 = vector.load %arg2[%c0_225, %c75] : memref<8x128xf32, #tpu.memory_space<vmem>>, vector<8x1xf32>
    %c75_226 = arith.constant 75 : index
    %c0_227 = arith.constant 0 : index
    %527 = vector.load %arg3[%c75_226, %c0_227] : memref<128x128xf32, #tpu.memory_space<vmem>>, vector<1x128xf32>
    %528 = vector.broadcast %526 : vector<8x1xf32> to vector<8x128xf32>
    %529 = vector.broadcast %527 : vector<1x128xf32> to vector<8x128xf32>
    %530 = arith.subf %528, %529 : vector<8x128xf32>
    %531 = math.absf %530 : vector<8x128xf32>
    %532 = arith.addf %525, %531 : vector<8x128xf32>
    %c0_228 = arith.constant 0 : index
    %c76 = arith.constant 76 : index
    %533 = vector.load %arg2[%c0_228, %c76] : memref<8x128xf32, #tpu.memory_space<vmem>>, vector<8x1xf32>
    %c76_229 = arith.constant 76 : index
    %c0_230 = arith.constant 0 : index
    %534 = vector.load %arg3[%c76_229, %c0_230] : memref<128x128xf32, #tpu.memory_space<vmem>>, vector<1x128xf32>
    %535 = vector.broadcast %533 : vector<8x1xf32> to vector<8x128xf32>
    %536 = vector.broadcast %534 : vector<1x128xf32> to vector<8x128xf32>
    %537 = arith.subf %535, %536 : vector<8x128xf32>
    %538 = math.absf %537 : vector<8x128xf32>
    %539 = arith.addf %532, %538 : vector<8x128xf32>
    %c0_231 = arith.constant 0 : index
    %c77 = arith.constant 77 : index
    %540 = vector.load %arg2[%c0_231, %c77] : memref<8x128xf32, #tpu.memory_space<vmem>>, vector<8x1xf32>
    %c77_232 = arith.constant 77 : index
    %c0_233 = arith.constant 0 : index
    %541 = vector.load %arg3[%c77_232, %c0_233] : memref<128x128xf32, #tpu.memory_space<vmem>>, vector<1x128xf32>
    %542 = vector.broadcast %540 : vector<8x1xf32> to vector<8x128xf32>
    %543 = vector.broadcast %541 : vector<1x128xf32> to vector<8x128xf32>
    %544 = arith.subf %542, %543 : vector<8x128xf32>
    %545 = math.absf %544 : vector<8x128xf32>
    %546 = arith.addf %539, %545 : vector<8x128xf32>
    %c0_234 = arith.constant 0 : index
    %c78 = arith.constant 78 : index
    %547 = vector.load %arg2[%c0_234, %c78] : memref<8x128xf32, #tpu.memory_space<vmem>>, vector<8x1xf32>
    %c78_235 = arith.constant 78 : index
    %c0_236 = arith.constant 0 : index
    %548 = vector.load %arg3[%c78_235, %c0_236] : memref<128x128xf32, #tpu.memory_space<vmem>>, vector<1x128xf32>
    %549 = vector.broadcast %547 : vector<8x1xf32> to vector<8x128xf32>
    %550 = vector.broadcast %548 : vector<1x128xf32> to vector<8x128xf32>
    %551 = arith.subf %549, %550 : vector<8x128xf32>
    %552 = math.absf %551 : vector<8x128xf32>
    %553 = arith.addf %546, %552 : vector<8x128xf32>
    %c0_237 = arith.constant 0 : index
    %c79 = arith.constant 79 : index
    %554 = vector.load %arg2[%c0_237, %c79] : memref<8x128xf32, #tpu.memory_space<vmem>>, vector<8x1xf32>
    %c79_238 = arith.constant 79 : index
    %c0_239 = arith.constant 0 : index
    %555 = vector.load %arg3[%c79_238, %c0_239] : memref<128x128xf32, #tpu.memory_space<vmem>>, vector<1x128xf32>
    %556 = vector.broadcast %554 : vector<8x1xf32> to vector<8x128xf32>
    %557 = vector.broadcast %555 : vector<1x128xf32> to vector<8x128xf32>
    %558 = arith.subf %556, %557 : vector<8x128xf32>
    %559 = math.absf %558 : vector<8x128xf32>
    %560 = arith.addf %553, %559 : vector<8x128xf32>
    %c0_240 = arith.constant 0 : index
    %c80 = arith.constant 80 : index
    %561 = vector.load %arg2[%c0_240, %c80] : memref<8x128xf32, #tpu.memory_space<vmem>>, vector<8x1xf32>
    %c80_241 = arith.constant 80 : index
    %c0_242 = arith.constant 0 : index
    %562 = vector.load %arg3[%c80_241, %c0_242] : memref<128x128xf32, #tpu.memory_space<vmem>>, vector<1x128xf32>
    %563 = vector.broadcast %561 : vector<8x1xf32> to vector<8x128xf32>
    %564 = vector.broadcast %562 : vector<1x128xf32> to vector<8x128xf32>
    %565 = arith.subf %563, %564 : vector<8x128xf32>
    %566 = math.absf %565 : vector<8x128xf32>
    %567 = arith.addf %560, %566 : vector<8x128xf32>
    %c0_243 = arith.constant 0 : index
    %c81 = arith.constant 81 : index
    %568 = vector.load %arg2[%c0_243, %c81] : memref<8x128xf32, #tpu.memory_space<vmem>>, vector<8x1xf32>
    %c81_244 = arith.constant 81 : index
    %c0_245 = arith.constant 0 : index
    %569 = vector.load %arg3[%c81_244, %c0_245] : memref<128x128xf32, #tpu.memory_space<vmem>>, vector<1x128xf32>
    %570 = vector.broadcast %568 : vector<8x1xf32> to vector<8x128xf32>
    %571 = vector.broadcast %569 : vector<1x128xf32> to vector<8x128xf32>
    %572 = arith.subf %570, %571 : vector<8x128xf32>
    %573 = math.absf %572 : vector<8x128xf32>
    %574 = arith.addf %567, %573 : vector<8x128xf32>
    %c0_246 = arith.constant 0 : index
    %c82 = arith.constant 82 : index
    %575 = vector.load %arg2[%c0_246, %c82] : memref<8x128xf32, #tpu.memory_space<vmem>>, vector<8x1xf32>
    %c82_247 = arith.constant 82 : index
    %c0_248 = arith.constant 0 : index
    %576 = vector.load %arg3[%c82_247, %c0_248] : memref<128x128xf32, #tpu.memory_space<vmem>>, vector<1x128xf32>
    %577 = vector.broadcast %575 : vector<8x1xf32> to vector<8x128xf32>
    %578 = vector.broadcast %576 : vector<1x128xf32> to vector<8x128xf32>
    %579 = arith.subf %577, %578 : vector<8x128xf32>
    %580 = math.absf %579 : vector<8x128xf32>
    %581 = arith.addf %574, %580 : vector<8x128xf32>
    %c0_249 = arith.constant 0 : index
    %c83 = arith.constant 83 : index
    %582 = vector.load %arg2[%c0_249, %c83] : memref<8x128xf32, #tpu.memory_space<vmem>>, vector<8x1xf32>
    %c83_250 = arith.constant 83 : index
    %c0_251 = arith.constant 0 : index
    %583 = vector.load %arg3[%c83_250, %c0_251] : memref<128x128xf32, #tpu.memory_space<vmem>>, vector<1x128xf32>
    %584 = vector.broadcast %582 : vector<8x1xf32> to vector<8x128xf32>
    %585 = vector.broadcast %583 : vector<1x128xf32> to vector<8x128xf32>
    %586 = arith.subf %584, %585 : vector<8x128xf32>
    %587 = math.absf %586 : vector<8x128xf32>
    %588 = arith.addf %581, %587 : vector<8x128xf32>
    %c0_252 = arith.constant 0 : index
    %c84 = arith.constant 84 : index
    %589 = vector.load %arg2[%c0_252, %c84] : memref<8x128xf32, #tpu.memory_space<vmem>>, vector<8x1xf32>
    %c84_253 = arith.constant 84 : index
    %c0_254 = arith.constant 0 : index
    %590 = vector.load %arg3[%c84_253, %c0_254] : memref<128x128xf32, #tpu.memory_space<vmem>>, vector<1x128xf32>
    %591 = vector.broadcast %589 : vector<8x1xf32> to vector<8x128xf32>
    %592 = vector.broadcast %590 : vector<1x128xf32> to vector<8x128xf32>
    %593 = arith.subf %591, %592 : vector<8x128xf32>
    %594 = math.absf %593 : vector<8x128xf32>
    %595 = arith.addf %588, %594 : vector<8x128xf32>
    %c0_255 = arith.constant 0 : index
    %c85 = arith.constant 85 : index
    %596 = vector.load %arg2[%c0_255, %c85] : memref<8x128xf32, #tpu.memory_space<vmem>>, vector<8x1xf32>
    %c85_256 = arith.constant 85 : index
    %c0_257 = arith.constant 0 : index
    %597 = vector.load %arg3[%c85_256, %c0_257] : memref<128x128xf32, #tpu.memory_space<vmem>>, vector<1x128xf32>
    %598 = vector.broadcast %596 : vector<8x1xf32> to vector<8x128xf32>
    %599 = vector.broadcast %597 : vector<1x128xf32> to vector<8x128xf32>
    %600 = arith.subf %598, %599 : vector<8x128xf32>
    %601 = math.absf %600 : vector<8x128xf32>
    %602 = arith.addf %595, %601 : vector<8x128xf32>
    %c0_258 = arith.constant 0 : index
    %c86 = arith.constant 86 : index
    %603 = vector.load %arg2[%c0_258, %c86] : memref<8x128xf32, #tpu.memory_space<vmem>>, vector<8x1xf32>
    %c86_259 = arith.constant 86 : index
    %c0_260 = arith.constant 0 : index
    %604 = vector.load %arg3[%c86_259, %c0_260] : memref<128x128xf32, #tpu.memory_space<vmem>>, vector<1x128xf32>
    %605 = vector.broadcast %603 : vector<8x1xf32> to vector<8x128xf32>
    %606 = vector.broadcast %604 : vector<1x128xf32> to vector<8x128xf32>
    %607 = arith.subf %605, %606 : vector<8x128xf32>
    %608 = math.absf %607 : vector<8x128xf32>
    %609 = arith.addf %602, %608 : vector<8x128xf32>
    %c0_261 = arith.constant 0 : index
    %c87 = arith.constant 87 : index
    %610 = vector.load %arg2[%c0_261, %c87] : memref<8x128xf32, #tpu.memory_space<vmem>>, vector<8x1xf32>
    %c87_262 = arith.constant 87 : index
    %c0_263 = arith.constant 0 : index
    %611 = vector.load %arg3[%c87_262, %c0_263] : memref<128x128xf32, #tpu.memory_space<vmem>>, vector<1x128xf32>
    %612 = vector.broadcast %610 : vector<8x1xf32> to vector<8x128xf32>
    %613 = vector.broadcast %611 : vector<1x128xf32> to vector<8x128xf32>
    %614 = arith.subf %612, %613 : vector<8x128xf32>
    %615 = math.absf %614 : vector<8x128xf32>
    %616 = arith.addf %609, %615 : vector<8x128xf32>
    %c0_264 = arith.constant 0 : index
    %c88 = arith.constant 88 : index
    %617 = vector.load %arg2[%c0_264, %c88] : memref<8x128xf32, #tpu.memory_space<vmem>>, vector<8x1xf32>
    %c88_265 = arith.constant 88 : index
    %c0_266 = arith.constant 0 : index
    %618 = vector.load %arg3[%c88_265, %c0_266] : memref<128x128xf32, #tpu.memory_space<vmem>>, vector<1x128xf32>
    %619 = vector.broadcast %617 : vector<8x1xf32> to vector<8x128xf32>
    %620 = vector.broadcast %618 : vector<1x128xf32> to vector<8x128xf32>
    %621 = arith.subf %619, %620 : vector<8x128xf32>
    %622 = math.absf %621 : vector<8x128xf32>
    %623 = arith.addf %616, %622 : vector<8x128xf32>
    %c0_267 = arith.constant 0 : index
    %c89 = arith.constant 89 : index
    %624 = vector.load %arg2[%c0_267, %c89] : memref<8x128xf32, #tpu.memory_space<vmem>>, vector<8x1xf32>
    %c89_268 = arith.constant 89 : index
    %c0_269 = arith.constant 0 : index
    %625 = vector.load %arg3[%c89_268, %c0_269] : memref<128x128xf32, #tpu.memory_space<vmem>>, vector<1x128xf32>
    %626 = vector.broadcast %624 : vector<8x1xf32> to vector<8x128xf32>
    %627 = vector.broadcast %625 : vector<1x128xf32> to vector<8x128xf32>
    %628 = arith.subf %626, %627 : vector<8x128xf32>
    %629 = math.absf %628 : vector<8x128xf32>
    %630 = arith.addf %623, %629 : vector<8x128xf32>
    %c0_270 = arith.constant 0 : index
    %c90 = arith.constant 90 : index
    %631 = vector.load %arg2[%c0_270, %c90] : memref<8x128xf32, #tpu.memory_space<vmem>>, vector<8x1xf32>
    %c90_271 = arith.constant 90 : index
    %c0_272 = arith.constant 0 : index
    %632 = vector.load %arg3[%c90_271, %c0_272] : memref<128x128xf32, #tpu.memory_space<vmem>>, vector<1x128xf32>
    %633 = vector.broadcast %631 : vector<8x1xf32> to vector<8x128xf32>
    %634 = vector.broadcast %632 : vector<1x128xf32> to vector<8x128xf32>
    %635 = arith.subf %633, %634 : vector<8x128xf32>
    %636 = math.absf %635 : vector<8x128xf32>
    %637 = arith.addf %630, %636 : vector<8x128xf32>
    %c0_273 = arith.constant 0 : index
    %c91 = arith.constant 91 : index
    %638 = vector.load %arg2[%c0_273, %c91] : memref<8x128xf32, #tpu.memory_space<vmem>>, vector<8x1xf32>
    %c91_274 = arith.constant 91 : index
    %c0_275 = arith.constant 0 : index
    %639 = vector.load %arg3[%c91_274, %c0_275] : memref<128x128xf32, #tpu.memory_space<vmem>>, vector<1x128xf32>
    %640 = vector.broadcast %638 : vector<8x1xf32> to vector<8x128xf32>
    %641 = vector.broadcast %639 : vector<1x128xf32> to vector<8x128xf32>
    %642 = arith.subf %640, %641 : vector<8x128xf32>
    %643 = math.absf %642 : vector<8x128xf32>
    %644 = arith.addf %637, %643 : vector<8x128xf32>
    %c0_276 = arith.constant 0 : index
    %c92 = arith.constant 92 : index
    %645 = vector.load %arg2[%c0_276, %c92] : memref<8x128xf32, #tpu.memory_space<vmem>>, vector<8x1xf32>
    %c92_277 = arith.constant 92 : index
    %c0_278 = arith.constant 0 : index
    %646 = vector.load %arg3[%c92_277, %c0_278] : memref<128x128xf32, #tpu.memory_space<vmem>>, vector<1x128xf32>
    %647 = vector.broadcast %645 : vector<8x1xf32> to vector<8x128xf32>
    %648 = vector.broadcast %646 : vector<1x128xf32> to vector<8x128xf32>
    %649 = arith.subf %647, %648 : vector<8x128xf32>
    %650 = math.absf %649 : vector<8x128xf32>
    %651 = arith.addf %644, %650 : vector<8x128xf32>
    %c0_279 = arith.constant 0 : index
    %c93 = arith.constant 93 : index
    %652 = vector.load %arg2[%c0_279, %c93] : memref<8x128xf32, #tpu.memory_space<vmem>>, vector<8x1xf32>
    %c93_280 = arith.constant 93 : index
    %c0_281 = arith.constant 0 : index
    %653 = vector.load %arg3[%c93_280, %c0_281] : memref<128x128xf32, #tpu.memory_space<vmem>>, vector<1x128xf32>
    %654 = vector.broadcast %652 : vector<8x1xf32> to vector<8x128xf32>
    %655 = vector.broadcast %653 : vector<1x128xf32> to vector<8x128xf32>
    %656 = arith.subf %654, %655 : vector<8x128xf32>
    %657 = math.absf %656 : vector<8x128xf32>
    %658 = arith.addf %651, %657 : vector<8x128xf32>
    %c0_282 = arith.constant 0 : index
    %c94 = arith.constant 94 : index
    %659 = vector.load %arg2[%c0_282, %c94] : memref<8x128xf32, #tpu.memory_space<vmem>>, vector<8x1xf32>
    %c94_283 = arith.constant 94 : index
    %c0_284 = arith.constant 0 : index
    %660 = vector.load %arg3[%c94_283, %c0_284] : memref<128x128xf32, #tpu.memory_space<vmem>>, vector<1x128xf32>
    %661 = vector.broadcast %659 : vector<8x1xf32> to vector<8x128xf32>
    %662 = vector.broadcast %660 : vector<1x128xf32> to vector<8x128xf32>
    %663 = arith.subf %661, %662 : vector<8x128xf32>
    %664 = math.absf %663 : vector<8x128xf32>
    %665 = arith.addf %658, %664 : vector<8x128xf32>
    %c0_285 = arith.constant 0 : index
    %c95 = arith.constant 95 : index
    %666 = vector.load %arg2[%c0_285, %c95] : memref<8x128xf32, #tpu.memory_space<vmem>>, vector<8x1xf32>
    %c95_286 = arith.constant 95 : index
    %c0_287 = arith.constant 0 : index
    %667 = vector.load %arg3[%c95_286, %c0_287] : memref<128x128xf32, #tpu.memory_space<vmem>>, vector<1x128xf32>
    %668 = vector.broadcast %666 : vector<8x1xf32> to vector<8x128xf32>
    %669 = vector.broadcast %667 : vector<1x128xf32> to vector<8x128xf32>
    %670 = arith.subf %668, %669 : vector<8x128xf32>
    %671 = math.absf %670 : vector<8x128xf32>
    %672 = arith.addf %665, %671 : vector<8x128xf32>
    %c0_288 = arith.constant 0 : index
    %c96 = arith.constant 96 : index
    %673 = vector.load %arg2[%c0_288, %c96] : memref<8x128xf32, #tpu.memory_space<vmem>>, vector<8x1xf32>
    %c96_289 = arith.constant 96 : index
    %c0_290 = arith.constant 0 : index
    %674 = vector.load %arg3[%c96_289, %c0_290] : memref<128x128xf32, #tpu.memory_space<vmem>>, vector<1x128xf32>
    %675 = vector.broadcast %673 : vector<8x1xf32> to vector<8x128xf32>
    %676 = vector.broadcast %674 : vector<1x128xf32> to vector<8x128xf32>
    %677 = arith.subf %675, %676 : vector<8x128xf32>
    %678 = math.absf %677 : vector<8x128xf32>
    %679 = arith.addf %672, %678 : vector<8x128xf32>
    %c0_291 = arith.constant 0 : index
    %c97 = arith.constant 97 : index
    %680 = vector.load %arg2[%c0_291, %c97] : memref<8x128xf32, #tpu.memory_space<vmem>>, vector<8x1xf32>
    %c97_292 = arith.constant 97 : index
    %c0_293 = arith.constant 0 : index
    %681 = vector.load %arg3[%c97_292, %c0_293] : memref<128x128xf32, #tpu.memory_space<vmem>>, vector<1x128xf32>
    %682 = vector.broadcast %680 : vector<8x1xf32> to vector<8x128xf32>
    %683 = vector.broadcast %681 : vector<1x128xf32> to vector<8x128xf32>
    %684 = arith.subf %682, %683 : vector<8x128xf32>
    %685 = math.absf %684 : vector<8x128xf32>
    %686 = arith.addf %679, %685 : vector<8x128xf32>
    %c0_294 = arith.constant 0 : index
    %c98 = arith.constant 98 : index
    %687 = vector.load %arg2[%c0_294, %c98] : memref<8x128xf32, #tpu.memory_space<vmem>>, vector<8x1xf32>
    %c98_295 = arith.constant 98 : index
    %c0_296 = arith.constant 0 : index
    %688 = vector.load %arg3[%c98_295, %c0_296] : memref<128x128xf32, #tpu.memory_space<vmem>>, vector<1x128xf32>
    %689 = vector.broadcast %687 : vector<8x1xf32> to vector<8x128xf32>
    %690 = vector.broadcast %688 : vector<1x128xf32> to vector<8x128xf32>
    %691 = arith.subf %689, %690 : vector<8x128xf32>
    %692 = math.absf %691 : vector<8x128xf32>
    %693 = arith.addf %686, %692 : vector<8x128xf32>
    %c0_297 = arith.constant 0 : index
    %c99 = arith.constant 99 : index
    %694 = vector.load %arg2[%c0_297, %c99] : memref<8x128xf32, #tpu.memory_space<vmem>>, vector<8x1xf32>
    %c99_298 = arith.constant 99 : index
    %c0_299 = arith.constant 0 : index
    %695 = vector.load %arg3[%c99_298, %c0_299] : memref<128x128xf32, #tpu.memory_space<vmem>>, vector<1x128xf32>
    %696 = vector.broadcast %694 : vector<8x1xf32> to vector<8x128xf32>
    %697 = vector.broadcast %695 : vector<1x128xf32> to vector<8x128xf32>
    %698 = arith.subf %696, %697 : vector<8x128xf32>
    %699 = math.absf %698 : vector<8x128xf32>
    %700 = arith.addf %693, %699 : vector<8x128xf32>
    %c0_300 = arith.constant 0 : index
    %c100 = arith.constant 100 : index
    %701 = vector.load %arg2[%c0_300, %c100] : memref<8x128xf32, #tpu.memory_space<vmem>>, vector<8x1xf32>
    %c100_301 = arith.constant 100 : index
    %c0_302 = arith.constant 0 : index
    %702 = vector.load %arg3[%c100_301, %c0_302] : memref<128x128xf32, #tpu.memory_space<vmem>>, vector<1x128xf32>
    %703 = vector.broadcast %701 : vector<8x1xf32> to vector<8x128xf32>
    %704 = vector.broadcast %702 : vector<1x128xf32> to vector<8x128xf32>
    %705 = arith.subf %703, %704 : vector<8x128xf32>
    %706 = math.absf %705 : vector<8x128xf32>
    %707 = arith.addf %700, %706 : vector<8x128xf32>
    %c0_303 = arith.constant 0 : index
    %c101 = arith.constant 101 : index
    %708 = vector.load %arg2[%c0_303, %c101] : memref<8x128xf32, #tpu.memory_space<vmem>>, vector<8x1xf32>
    %c101_304 = arith.constant 101 : index
    %c0_305 = arith.constant 0 : index
    %709 = vector.load %arg3[%c101_304, %c0_305] : memref<128x128xf32, #tpu.memory_space<vmem>>, vector<1x128xf32>
    %710 = vector.broadcast %708 : vector<8x1xf32> to vector<8x128xf32>
    %711 = vector.broadcast %709 : vector<1x128xf32> to vector<8x128xf32>
    %712 = arith.subf %710, %711 : vector<8x128xf32>
    %713 = math.absf %712 : vector<8x128xf32>
    %714 = arith.addf %707, %713 : vector<8x128xf32>
    %c0_306 = arith.constant 0 : index
    %c102 = arith.constant 102 : index
    %715 = vector.load %arg2[%c0_306, %c102] : memref<8x128xf32, #tpu.memory_space<vmem>>, vector<8x1xf32>
    %c102_307 = arith.constant 102 : index
    %c0_308 = arith.constant 0 : index
    %716 = vector.load %arg3[%c102_307, %c0_308] : memref<128x128xf32, #tpu.memory_space<vmem>>, vector<1x128xf32>
    %717 = vector.broadcast %715 : vector<8x1xf32> to vector<8x128xf32>
    %718 = vector.broadcast %716 : vector<1x128xf32> to vector<8x128xf32>
    %719 = arith.subf %717, %718 : vector<8x128xf32>
    %720 = math.absf %719 : vector<8x128xf32>
    %721 = arith.addf %714, %720 : vector<8x128xf32>
    %c0_309 = arith.constant 0 : index
    %c103 = arith.constant 103 : index
    %722 = vector.load %arg2[%c0_309, %c103] : memref<8x128xf32, #tpu.memory_space<vmem>>, vector<8x1xf32>
    %c103_310 = arith.constant 103 : index
    %c0_311 = arith.constant 0 : index
    %723 = vector.load %arg3[%c103_310, %c0_311] : memref<128x128xf32, #tpu.memory_space<vmem>>, vector<1x128xf32>
    %724 = vector.broadcast %722 : vector<8x1xf32> to vector<8x128xf32>
    %725 = vector.broadcast %723 : vector<1x128xf32> to vector<8x128xf32>
    %726 = arith.subf %724, %725 : vector<8x128xf32>
    %727 = math.absf %726 : vector<8x128xf32>
    %728 = arith.addf %721, %727 : vector<8x128xf32>
    %c0_312 = arith.constant 0 : index
    %c104 = arith.constant 104 : index
    %729 = vector.load %arg2[%c0_312, %c104] : memref<8x128xf32, #tpu.memory_space<vmem>>, vector<8x1xf32>
    %c104_313 = arith.constant 104 : index
    %c0_314 = arith.constant 0 : index
    %730 = vector.load %arg3[%c104_313, %c0_314] : memref<128x128xf32, #tpu.memory_space<vmem>>, vector<1x128xf32>
    %731 = vector.broadcast %729 : vector<8x1xf32> to vector<8x128xf32>
    %732 = vector.broadcast %730 : vector<1x128xf32> to vector<8x128xf32>
    %733 = arith.subf %731, %732 : vector<8x128xf32>
    %734 = math.absf %733 : vector<8x128xf32>
    %735 = arith.addf %728, %734 : vector<8x128xf32>
    %c0_315 = arith.constant 0 : index
    %c105 = arith.constant 105 : index
    %736 = vector.load %arg2[%c0_315, %c105] : memref<8x128xf32, #tpu.memory_space<vmem>>, vector<8x1xf32>
    %c105_316 = arith.constant 105 : index
    %c0_317 = arith.constant 0 : index
    %737 = vector.load %arg3[%c105_316, %c0_317] : memref<128x128xf32, #tpu.memory_space<vmem>>, vector<1x128xf32>
    %738 = vector.broadcast %736 : vector<8x1xf32> to vector<8x128xf32>
    %739 = vector.broadcast %737 : vector<1x128xf32> to vector<8x128xf32>
    %740 = arith.subf %738, %739 : vector<8x128xf32>
    %741 = math.absf %740 : vector<8x128xf32>
    %742 = arith.addf %735, %741 : vector<8x128xf32>
    %c0_318 = arith.constant 0 : index
    %c106 = arith.constant 106 : index
    %743 = vector.load %arg2[%c0_318, %c106] : memref<8x128xf32, #tpu.memory_space<vmem>>, vector<8x1xf32>
    %c106_319 = arith.constant 106 : index
    %c0_320 = arith.constant 0 : index
    %744 = vector.load %arg3[%c106_319, %c0_320] : memref<128x128xf32, #tpu.memory_space<vmem>>, vector<1x128xf32>
    %745 = vector.broadcast %743 : vector<8x1xf32> to vector<8x128xf32>
    %746 = vector.broadcast %744 : vector<1x128xf32> to vector<8x128xf32>
    %747 = arith.subf %745, %746 : vector<8x128xf32>
    %748 = math.absf %747 : vector<8x128xf32>
    %749 = arith.addf %742, %748 : vector<8x128xf32>
    %c0_321 = arith.constant 0 : index
    %c107 = arith.constant 107 : index
    %750 = vector.load %arg2[%c0_321, %c107] : memref<8x128xf32, #tpu.memory_space<vmem>>, vector<8x1xf32>
    %c107_322 = arith.constant 107 : index
    %c0_323 = arith.constant 0 : index
    %751 = vector.load %arg3[%c107_322, %c0_323] : memref<128x128xf32, #tpu.memory_space<vmem>>, vector<1x128xf32>
    %752 = vector.broadcast %750 : vector<8x1xf32> to vector<8x128xf32>
    %753 = vector.broadcast %751 : vector<1x128xf32> to vector<8x128xf32>
    %754 = arith.subf %752, %753 : vector<8x128xf32>
    %755 = math.absf %754 : vector<8x128xf32>
    %756 = arith.addf %749, %755 : vector<8x128xf32>
    %c0_324 = arith.constant 0 : index
    %c108 = arith.constant 108 : index
    %757 = vector.load %arg2[%c0_324, %c108] : memref<8x128xf32, #tpu.memory_space<vmem>>, vector<8x1xf32>
    %c108_325 = arith.constant 108 : index
    %c0_326 = arith.constant 0 : index
    %758 = vector.load %arg3[%c108_325, %c0_326] : memref<128x128xf32, #tpu.memory_space<vmem>>, vector<1x128xf32>
    %759 = vector.broadcast %757 : vector<8x1xf32> to vector<8x128xf32>
    %760 = vector.broadcast %758 : vector<1x128xf32> to vector<8x128xf32>
    %761 = arith.subf %759, %760 : vector<8x128xf32>
    %762 = math.absf %761 : vector<8x128xf32>
    %763 = arith.addf %756, %762 : vector<8x128xf32>
    %c0_327 = arith.constant 0 : index
    %c109 = arith.constant 109 : index
    %764 = vector.load %arg2[%c0_327, %c109] : memref<8x128xf32, #tpu.memory_space<vmem>>, vector<8x1xf32>
    %c109_328 = arith.constant 109 : index
    %c0_329 = arith.constant 0 : index
    %765 = vector.load %arg3[%c109_328, %c0_329] : memref<128x128xf32, #tpu.memory_space<vmem>>, vector<1x128xf32>
    %766 = vector.broadcast %764 : vector<8x1xf32> to vector<8x128xf32>
    %767 = vector.broadcast %765 : vector<1x128xf32> to vector<8x128xf32>
    %768 = arith.subf %766, %767 : vector<8x128xf32>
    %769 = math.absf %768 : vector<8x128xf32>
    %770 = arith.addf %763, %769 : vector<8x128xf32>
    %c0_330 = arith.constant 0 : index
    %c110 = arith.constant 110 : index
    %771 = vector.load %arg2[%c0_330, %c110] : memref<8x128xf32, #tpu.memory_space<vmem>>, vector<8x1xf32>
    %c110_331 = arith.constant 110 : index
    %c0_332 = arith.constant 0 : index
    %772 = vector.load %arg3[%c110_331, %c0_332] : memref<128x128xf32, #tpu.memory_space<vmem>>, vector<1x128xf32>
    %773 = vector.broadcast %771 : vector<8x1xf32> to vector<8x128xf32>
    %774 = vector.broadcast %772 : vector<1x128xf32> to vector<8x128xf32>
    %775 = arith.subf %773, %774 : vector<8x128xf32>
    %776 = math.absf %775 : vector<8x128xf32>
    %777 = arith.addf %770, %776 : vector<8x128xf32>
    %c0_333 = arith.constant 0 : index
    %c111 = arith.constant 111 : index
    %778 = vector.load %arg2[%c0_333, %c111] : memref<8x128xf32, #tpu.memory_space<vmem>>, vector<8x1xf32>
    %c111_334 = arith.constant 111 : index
    %c0_335 = arith.constant 0 : index
    %779 = vector.load %arg3[%c111_334, %c0_335] : memref<128x128xf32, #tpu.memory_space<vmem>>, vector<1x128xf32>
    %780 = vector.broadcast %778 : vector<8x1xf32> to vector<8x128xf32>
    %781 = vector.broadcast %779 : vector<1x128xf32> to vector<8x128xf32>
    %782 = arith.subf %780, %781 : vector<8x128xf32>
    %783 = math.absf %782 : vector<8x128xf32>
    %784 = arith.addf %777, %783 : vector<8x128xf32>
    %c0_336 = arith.constant 0 : index
    %c112 = arith.constant 112 : index
    %785 = vector.load %arg2[%c0_336, %c112] : memref<8x128xf32, #tpu.memory_space<vmem>>, vector<8x1xf32>
    %c112_337 = arith.constant 112 : index
    %c0_338 = arith.constant 0 : index
    %786 = vector.load %arg3[%c112_337, %c0_338] : memref<128x128xf32, #tpu.memory_space<vmem>>, vector<1x128xf32>
    %787 = vector.broadcast %785 : vector<8x1xf32> to vector<8x128xf32>
    %788 = vector.broadcast %786 : vector<1x128xf32> to vector<8x128xf32>
    %789 = arith.subf %787, %788 : vector<8x128xf32>
    %790 = math.absf %789 : vector<8x128xf32>
    %791 = arith.addf %784, %790 : vector<8x128xf32>
    %c0_339 = arith.constant 0 : index
    %c113 = arith.constant 113 : index
    %792 = vector.load %arg2[%c0_339, %c113] : memref<8x128xf32, #tpu.memory_space<vmem>>, vector<8x1xf32>
    %c113_340 = arith.constant 113 : index
    %c0_341 = arith.constant 0 : index
    %793 = vector.load %arg3[%c113_340, %c0_341] : memref<128x128xf32, #tpu.memory_space<vmem>>, vector<1x128xf32>
    %794 = vector.broadcast %792 : vector<8x1xf32> to vector<8x128xf32>
    %795 = vector.broadcast %793 : vector<1x128xf32> to vector<8x128xf32>
    %796 = arith.subf %794, %795 : vector<8x128xf32>
    %797 = math.absf %796 : vector<8x128xf32>
    %798 = arith.addf %791, %797 : vector<8x128xf32>
    %c0_342 = arith.constant 0 : index
    %c114 = arith.constant 114 : index
    %799 = vector.load %arg2[%c0_342, %c114] : memref<8x128xf32, #tpu.memory_space<vmem>>, vector<8x1xf32>
    %c114_343 = arith.constant 114 : index
    %c0_344 = arith.constant 0 : index
    %800 = vector.load %arg3[%c114_343, %c0_344] : memref<128x128xf32, #tpu.memory_space<vmem>>, vector<1x128xf32>
    %801 = vector.broadcast %799 : vector<8x1xf32> to vector<8x128xf32>
    %802 = vector.broadcast %800 : vector<1x128xf32> to vector<8x128xf32>
    %803 = arith.subf %801, %802 : vector<8x128xf32>
    %804 = math.absf %803 : vector<8x128xf32>
    %805 = arith.addf %798, %804 : vector<8x128xf32>
    %c0_345 = arith.constant 0 : index
    %c115 = arith.constant 115 : index
    %806 = vector.load %arg2[%c0_345, %c115] : memref<8x128xf32, #tpu.memory_space<vmem>>, vector<8x1xf32>
    %c115_346 = arith.constant 115 : index
    %c0_347 = arith.constant 0 : index
    %807 = vector.load %arg3[%c115_346, %c0_347] : memref<128x128xf32, #tpu.memory_space<vmem>>, vector<1x128xf32>
    %808 = vector.broadcast %806 : vector<8x1xf32> to vector<8x128xf32>
    %809 = vector.broadcast %807 : vector<1x128xf32> to vector<8x128xf32>
    %810 = arith.subf %808, %809 : vector<8x128xf32>
    %811 = math.absf %810 : vector<8x128xf32>
    %812 = arith.addf %805, %811 : vector<8x128xf32>
    %c0_348 = arith.constant 0 : index
    %c116 = arith.constant 116 : index
    %813 = vector.load %arg2[%c0_348, %c116] : memref<8x128xf32, #tpu.memory_space<vmem>>, vector<8x1xf32>
    %c116_349 = arith.constant 116 : index
    %c0_350 = arith.constant 0 : index
    %814 = vector.load %arg3[%c116_349, %c0_350] : memref<128x128xf32, #tpu.memory_space<vmem>>, vector<1x128xf32>
    %815 = vector.broadcast %813 : vector<8x1xf32> to vector<8x128xf32>
    %816 = vector.broadcast %814 : vector<1x128xf32> to vector<8x128xf32>
    %817 = arith.subf %815, %816 : vector<8x128xf32>
    %818 = math.absf %817 : vector<8x128xf32>
    %819 = arith.addf %812, %818 : vector<8x128xf32>
    %c0_351 = arith.constant 0 : index
    %c117 = arith.constant 117 : index
    %820 = vector.load %arg2[%c0_351, %c117] : memref<8x128xf32, #tpu.memory_space<vmem>>, vector<8x1xf32>
    %c117_352 = arith.constant 117 : index
    %c0_353 = arith.constant 0 : index
    %821 = vector.load %arg3[%c117_352, %c0_353] : memref<128x128xf32, #tpu.memory_space<vmem>>, vector<1x128xf32>
    %822 = vector.broadcast %820 : vector<8x1xf32> to vector<8x128xf32>
    %823 = vector.broadcast %821 : vector<1x128xf32> to vector<8x128xf32>
    %824 = arith.subf %822, %823 : vector<8x128xf32>
    %825 = math.absf %824 : vector<8x128xf32>
    %826 = arith.addf %819, %825 : vector<8x128xf32>
    %c0_354 = arith.constant 0 : index
    %c118 = arith.constant 118 : index
    %827 = vector.load %arg2[%c0_354, %c118] : memref<8x128xf32, #tpu.memory_space<vmem>>, vector<8x1xf32>
    %c118_355 = arith.constant 118 : index
    %c0_356 = arith.constant 0 : index
    %828 = vector.load %arg3[%c118_355, %c0_356] : memref<128x128xf32, #tpu.memory_space<vmem>>, vector<1x128xf32>
    %829 = vector.broadcast %827 : vector<8x1xf32> to vector<8x128xf32>
    %830 = vector.broadcast %828 : vector<1x128xf32> to vector<8x128xf32>
    %831 = arith.subf %829, %830 : vector<8x128xf32>
    %832 = math.absf %831 : vector<8x128xf32>
    %833 = arith.addf %826, %832 : vector<8x128xf32>
    %c0_357 = arith.constant 0 : index
    %c119 = arith.constant 119 : index
    %834 = vector.load %arg2[%c0_357, %c119] : memref<8x128xf32, #tpu.memory_space<vmem>>, vector<8x1xf32>
    %c119_358 = arith.constant 119 : index
    %c0_359 = arith.constant 0 : index
    %835 = vector.load %arg3[%c119_358, %c0_359] : memref<128x128xf32, #tpu.memory_space<vmem>>, vector<1x128xf32>
    %836 = vector.broadcast %834 : vector<8x1xf32> to vector<8x128xf32>
    %837 = vector.broadcast %835 : vector<1x128xf32> to vector<8x128xf32>
    %838 = arith.subf %836, %837 : vector<8x128xf32>
    %839 = math.absf %838 : vector<8x128xf32>
    %840 = arith.addf %833, %839 : vector<8x128xf32>
    %c0_360 = arith.constant 0 : index
    %c120 = arith.constant 120 : index
    %841 = vector.load %arg2[%c0_360, %c120] : memref<8x128xf32, #tpu.memory_space<vmem>>, vector<8x1xf32>
    %c120_361 = arith.constant 120 : index
    %c0_362 = arith.constant 0 : index
    %842 = vector.load %arg3[%c120_361, %c0_362] : memref<128x128xf32, #tpu.memory_space<vmem>>, vector<1x128xf32>
    %843 = vector.broadcast %841 : vector<8x1xf32> to vector<8x128xf32>
    %844 = vector.broadcast %842 : vector<1x128xf32> to vector<8x128xf32>
    %845 = arith.subf %843, %844 : vector<8x128xf32>
    %846 = math.absf %845 : vector<8x128xf32>
    %847 = arith.addf %840, %846 : vector<8x128xf32>
    %c0_363 = arith.constant 0 : index
    %c121 = arith.constant 121 : index
    %848 = vector.load %arg2[%c0_363, %c121] : memref<8x128xf32, #tpu.memory_space<vmem>>, vector<8x1xf32>
    %c121_364 = arith.constant 121 : index
    %c0_365 = arith.constant 0 : index
    %849 = vector.load %arg3[%c121_364, %c0_365] : memref<128x128xf32, #tpu.memory_space<vmem>>, vector<1x128xf32>
    %850 = vector.broadcast %848 : vector<8x1xf32> to vector<8x128xf32>
    %851 = vector.broadcast %849 : vector<1x128xf32> to vector<8x128xf32>
    %852 = arith.subf %850, %851 : vector<8x128xf32>
    %853 = math.absf %852 : vector<8x128xf32>
    %854 = arith.addf %847, %853 : vector<8x128xf32>
    %c0_366 = arith.constant 0 : index
    %c122 = arith.constant 122 : index
    %855 = vector.load %arg2[%c0_366, %c122] : memref<8x128xf32, #tpu.memory_space<vmem>>, vector<8x1xf32>
    %c122_367 = arith.constant 122 : index
    %c0_368 = arith.constant 0 : index
    %856 = vector.load %arg3[%c122_367, %c0_368] : memref<128x128xf32, #tpu.memory_space<vmem>>, vector<1x128xf32>
    %857 = vector.broadcast %855 : vector<8x1xf32> to vector<8x128xf32>
    %858 = vector.broadcast %856 : vector<1x128xf32> to vector<8x128xf32>
    %859 = arith.subf %857, %858 : vector<8x128xf32>
    %860 = math.absf %859 : vector<8x128xf32>
    %861 = arith.addf %854, %860 : vector<8x128xf32>
    %c0_369 = arith.constant 0 : index
    %c123 = arith.constant 123 : index
    %862 = vector.load %arg2[%c0_369, %c123] : memref<8x128xf32, #tpu.memory_space<vmem>>, vector<8x1xf32>
    %c123_370 = arith.constant 123 : index
    %c0_371 = arith.constant 0 : index
    %863 = vector.load %arg3[%c123_370, %c0_371] : memref<128x128xf32, #tpu.memory_space<vmem>>, vector<1x128xf32>
    %864 = vector.broadcast %862 : vector<8x1xf32> to vector<8x128xf32>
    %865 = vector.broadcast %863 : vector<1x128xf32> to vector<8x128xf32>
    %866 = arith.subf %864, %865 : vector<8x128xf32>
    %867 = math.absf %866 : vector<8x128xf32>
    %868 = arith.addf %861, %867 : vector<8x128xf32>
    %c0_372 = arith.constant 0 : index
    %c124 = arith.constant 124 : index
    %869 = vector.load %arg2[%c0_372, %c124] : memref<8x128xf32, #tpu.memory_space<vmem>>, vector<8x1xf32>
    %c124_373 = arith.constant 124 : index
    %c0_374 = arith.constant 0 : index
    %870 = vector.load %arg3[%c124_373, %c0_374] : memref<128x128xf32, #tpu.memory_space<vmem>>, vector<1x128xf32>
    %871 = vector.broadcast %869 : vector<8x1xf32> to vector<8x128xf32>
    %872 = vector.broadcast %870 : vector<1x128xf32> to vector<8x128xf32>
    %873 = arith.subf %871, %872 : vector<8x128xf32>
    %874 = math.absf %873 : vector<8x128xf32>
    %875 = arith.addf %868, %874 : vector<8x128xf32>
    %c0_375 = arith.constant 0 : index
    %c125 = arith.constant 125 : index
    %876 = vector.load %arg2[%c0_375, %c125] : memref<8x128xf32, #tpu.memory_space<vmem>>, vector<8x1xf32>
    %c125_376 = arith.constant 125 : index
    %c0_377 = arith.constant 0 : index
    %877 = vector.load %arg3[%c125_376, %c0_377] : memref<128x128xf32, #tpu.memory_space<vmem>>, vector<1x128xf32>
    %878 = vector.broadcast %876 : vector<8x1xf32> to vector<8x128xf32>
    %879 = vector.broadcast %877 : vector<1x128xf32> to vector<8x128xf32>
    %880 = arith.subf %878, %879 : vector<8x128xf32>
    %881 = math.absf %880 : vector<8x128xf32>
    %882 = arith.addf %875, %881 : vector<8x128xf32>
    %c0_378 = arith.constant 0 : index
    %c126 = arith.constant 126 : index
    %883 = vector.load %arg2[%c0_378, %c126] : memref<8x128xf32, #tpu.memory_space<vmem>>, vector<8x1xf32>
    %c126_379 = arith.constant 126 : index
    %c0_380 = arith.constant 0 : index
    %884 = vector.load %arg3[%c126_379, %c0_380] : memref<128x128xf32, #tpu.memory_space<vmem>>, vector<1x128xf32>
    %885 = vector.broadcast %883 : vector<8x1xf32> to vector<8x128xf32>
    %886 = vector.broadcast %884 : vector<1x128xf32> to vector<8x128xf32>
    %887 = arith.subf %885, %886 : vector<8x128xf32>
    %888 = math.absf %887 : vector<8x128xf32>
    %889 = arith.addf %882, %888 : vector<8x128xf32>
    %c0_381 = arith.constant 0 : index
    %c127 = arith.constant 127 : index
    %890 = vector.load %arg2[%c0_381, %c127] : memref<8x128xf32, #tpu.memory_space<vmem>>, vector<8x1xf32>
    %c127_382 = arith.constant 127 : index
    %c0_383 = arith.constant 0 : index
    %891 = vector.load %arg3[%c127_382, %c0_383] : memref<128x128xf32, #tpu.memory_space<vmem>>, vector<1x128xf32>
    %892 = vector.broadcast %890 : vector<8x1xf32> to vector<8x128xf32>
    %893 = vector.broadcast %891 : vector<1x128xf32> to vector<8x128xf32>
    %894 = arith.subf %892, %893 : vector<8x128xf32>
    %895 = math.absf %894 : vector<8x128xf32>
    %896 = arith.addf %889, %895 : vector<8x128xf32>
    %cst_384 = arith.constant 9.000000e+00 : f32
    %897 = vector.broadcast %cst_384 : f32 to vector<8x128xf32>
    %898 = arith.subf %897, %896 : vector<8x128xf32>
    %899 = arith.negf %898 : vector<8x128xf32>
    %900 = math.exp %899 : vector<8x128xf32>
    %cst_385 = arith.constant 1.000000e+00 : f32
    %901 = vector.broadcast %cst_385 : f32 to vector<8x128xf32>
    %902 = arith.addf %901, %900 : vector<8x128xf32>
    %903 = arith.divf %901, %902 : vector<8x128xf32>
    %c0_386 = arith.constant 0 : index
    %c0_387 = arith.constant 0 : index
    %904 = vector.load %arg4[%c0_386, %c0_387] : memref<8x128xf32, #tpu.memory_space<vmem>>, vector<8x128xf32>
    tpu.vector_store %arg4[%c0_386, %c0_387], %903 {strides = array<i32>} : memref<8x128xf32, #tpu.memory_space<vmem>>, vector<8x128xf32>,
    return
  }
  func.func @transform_0(%arg0: i32, %arg1: i32) -> (i32, i32) {
    %c0_i32 = arith.constant 0 : i32
    %c0_i32_0 = arith.constant 0 : i32
    return %arg0, %c0_i32 : i32, i32
  }
  func.func @transform_1(%arg0: i32, %arg1: i32) -> (i32, i32) {
    %c0_i32 = arith.constant 0 : i32
    %c0_i32_0 = arith.constant 0 : i32
    return %c0_i32, %arg1 : i32, i32
  }
  func.func @transform_2(%arg0: i32, %arg1: i32) -> (i32, i32) {
    %c0_i32 = arith.constant 0 : i32
    return %arg0, %arg1 : i32, i32
  }
}

</mosaic_0001>

<bundles_post_ra>
// kernel: tpu_custom_call.1
= control target key start
LH: loop header
LB: loop body
LE: loop exit
PB: predicated region body
PF: predicated region fallthrough
CT: control target
= control target key end

     0   :  { %7 = vsyncpa [#allocation3], 0  ;;  %s3112_s0 = inlined_call_operand.hbm [shape: f32[8,128], index: 0, kind: input, shape index: {}]   ;;  %s3113_s1 = inlined_call_operand.hbm [shape: f32[128,256], index: 1, kind: input, shape index: {}]   ;;  %s3114_s2 = inlined_call_operand.hbm [shape: f32[8,256], index: 2, kind: output, shape index: {}]  }
   0x1   :  { %8 = vsyncpa [#allocation6], 0 }
   0x2   :  { %10 = vsyncpa [#allocation6 + $0x1], 0 }
   0x3   :  { %11 = vsyncpa [#allocation4], 0 }
   0x4   :  { %13 = vsyncpa [#allocation4 + $0x1], 0  ;;  %s2628_s9 = smov 0   ;;  %s2630_s10 = smov 0  }
   0x5   :  { %s2632_s11 = smov 0   ;;  %s2634_s12 = smov 0  }
   0x6   :  { %s2636_s13 = smov 0   ;;  %s2638_s14 = smov 0  }
   0x7 LB: > { %s1851_s15 = sadd.s32 4294967295, %s2477_s14   ;;  %s1852_s16 = sadd.s32 4294967294, %s2477_s14   ;;  %s2477_s14 = sphi %s2638_s14, %s19_s14   ;;  %s2473_s13 = sphi %s2636_s13, %s3142_s13   ;;  %s2469_s12 = sphi %s2634_s12, %s3141_s12   ;;  %s2465_s11 = sphi %s2632_s11, %s3140_s11   ;;  %s2461_s10 = sphi %s2630_s10, %s3139_s10   ;;  %s2457_s9 = sphi %s2628_s9, %s3138_s9  }
   0x8   : > { %s64_s17 = sadd.s32 1, %s2465_s11  ;;  %p71_p0 = scmp.ne.s32.totalorder %s2465_s11, %s2461_s10 }
   0x9   : > { %p72_p1 = scmp.eq.s32.totalorder %s2477_s14, 0  ;;  %p77_p2 = scmp.ne.s32.totalorder %s2461_s10, %s2457_s9 }
   0xa   : > { %p2666_p3 = scmp.eq.s32.totalorder %s1851_s15, 0  ;;  %p103_p4 = scmp.eq.s32.totalorder %s1851_s15, 1 }
   0xb   : > { %p2670_p5 = por %p72_p1, %p71_p0  ;;  %p109_p6 = scmp.eq.s32.totalorder %s1852_s16, 1 }
   0xc   : > { %s3121_s18 = scalar_select %p2666_p3, 1, 0 }
   0xd   : > { %p2676_p7 = por %p2666_p3, %p77_p2  ;;  %p2680_p8 = por %p103_p4, %p71_p0 }
   0xe   : > { %p2684_p9 = por %p109_p6, %p77_p2  ;;  %p1853_p10 = scmp.ge.s32.totalorder %s2477_s14, 1 }
   0xf   : > { %s3123_s20 = scalar_select %p2676_p7, 1, 0 }
  0x10   : > { %s3124_s21 = scalar_select %p2680_p8, 1, 0 }
  0x11   : > { %s3125_s22 = scalar_select %p2684_p9, 1, 0 }
  0x12   : > { %p116_p11 = scmp.lt.s32.totalorder %s2477_s14, 3  ;;  %s2479_s24 = smov [#allocation2]  }
  0x13   : > { %s131_s25 = sshll.u32 %s2479_s24, 4  ;;  %p2016_p1 = scmp.lt.s32.totalorder %s2477_s14, 2  ;;  %s132_s25 = int_to_ptr.vmem [resolvable:$true] %s131_s25 }
  0x14   : > { %p2691_p13 = pnand %p1853_p10, %p116_p11  ;;  %s28_s28 = sadd.s32 1, %s2473_s13 }
  0x15   : > { %p2700_p4 = pnand %p2016_p1, %p2670_p5  ;;  %p2711_p6 = scmp.ge.s32.totalorder %s28_s28, 2 }
  0x16   : > { %s3126_s23 = scalar_select %p2691_p13, 1, 0 }
  0x17   : > { %p2003_p0 = pneg %p2691_p13  ;;  %s142_s30 = sand.u32 1, %s2465_s11  }
  0x18   : > { %s3127_s26 = scalar_select %p2700_p4, 1, 0 }
  0x19   : > { %p2706_p2 = pnand %p2003_p0, %p2666_p3  ;;  %s2333_s5 = scalar_lea.hbm %s3112_s0, 128 }
  0x1a   : > { %s3129_s29 = scalar_select %p2711_p6, 1, 0 }
  0x1b   : > { %p2334_p5 = scmp.ne.s32.totalorder %s3112_s0, %s2333_s5  ;;  %p2335_p10 = pneg %p2706_p2 }
  0x1c   : > { %p2340_p0 = scmp.lt.u32.totalorder %s2333_s5, %s3112_s0 }
  0x1d   : > { %p2336_p11 = pnand %p2335_p10, %p2334_p5 }
  0x1f   : > { %p2337_p1 = pneg %p2336_p11 }
  0x21   : > { %p2342_p12 = pnand %p2340_p0, %p2337_p1 }
  0x23   : > { %2345 = shalt.err (!%p2342_p12)
}
  0x24   : > { %s2346_s16 = scalar_lea.vmem %s132_s25, 128  ;;  %p2354_p3 = scmp.lt.s32.totalorder %s132_s25, %s132_s25 }
  0x25   : > { %p2347_p9 = scmp.ne.s32.totalorder %s132_s25, %s2346_s16  ;;  %p2355_p13 = scmp.lt.s32.totalorder %s2346_s16, %s2346_s16 }
  0x27   : > { %p2349_p8 = pnand %p2347_p9, %p2335_p10  ;;  %p2356_p4 = por %p2355_p13, %p2354_p3 }
  0x29   : > { %p2350_p7 = pneg %p2349_p8 }
  0x2b   : > { %p2357_p6 = pnand %p2356_p4, %p2350_p7 }
  0x2d   : > { %2360 = shalt.err (!%p2357_p6)
}
  0x2e   : > { %2006 = dma.hbm_to_vmem [thread:$0]  (!%p2706_p2), %s3112_s0, 128, %s132_s25, [#allocation3]  }
  0x2f   : > { %p3130_p9 = scmp.ne.s32.totalorder %s3129_s29, 0  ;;  %s1856_s3 = sshll.u32 %s142_s30, 7 }
  0x30   : > { %s1857_s5 = sshll.u32 %s2473_s13, 7  ;;  %s146_s8 = scalar_lea.vmem [#allocation5], %s1856_s3 }
  0x31   : > { %s3144_s28 = smov (%p3130_p9, %s28_s28), 0  ;;  %s2742_s7 = scalar_lea.hbm %s3113_s1, %s1857_s5 }
  0x32   : > { %s61_s4 = ssub.s32 %s2473_s13, %s3144_s28  ;;  %s152_s15 = sshll.u32 %s146_s8, 4  ;;  %s2749_s15 = int_to_ptr.vmem [resolvable:$true] %s152_s15 }
  0x33   : > { %p62_p3 = scmp.eq.s32.totalorder %s61_s4, 0  ;;  %s2751_s29 = scalar_lea.sflag [#allocation6], %s142_s30 }
  0x34   : > { %s2361_s16 = scalar_lea.hbm %s2742_s7, 2048  ;;  %p3131_p8 = scmp.ne.s32.totalorder %s3127_s26, 0 }
  0x35   : > { %s2747_s25 = scalar_select %p62_p3, %s2465_s11, %s64_s17  }
  0x36   : > { %p2362_p7 = scmp.ne.s32.totalorder %s2742_s7, %s2361_s16  ;;  %p2363_p12 = pneg %p3131_p8 }
  0x37   : > { %s2366_s3 = scalar_lea.hbm %s3113_s1, 4096  ;;  %p2367_p2 = scmp.lt.u32.totalorder %s2742_s7, %s3113_s1 }
  0x38   : > { %p2364_p13 = pnand %p2363_p12, %p2362_p7  ;;  %p2368_p6 = scmp.lt.u32.totalorder %s2366_s3, %s2361_s16 }
  0x39   : > { %p2370_p10 = scmp.lt.u32.totalorder %s2361_s16, %s2742_s7 }
  0x3a   : > { %p2365_p4 = pneg %p2364_p13  ;;  %p2369_p5 = por %p2368_p6, %p2367_p2 }
  0x3c   : > { %p2371_p11 = por %p2370_p10, %p2369_p5 }
  0x3e   : > { %p2372_p1 = pnand %p2371_p11, %p2365_p4 }
  0x40   : > { %2375 = shalt.err (!%p2372_p1)
}
  0x41   : > { %s2376_s17 = scalar_lea.vmem %s2749_s15, 2048  ;;  %s2480_s30 = smov [#allocation5]  }
  0x42   : > { %p2377_p0 = scmp.ne.s32.totalorder %s2749_s15, %s2376_s17  ;;  %s2381_s27 = sshll.u32 %s2480_s30, 4  ;;  %s2382_s27 = int_to_ptr.vmem [resolvable:$false] %s2381_s27 }
  0x43   : > { %s2383_s6 = scalar_lea.vmem %s2382_s27, 4096  ;;  %p2384_p7 = scmp.lt.s32.totalorder %s2749_s15, %s2382_s27 }
  0x44   : > { %p2379_p9 = pnand %p2377_p0, %p2363_p12  ;;  %p2385_p13 = scmp.lt.s32.totalorder %s2383_s6, %s2376_s17 }
  0x46   : > { %p2380_p3 = pneg %p2379_p9  ;;  %p2386_p2 = por %p2385_p13, %p2384_p7 }
  0x48   : > { %p2387_p6 = pnand %p2386_p2, %p2380_p3 }
  0x4a   : > { %2390 = shalt.err (!%p2387_p6)
}
  0x4b   : > { %s2481_s8 = smov 256   ;;  %s2482_s16 = smov 128  }
  0x4c   : > { %s2483_s19 = smov 8   ;;  %p3132_p12 = scmp.ne.s32.totalorder %s3126_s23, 0 }
  0x4d   : > { %2010 = dma.hbm_to_vmem [thread:$0]  (!%p3131_p8), %s2742_s7, 2048, %s2749_s15, %s2751_s29, %s2481_s8, %s2482_s16, %s2483_s19  }
  0x4e   : > { %164 = sbr.rel (%p3132_p12) target bundleno = 688 (0x2b0), region = 28  ;;  %p3133_p4 = scmp.ne.s32.totalorder (!%p3132_p12), %s3121_s18, 0 }
  0x55   : > { %2444 = dma.done.wait (%p3133_p4), [#allocation3], 128  }
  0x56   : > { %2446 = vsyncadd (%p3133_p4), [#allocation3], 4294967168  ;;  %s2786_s24 = sand.u32 1, %s2461_s10   ;;  %p3134_p8 = scmp.ne.s32.totalorder %s3123_s20, 0 }
  0x57   : > { %s1860_s3 = sshll.u32 %s2786_s24, 7  ;;  %s171_s4 = scalar_lea.sflag [#allocation6], %s2786_s24 }
  0x58   : > { %s2790_s5 = scalar_lea.vmem [#allocation5], %s1860_s3 }
  0x59   : > { %2448 = dma.done.wait (%p3134_p8), %s171_s4, 2048  }
  0x5a   : > { %2450 = vsyncadd (%p3134_p8), %s171_s4, 4294965248  ;;  %v2484_v0 = vmov 2   ;;  %v2485_v1 = vmov 0   ;;  %v2796_v2 = vld [vmem:[#allocation2] sm:$0xff]  ;;  %v2486_v3 = vmov 3   ;;  %v2487_v4 = vmov 1  }
  0x5b   : > { %2201 = vset.pattern.permute.xlu1 %v2484_v0  ;;  %2199 = vset.pattern.permute.xlu0 %v2485_v1  ;;  %v2488_v5 = vmov 4   ;;  %v2489_v6 = vmov 5   ;;  %v2490_v7 = vmov 6   ;;  %v2491_v8 = vmov 8   ;;  %v1862_v53 = vld [vmem:[%s2790_s5] ss:$0 sm:$0xff] }
  0x5c   : > { %223 = vperm.xlu1 %2201, %v2796_v2   ;;  %199 = vperm.xlu0 %2199, %v2796_v2   ;;  %v2492_v9 = vmov 7   ;;  %v2493_v10 = vmov 11   ;;  %v2494_v11 = vmov 9   ;;  %v2495_v12 = vmov 14   ;;  %v1864_v59 = vld [vmem:[%s2790_s5 + $0x2] ss:$0 sm:$0xff] }
  0x5d   : > { %v2496_v13 = vmov 10   ;;  %v2497_v14 = vmov 17   ;;  %v2498_v15 = vmov 12   ;;  %v2499_v16 = vmov 20   ;;  %v1863_v60 = vld [vmem:[%s2790_s5 + $0x1] ss:$0 sm:$0xff] }
  0x5e   : > { %v2500_v17 = vmov 13   ;;  %v2501_v18 = vmov 23   ;;  %v2502_v19 = vmov 15   ;;  %v2503_v20 = vmov 26   ;;  %v1865_v61 = vld [vmem:[%s2790_s5 + $0x3] ss:$0 sm:$0xff] }
  0x5f   : > { %v2504_v21 = vmov 16   ;;  %v2505_v22 = vmov 29   ;;  %v2506_v23 = vmov 18   ;;  %v2507_v24 = vmov 32   ;;  %s1861_s18 = sshll.u32 %s2786_s24, 3  ;;  %s1992_s20 = sshll.u32 %s2469_s12, 7 }
  0x60   : > { %2202 = vset.pattern.permute.xlu1 %v2486_v3  ;;  %2200 = vset.pattern.permute.xlu0 %v2487_v4  ;;  %v2508_v25 = vmov 19   ;;  %v2509_v26 = vmov 35   ;;  %v2510_v27 = vmov 21   ;;  %v2511_v28 = vmov 38   ;;  %s194_s23 = scalar_lea.vmem [#allocation7], %s1861_s18  ;;  %s3063_s29 = scalar_lea.hbm %s3114_s2, %s1992_s20 }
  0x61   : > { %235 = vperm.xlu1 %2202, %v2796_v2   ;;  %211 = vperm.xlu0 %2200, %v2796_v2   ;;  %v2512_v29 = vmov 22   ;;  %v2513_v30 = vmov 41   ;;  %v2514_v31 = vmov 24   ;;  %v2515_v32 = vmov 44   ;;  %s1757_s26 = sshll.u32 %s194_s23, 4  ;;  %s1742_s17 = scalar_lea.sflag [#allocation4], %s2786_s24  ;;  %s3065_s26 = int_to_ptr.vmem [resolvable:$true] %s1757_s26 }
  0x62   : > { %v2516_v33 = vmov 25   ;;  %v2517_v34 = vmov 47   ;;  %v2518_v35 = vmov 27   ;;  %v2519_v36 = vmov 50   ;;  %s2391_s30 = scalar_lea.vmem %s3065_s26, 128  ;;  %p3135_p10 = scmp.ne.s32.totalorder %s3124_s21, 0 }
  0x63   : > { %v2520_v37 = vmov 28   ;;  %v2521_v38 = vmov 53   ;;  %v2522_v39 = vmov 30   ;;  %v2523_v40 = vmov 56   ;;  %p2392_p5 = scmp.ne.s32.totalorder %s3065_s26, %s2391_s30  ;;  %s2612_s12 = smov [#allocation7]  }
  0x64   : > { %v2524_v41 = vmov 31   ;;  %v2525_v42 = vmov 59   ;;  %v2526_v43 = vmov 33   ;;  %v2527_v44 = vmov 62   ;;  %s2395_s27 = sshll.u32 %s2612_s12, 4  ;;  %s2396_s27 = int_to_ptr.vmem [resolvable:$false] %s2395_s27 }
  0x65   : > { %2203 = vset.pattern.permute.xlu1 %v2488_v5  ;;  %2204 = vset.pattern.permute.xlu0 %v2489_v6  ;;  %v2528_v45 = vmov 34   ;;  %v2529_v46 = vmov 65   ;;  %v2530_v47 = vmov 36   ;;  %v2531_v48 = vmov 68   ;;  %p2393_p11 = pnand %p2392_p5, %p3135_p10  ;;  %s2397_s6 = scalar_lea.vmem %s2396_s27, 256 }
  0x66   : > { %247 = vperm.xlu1 %2203, %v2796_v2   ;;  %259 = vperm.xlu0 %2204, %v2796_v2   ;;  %v2532_v49 = vmov 37   ;;  %v2533_v50 = vmov 71   ;;  %v2534_v51 = vmov 39   ;;  %v2535_v52 = vmov 74   ;;  %p2398_p0 = scmp.lt.s32.totalorder %s3065_s26, %s2396_s27  ;;  %p2399_p9 = scmp.lt.s32.totalorder %s2397_s6, %s2391_s30 }
  0x67   : > { %v2536_v57 = vmov 40   ;;  %v2537_v58 = vmov 77   ;;  %v2538_v4 = vmov 42   ;;  %v2539_v5 = vmov 80   ;;  %p2394_p1 = pneg %p2393_p11 }
  0x68   : > { %p2400_p3 = por %p2399_p9, %p2398_p0 }
  0x6a   : > { %2205 = vset.pattern.permute.xlu1 %v2490_v7  ;;  %2207 = vset.pattern.permute.xlu0 %v2491_v8  ;;  %v1866_v8 = vld [vmem:[%s2790_s5 + $0x4] ss:$0 sm:$0xff]  ;;  %p2401_p7 = pnand %p2400_p3, %p2394_p1 }
  0x6b   : > { %271 = vperm.xlu1 %2205, %v2796_v2   ;;  %295 = vperm.xlu0 %2207, %v2796_v2  }
  0x6f   : > { %2206 = vset.pattern.permute.xlu1 %v2492_v9  ;;  %2210 = vset.pattern.permute.xlu0 %v2493_v10  ;;  %v1867_v9 = vld [vmem:[%s2790_s5 + $0x5] ss:$0 sm:$0xff] }
  0x70   : > { %283 = vperm.xlu1 %2206, %v2796_v2   ;;  %331 = vperm.xlu0 %2210, %v2796_v2  }
  0x74   : > { %2208 = vset.pattern.permute.xlu1 %v2494_v11  ;;  %2213 = vset.pattern.permute.xlu0 %v2495_v12 }
  0x75   : > { %307 = vperm.xlu1 %2208, %v2796_v2   ;;  %367 = vperm.xlu0 %2213, %v2796_v2  }
  0x79   : > { %2209 = vset.pattern.permute.xlu1 %v2496_v13  ;;  %2216 = vset.pattern.permute.xlu0 %v2497_v14 }
  0x7a   : > { %319 = vperm.xlu1 %2209, %v2796_v2   ;;  %403 = vperm.xlu0 %2216, %v2796_v2  }
  0x7e   : > { %2211 = vset.pattern.permute.xlu1 %v2498_v15  ;;  %2219 = vset.pattern.permute.xlu0 %v2499_v16 }
  0x7f   : > { %343 = vperm.xlu1 %2211, %v2796_v2   ;;  %439 = vperm.xlu0 %2219, %v2796_v2  }
  0x83   : > { %2212 = vset.pattern.permute.xlu1 %v2500_v17  ;;  %2222 = vset.pattern.permute.xlu0 %v2501_v18  ;;  %v2540_v18 = vmov 43  }
  0x84   : > { %355 = vperm.xlu1 %2212, %v2796_v2   ;;  %475 = vperm.xlu0 %2222, %v2796_v2  }
  0x88   : > { %2214 = vset.pattern.permute.xlu1 %v2502_v19  ;;  %2225 = vset.pattern.permute.xlu0 %v2503_v20  ;;  %v1868_v20 = vld [vmem:[%s2790_s5 + $0x6] ss:$0 sm:$0xff] }
  0x89   : > { %379 = vperm.xlu1 %2214, %v2796_v2   ;;  %511 = vperm.xlu0 %2225, %v2796_v2  }
  0x8d   : > { %2215 = vset.pattern.permute.xlu1 %v2504_v21  ;;  %2228 = vset.pattern.permute.xlu0 %v2505_v22 }
  0x8e   : > { %391 = vperm.xlu1 %2215, %v2796_v2   ;;  %547 = vperm.xlu0 %2228, %v2796_v2  }
  0x92   : > { %2217 = vset.pattern.permute.xlu1 %v2506_v23  ;;  %2231 = vset.pattern.permute.xlu0 %v2507_v24 }
  0x93   : > { %415 = vperm.xlu1 %2217, %v2796_v2   ;;  %583 = vperm.xlu0 %2231, %v2796_v2  }
  0x97   : > { %2218 = vset.pattern.permute.xlu1 %v2508_v25  ;;  %2234 = vset.pattern.permute.xlu0 %v2509_v26  ;;  %v2541_v26 = vmov 83  }
  0x98   : > { %427 = vperm.xlu1 %2218, %v2796_v2   ;;  %619 = vperm.xlu0 %2234, %v2796_v2  }
  0x9c   : > { %2220 = vset.pattern.permute.xlu1 %v2510_v27  ;;  %2237 = vset.pattern.permute.xlu0 %v2511_v28  ;;  %v2542_v27 = vmov 45   ;;  %v1869_v28 = vld [vmem:[%s2790_s5 + $0x7] ss:$0 sm:$0xff] }
  0x9d   : > { %451 = vperm.xlu1 %2220, %v2796_v2   ;;  %655 = vperm.xlu0 %2237, %v2796_v2  }
  0xa1   : > { %2221 = vset.pattern.permute.xlu1 %v2512_v29  ;;  %2240 = vset.pattern.permute.xlu0 %v2513_v30  ;;  %v1870_v29 = vld [vmem:[%s2790_s5 + $0x8] ss:$0 sm:$0xff] }
  0xa2   : > { %463 = vperm.xlu1 %2221, %v2796_v2   ;;  %691 = vperm.xlu0 %2240, %v2796_v2  }
  0xa6   : > { %2223 = vset.pattern.permute.xlu1 %v2514_v31  ;;  %2243 = vset.pattern.permute.xlu0 %v2515_v32 }
  0xa7   : > { %487 = vperm.xlu1 %2223, %v2796_v2   ;;  %727 = vperm.xlu0 %2243, %v2796_v2  }
  0xab   : > { %2224 = vset.pattern.permute.xlu1 %v2516_v33  ;;  %2246 = vset.pattern.permute.xlu0 %v2517_v34 }
  0xac   : > { %499 = vperm.xlu1 %2224, %v2796_v2   ;;  %763 = vperm.xlu0 %2246, %v2796_v2  }
  0xb0   : > { %2226 = vset.pattern.permute.xlu1 %v2518_v35  ;;  %2249 = vset.pattern.permute.xlu0 %v2519_v36  ;;  %v2543_v36 = vmov 46  }
  0xb1   : > { %523 = vperm.xlu1 %2226, %v2796_v2   ;;  %799 = vperm.xlu0 %2249, %v2796_v2  }
  0xb5   : > { %2227 = vset.pattern.permute.xlu1 %v2520_v37  ;;  %2252 = vset.pattern.permute.xlu0 %v2521_v38 }
  0xb6   : > { %535 = vperm.xlu1 %2227, %v2796_v2   ;;  %835 = vperm.xlu0 %2252, %v2796_v2  }
  0xba   : > { %2229 = vset.pattern.permute.xlu1 %v2522_v39  ;;  %2255 = vset.pattern.permute.xlu0 %v2523_v40  ;;  %v1871_v39 = vld [vmem:[%s2790_s5 + $0x9] ss:$0 sm:$0xff] }
  0xbb   : > { %559 = vperm.xlu1 %2229, %v2796_v2   ;;  %871 = vperm.xlu0 %2255, %v2796_v2  }
  0xbf   : > { %2230 = vset.pattern.permute.xlu1 %v2524_v41  ;;  %2258 = vset.pattern.permute.xlu0 %v2525_v42 }
  0xc0   : > { %571 = vperm.xlu1 %2230, %v2796_v2   ;;  %907 = vperm.xlu0 %2258, %v2796_v2  }
  0xc4   : > { %2232 = vset.pattern.permute.xlu1 %v2526_v43  ;;  %2261 = vset.pattern.permute.xlu0 %v2527_v44  ;;  %v2544_v44 = vmov 86  }
  0xc5   : > { %595 = vperm.xlu1 %2232, %v2796_v2   ;;  %943 = vperm.xlu0 %2261, %v2796_v2  }
  0xc9   : > { %2233 = vset.pattern.permute.xlu1 %v2528_v45  ;;  %2264 = vset.pattern.permute.xlu0 %v2529_v46  ;;  %v2545_v45 = vmov 48   ;;  %v1872_v46 = vld [vmem:[%s2790_s5 + $0xa] ss:$0 sm:$0xff] }
  0xca   : > { %607 = vperm.xlu1 %2233, %v2796_v2   ;;  %979 = vperm.xlu0 %2264, %v2796_v2  }
  0xce   : > { %2235 = vset.pattern.permute.xlu1 %v2530_v47  ;;  %2267 = vset.pattern.permute.xlu0 %v2531_v48  ;;  %v1873_v47 = vld [vmem:[%s2790_s5 + $0xb] ss:$0 sm:$0xff] }
  0xcf   : > { %631 = vperm.xlu1 %2235, %v2796_v2   ;;  %1015 = vperm.xlu0 %2267, %v2796_v2  }
  0xd3   : > { %2236 = vset.pattern.permute.xlu1 %v2532_v49  ;;  %2270 = vset.pattern.permute.xlu0 %v2533_v50 }
  0xd4   : > { %643 = vperm.xlu1 %2236, %v2796_v2   ;;  %1051 = vperm.xlu0 %2270, %v2796_v2  }
  0xd8   : > { %2238 = vset.pattern.permute.xlu1 %v2534_v51  ;;  %2273 = vset.pattern.permute.xlu0 %v2535_v52 }
  0xd9   : > { %667 = vperm.xlu1 %2238, %v2796_v2   ;;  %1087 = vperm.xlu0 %2273, %v2796_v2  }
  0xdb   : > { %v224_v54 = vpop.permute.xlu1 %223  ;;  %v200_v55 = vpop.permute.xlu0 %199 }
  0xdc   : > { %v206_v56 = vsub.f32 %v200_v55, %v1862_v53  ;;  %v230_v0 = vsub.f32 %v224_v54, %v1864_v59  ;;  %v2546_v54 = vmov 49  }
  0xdd   : > { %2239 = vset.pattern.permute.xlu1 %v2536_v57  ;;  %2276 = vset.pattern.permute.xlu0 %v2537_v58  ;;  %v1874_v57 = vld [vmem:[%s2790_s5 + $0xc] ss:$0 sm:$0xff] }
  0xde   : > { %679 = vperm.xlu1 %2239, %v2796_v2   ;;  %1123 = vperm.xlu0 %2276, %v2796_v2   ;;  %v207_v1 = vand.u32 2147483647, %v206_v56  ;;  %v231_v10 = vand.u32 2147483647, %v230_v0  ;;  %v1875_v0 = vld [vmem:[%s2790_s5 + $0xd] ss:$0 sm:$0xff] }
  0xe0   : > { %v236_v62 = vpop.permute.xlu1 %235  ;;  %v212_v63 = vpop.permute.xlu0 %211 }
  0xe1   : > { %v218_v3 = vsub.f32 %v212_v63, %v1863_v60  ;;  %v242_v6 = vsub.f32 %v236_v62, %v1865_v61  ;;  %v2547_v62 = vmov 89   ;;  %v2548_v63 = vmov 51  }
  0xe2   : > { %2241 = vset.pattern.permute.xlu1 %v2538_v4  ;;  %2279 = vset.pattern.permute.xlu0 %v2539_v5 }
  0xe3   : > { %v219_v7 = vand.u32 2147483647, %v218_v3  ;;  %703 = vperm.xlu1 %2241, %v2796_v2   ;;  %1159 = vperm.xlu0 %2279, %v2796_v2   ;;  %v243_v16 = vand.u32 2147483647, %v242_v6 }
  0xe5   : > { %v220_v11 = vadd.f32 %v219_v7, %v207_v1  ;;  %v248_v12 = vpop.permute.xlu1 %247  ;;  %v260_v13 = vpop.permute.xlu0 %259  ;;  %v1876_v1 = vld [vmem:[%s2790_s5 + $0xe] ss:$0 sm:$0xff] }
  0xe6   : > { %v254_v14 = vsub.f32 %v248_v12, %v1866_v8  ;;  %v266_v15 = vsub.f32 %v260_v13, %v1867_v9  ;;  %v2549_v9 = vmov 52   ;;  %v1877_v12 = vld [vmem:[%s2790_s5 + $0xf] ss:$0 sm:$0xff] }
  0xe7   : > { %v232_v17 = vadd.f32 %v231_v10, %v220_v11  ;;  %2242 = vset.pattern.permute.xlu1 %v2540_v18  ;;  %2282 = vset.pattern.permute.xlu0 %v2541_v26  ;;  %v2551_v18 = vmov 54  }
  0xe8   : > { %v255_v19 = vand.u32 2147483647, %v254_v14  ;;  %715 = vperm.xlu1 %2242, %v2796_v2   ;;  %v267_v22 = vand.u32 2147483647, %v266_v15  ;;  %1195 = vperm.xlu0 %2282, %v2796_v2  }
  0xe9   : > { %v244_v21 = vadd.f32 %v243_v16, %v232_v17  ;;  %v2550_v17 = vmov 92  }
  0xea   : > { %v272_v23 = vpop.permute.xlu1 %271  ;;  %v296_v30 = vpop.permute.xlu0 %295 }
  0xeb   : > { %v256_v24 = vadd.f32 %v255_v19, %v244_v21  ;;  %v278_v25 = vsub.f32 %v272_v23, %v1868_v20  ;;  %v302_v35 = vsub.f32 %v296_v30, %v1870_v29  ;;  %v1878_v19 = vld [vmem:[%s2790_s5 + $0x10] ss:$0 sm:$0xff]  ;;  %v1879_v20 = vld [vmem:[%s2790_s5 + $0x11] ss:$0 sm:$0xff]  ;;  %v1880_v30 = vld [vmem:[%s2790_s5 + $0x12] ss:$0 sm:$0xff] }
  0xec   : > { %2244 = vset.pattern.permute.xlu1 %v2542_v27  ;;  %2285 = vset.pattern.permute.xlu0 %v2544_v44  ;;  %v2552_v27 = vmov 55  }
  0xed   : > { %739 = vperm.xlu1 %2244, %v2796_v2   ;;  %v268_v31 = vadd.f32 %v267_v22, %v256_v24  ;;  %v279_v32 = vand.u32 2147483647, %v278_v25  ;;  %v303_v41 = vand.u32 2147483647, %v302_v35  ;;  %1231 = vperm.xlu0 %2285, %v2796_v2   ;;  %v2553_v35 = vmov 95  }
  0xef   : > { %v284_v33 = vpop.permute.xlu1 %283  ;;  %v280_v37 = vadd.f32 %v279_v32, %v268_v31  ;;  %v332_v48 = vpop.permute.xlu0 %331 }
  0xf0   : > { %v290_v34 = vsub.f32 %v284_v33, %v1869_v28  ;;  %v338_v53 = vsub.f32 %v332_v48, %v1873_v47  ;;  %v1883_v48 = vld [vmem:[%s2790_s5 + $0x15] ss:$0 sm:$0xff] }
  0xf1   : > { %2245 = vset.pattern.permute.xlu1 %v2543_v36  ;;  %2288 = vset.pattern.permute.xlu0 %v2547_v62  ;;  %v2554_v36 = vmov 57  }
  0xf2   : > { %v291_v38 = vand.u32 2147483647, %v290_v34  ;;  %751 = vperm.xlu1 %2245, %v2796_v2   ;;  %v339_v59 = vand.u32 2147483647, %v338_v53  ;;  %1267 = vperm.xlu0 %2288, %v2796_v2   ;;  %v2556_v53 = vmov 98  }
  0xf4   : > { %v292_v40 = vadd.f32 %v291_v38, %v280_v37  ;;  %v308_v42 = vpop.permute.xlu1 %307  ;;  %v368_v3 = vpop.permute.xlu0 %367  ;;  %v1881_v37 = vld [vmem:[%s2790_s5 + $0x13] ss:$0 sm:$0xff]  ;;  %v1882_v38 = vld [vmem:[%s2790_s5 + $0x14] ss:$0 sm:$0xff] }
  0xf5   : > { %v314_v43 = vsub.f32 %v308_v42, %v1871_v39  ;;  %v374_v8 = vsub.f32 %v368_v3, %v1876_v1  ;;  %v1886_v3 = vld [vmem:[%s2790_s5 + $0x18] ss:$0 sm:$0xff] }
  0xf6   : > { %2247 = vset.pattern.permute.xlu1 %v2545_v45  ;;  %v304_v49 = vadd.f32 %v303_v41, %v292_v40  ;;  %2291 = vset.pattern.permute.xlu0 %v2550_v17  ;;  %v2555_v45 = vmov 58  }
  0xf7   : > { %775 = vperm.xlu1 %2247, %v2796_v2   ;;  %v315_v50 = vand.u32 2147483647, %v314_v43  ;;  %v375_v14 = vand.u32 2147483647, %v374_v8  ;;  %1303 = vperm.xlu0 %2291, %v2796_v2   ;;  %v2559_v8 = vmov 101  }
  0xf9   : > { %v320_v51 = vpop.permute.xlu1 %319  ;;  %v316_v55 = vadd.f32 %v315_v50, %v304_v49  ;;  %v404_v21 = vpop.permute.xlu0 %403 }
  0xfa   : > { %v326_v52 = vsub.f32 %v320_v51, %v1872_v46  ;;  %v410_v26 = vsub.f32 %v404_v21, %v1879_v20  ;;  %v1889_v21 = vld [vmem:[%s2790_s5 + $0x1b] ss:$0 sm:$0xff] }
  0xfb   : > { %2248 = vset.pattern.permute.xlu1 %v2546_v54  ;;  %2294 = vset.pattern.permute.xlu0 %v2553_v35  ;;  %v2557_v54 = vmov 60  }
  0xfc   : > { %v327_v56 = vand.u32 2147483647, %v326_v52  ;;  %787 = vperm.xlu1 %2248, %v2796_v2   ;;  %v411_v32 = vand.u32 2147483647, %v410_v26  ;;  %1339 = vperm.xlu0 %2294, %v2796_v2   ;;  %v1891_v26 = vld [vmem:[%s2790_s5 + $0x1d] ss:$0 sm:$0xff] }
  0xfe   : > { %v328_v58 = vadd.f32 %v327_v56, %v316_v55  ;;  %v344_v60 = vpop.permute.xlu1 %343  ;;  %v440_v39 = vpop.permute.xlu0 %439  ;;  %v1884_v55 = vld [vmem:[%s2790_s5 + $0x16] ss:$0 sm:$0xff]  ;;  %v1885_v56 = vld [vmem:[%s2790_s5 + $0x17] ss:$0 sm:$0xff] }
  0xff   : > { %v350_v61 = vsub.f32 %v344_v60, %v1874_v57  ;;  %v446_v44 = vsub.f32 %v440_v39, %v1882_v38 }
 0x100   : > { %2250 = vset.pattern.permute.xlu1 %v2548_v63  ;;  %v340_v4 = vadd.f32 %v339_v59, %v328_v58  ;;  %2297 = vset.pattern.permute.xlu0 %v2556_v53  ;;  %v2558_v63 = vmov 61  }
 0x101   : > { %811 = vperm.xlu1 %2250, %v2796_v2   ;;  %v351_v5 = vand.u32 2147483647, %v350_v61  ;;  %v447_v50 = vand.u32 2147483647, %v446_v44  ;;  %1375 = vperm.xlu0 %2297, %v2796_v2   ;;  %v1894_v44 = vld [vmem:[%s2790_s5 + $0x20] ss:$0 sm:$0xff] }
 0x103   : > { %v356_v6 = vpop.permute.xlu1 %355  ;;  %v352_v10 = vadd.f32 %v351_v5, %v340_v4  ;;  %v476_v57 = vpop.permute.xlu0 %475 }
 0x104   : > { %v362_v7 = vsub.f32 %v356_v6, %v1875_v0  ;;  %v482_v62 = vsub.f32 %v476_v57, %v1885_v56 }
 0x105   : > { %2251 = vset.pattern.permute.xlu1 %v2549_v9  ;;  %2300 = vset.pattern.permute.xlu0 %v2559_v8  ;;  %v2560_v9 = vmov 63  }
 0x106   : > { %v363_v11 = vand.u32 2147483647, %v362_v7  ;;  %823 = vperm.xlu1 %2251, %v2796_v2   ;;  %v483_v5 = vand.u32 2147483647, %v482_v62  ;;  %1411 = vperm.xlu0 %2300, %v2796_v2   ;;  %v2568_v62 = vmov 110  }
 0x108   : > { %v364_v13 = vadd.f32 %v363_v11, %v352_v10  ;;  %v380_v15 = vpop.permute.xlu1 %379  ;;  %v1887_v10 = vld [vmem:[%s2790_s5 + $0x19] ss:$0 sm:$0xff]  ;;  %v1888_v11 = vld [vmem:[%s2790_s5 + $0x1a] ss:$0 sm:$0xff] }
 0x109   : > { %v386_v16 = vsub.f32 %v380_v15, %v1877_v12  ;;  %v512_v12 = vpop.permute.xlu0 %511 }
 0x10a   : > { %2253 = vset.pattern.permute.xlu1 %v2551_v18  ;;  %v376_v22 = vadd.f32 %v375_v14, %v364_v13  ;;  %v518_v17 = vsub.f32 %v512_v12, %v1888_v11  ;;  %v2561_v18 = vmov 64   ;;  %v1898_v12 = vld [vmem:[%s2790_s5 + $0x24] ss:$0 sm:$0xff] }
 0x10b   : > { %847 = vperm.xlu1 %2253, %v2796_v2   ;;  %v387_v23 = vand.u32 2147483647, %v386_v16 }
 0x10d   : > { %v392_v24 = vpop.permute.xlu1 %391  ;;  %v388_v28 = vadd.f32 %v387_v23, %v376_v22  ;;  %v519_v23 = vand.u32 2147483647, %v518_v17  ;;  %v2571_v17 = vmov 113  }
 0x10e   : > { %v398_v25 = vsub.f32 %v392_v24, %v1878_v19 }
 0x10f   : > { %2254 = vset.pattern.permute.xlu1 %v2552_v27  ;;  %v548_v27 = vpop.permute.xlu0 %547 }
 0x110   : > { %v399_v29 = vand.u32 2147483647, %v398_v25  ;;  %859 = vperm.xlu1 %2254, %v2796_v2  }
 0x112   : > { %v400_v31 = vadd.f32 %v399_v29, %v388_v28  ;;  %v416_v33 = vpop.permute.xlu1 %415  ;;  %v2562_v28 = vmov 104   ;;  %v2563_v29 = vmov 66  }
 0x113   : > { %v422_v34 = vsub.f32 %v416_v33, %v1880_v30  ;;  %2303 = vset.pattern.permute.xlu0 %v2562_v28  ;;  %v1890_v30 = vld [vmem:[%s2790_s5 + $0x1c] ss:$0 sm:$0xff]  ;;  %v554_v33 = vsub.f32 %v548_v27, %v1891_v26  ;;  %v2573_v27 = vmov 76  }
 0x114   : > { %2256 = vset.pattern.permute.xlu1 %v2554_v36  ;;  %v412_v40 = vadd.f32 %v411_v32, %v400_v31  ;;  %1447 = vperm.xlu0 %2303, %v2796_v2   ;;  %v2564_v36 = vmov 67  }
 0x115   : > { %883 = vperm.xlu1 %2256, %v2796_v2   ;;  %v423_v41 = vand.u32 2147483647, %v422_v34  ;;  %v555_v39 = vand.u32 2147483647, %v554_v33 }
 0x117   : > { %v428_v42 = vpop.permute.xlu1 %427  ;;  %v424_v46 = vadd.f32 %v423_v41, %v412_v40  ;;  %v1892_v40 = vld [vmem:[%s2790_s5 + $0x1e] ss:$0 sm:$0xff] }
 0x118   : > { %v434_v43 = vsub.f32 %v428_v42, %v1881_v37 }
 0x119   : > { %2257 = vset.pattern.permute.xlu1 %v2555_v45  ;;  %v584_v45 = vpop.permute.xlu0 %583 }
 0x11a   : > { %v435_v47 = vand.u32 2147483647, %v434_v43  ;;  %895 = vperm.xlu1 %2257, %v2796_v2  }
 0x11c   : > { %v436_v49 = vadd.f32 %v435_v47, %v424_v46  ;;  %v452_v51 = vpop.permute.xlu1 %451  ;;  %v2565_v46 = vmov 107  }
 0x11d   : > { %v458_v52 = vsub.f32 %v452_v51, %v1883_v48  ;;  %2306 = vset.pattern.permute.xlu0 %v2565_v46  ;;  %v2566_v48 = vmov 69   ;;  %v590_v51 = vsub.f32 %v584_v45, %v1894_v44  ;;  %v2576_v45 = vmov 79  }
 0x11e   : > { %2259 = vset.pattern.permute.xlu1 %v2557_v54  ;;  %v448_v58 = vadd.f32 %v447_v50, %v436_v49  ;;  %1483 = vperm.xlu0 %2306, %v2796_v2   ;;  %v1893_v50 = vld [vmem:[%s2790_s5 + $0x1f] ss:$0 sm:$0xff] }
 0x11f   : > { %919 = vperm.xlu1 %2259, %v2796_v2   ;;  %v459_v59 = vand.u32 2147483647, %v458_v52  ;;  %v591_v57 = vand.u32 2147483647, %v590_v51 }
 0x121   : > { %v464_v60 = vpop.permute.xlu1 %463  ;;  %v460_v0 = vadd.f32 %v459_v59, %v448_v58  ;;  %v1895_v58 = vld [vmem:[%s2790_s5 + $0x21] ss:$0 sm:$0xff] }
 0x122   : > { %v470_v61 = vsub.f32 %v464_v60, %v1884_v55  ;;  %v2567_v55 = vmov 70   ;;  %2309 = vset.pattern.permute.xlu0 %v2568_v62 }
 0x123   : > { %2260 = vset.pattern.permute.xlu1 %v2558_v63  ;;  %1519 = vperm.xlu0 %2309, %v2796_v2  }
 0x124   : > { %v471_v1 = vand.u32 2147483647, %v470_v61  ;;  %931 = vperm.xlu1 %2260, %v2796_v2  }
 0x126   : > { %v472_v4 = vadd.f32 %v471_v1, %v460_v0  ;;  %v488_v6 = vpop.permute.xlu1 %487  ;;  %v2569_v0 = vmov 72  }
 0x127   : > { %v494_v7 = vsub.f32 %v488_v6, %v1886_v3  ;;  %v1896_v3 = vld [vmem:[%s2790_s5 + $0x22] ss:$0 sm:$0xff]  ;;  %2312 = vset.pattern.permute.xlu0 %v2571_v17 }
 0x128   : > { %2262 = vset.pattern.permute.xlu1 %v2560_v9  ;;  %v484_v13 = vadd.f32 %v483_v5, %v472_v4  ;;  %v1897_v4 = vld [vmem:[%s2790_s5 + $0x23] ss:$0 sm:$0xff]  ;;  %v620_v5 = vpop.permute.xlu0 %619  ;;  %1555 = vperm.xlu0 %2312, %v2796_v2  }
 0x129   : > { %955 = vperm.xlu1 %2262, %v2796_v2   ;;  %v495_v14 = vand.u32 2147483647, %v494_v7  ;;  %v626_v9 = vsub.f32 %v620_v5, %v1897_v4 }
 0x12b   : > { %v500_v15 = vpop.permute.xlu1 %499  ;;  %v496_v19 = vadd.f32 %v495_v14, %v484_v13  ;;  %v627_v14 = vand.u32 2147483647, %v626_v9  ;;  %v2581_v9 = vmov 84  }
 0x12c   : > { %v506_v16 = vsub.f32 %v500_v15, %v1887_v10  ;;  %v2570_v10 = vmov 73  }
 0x12d   : > { %2263 = vset.pattern.permute.xlu1 %v2561_v18  ;;  %v2572_v18 = vmov 75  }
 0x12e   : > { %v507_v20 = vand.u32 2147483647, %v506_v16  ;;  %967 = vperm.xlu1 %2263, %v2796_v2  }
 0x130   : > { %v508_v22 = vadd.f32 %v507_v20, %v496_v19  ;;  %v524_v24 = vpop.permute.xlu1 %523  ;;  %v1899_v19 = vld [vmem:[%s2790_s5 + $0x25] ss:$0 sm:$0xff]  ;;  %v1900_v20 = vld [vmem:[%s2790_s5 + $0x26] ss:$0 sm:$0xff] }
 0x131   : > { %v530_v25 = vsub.f32 %v524_v24, %v1889_v21  ;;  %v656_v21 = vpop.permute.xlu0 %655 }
 0x132   : > { %2265 = vset.pattern.permute.xlu1 %v2563_v29  ;;  %v520_v31 = vadd.f32 %v519_v23, %v508_v22  ;;  %v662_v26 = vsub.f32 %v656_v21, %v1900_v20  ;;  %v1910_v21 = vld [vmem:[%s2790_s5 + $0x30] ss:$0 sm:$0xff] }
 0x133   : > { %991 = vperm.xlu1 %2265, %v2796_v2   ;;  %v531_v32 = vand.u32 2147483647, %v530_v25 }
 0x135   : > { %v536_v34 = vpop.permute.xlu1 %535  ;;  %v532_v37 = vadd.f32 %v531_v32, %v520_v31  ;;  %v663_v32 = vand.u32 2147483647, %v662_v26  ;;  %v2583_v26 = vmov 125  }
 0x136   : > { %v542_v35 = vsub.f32 %v536_v34, %v1890_v30  ;;  %v1901_v30 = vld [vmem:[%s2790_s5 + $0x27] ss:$0 sm:$0xff] }
 0x137   : > { %2266 = vset.pattern.permute.xlu1 %v2564_v36  ;;  %v2575_v36 = vmov 78  }
 0x138   : > { %v543_v38 = vand.u32 2147483647, %v542_v35  ;;  %1003 = vperm.xlu1 %2266, %v2796_v2   ;;  %v2574_v35 = vmov 116  }
 0x139   : > { %2315 = vset.pattern.permute.xlu0 %v2574_v35 }
 0x13a   : > { %v544_v41 = vadd.f32 %v543_v38, %v532_v37  ;;  %v560_v42 = vpop.permute.xlu1 %559  ;;  %1591 = vperm.xlu0 %2315, %v2796_v2   ;;  %v1902_v37 = vld [vmem:[%s2790_s5 + $0x28] ss:$0 sm:$0xff]  ;;  %v1903_v38 = vld [vmem:[%s2790_s5 + $0x29] ss:$0 sm:$0xff] }
 0x13b   : > { %v566_v43 = vsub.f32 %v560_v42, %v1892_v40 }
 0x13c   : > { %v556_v47 = vadd.f32 %v555_v39, %v544_v41  ;;  %2268 = vset.pattern.permute.xlu1 %v2566_v48  ;;  %v692_v39 = vpop.permute.xlu0 %691  ;;  %v1904_v48 = vld [vmem:[%s2790_s5 + $0x2a] ss:$0 sm:$0xff] }
 0x13d   : > { %v567_v49 = vand.u32 2147483647, %v566_v43  ;;  %1027 = vperm.xlu1 %2268, %v2796_v2   ;;  %v698_v44 = vsub.f32 %v692_v39, %v1903_v38  ;;  %v1913_v39 = vld [vmem:[%s2790_s5 + $0x33] ss:$0 sm:$0xff] }
 0x13f   : > { %v568_v52 = vadd.f32 %v567_v49, %v556_v47  ;;  %v572_v53 = vpop.permute.xlu1 %571 }
 0x140   : > { %v578_v54 = vsub.f32 %v572_v53, %v1893_v50  ;;  %v699_v50 = vand.u32 2147483647, %v698_v44  ;;  %v2577_v53 = vmov 119  }
 0x141   : > { %2269 = vset.pattern.permute.xlu1 %v2567_v55  ;;  %2318 = vset.pattern.permute.xlu0 %v2577_v53  ;;  %v1905_v55 = vld [vmem:[%s2790_s5 + $0x2b] ss:$0 sm:$0xff] }
 0x142   : > { %v579_v56 = vand.u32 2147483647, %v578_v54  ;;  %1039 = vperm.xlu1 %2269, %v2796_v2   ;;  %v2578_v54 = vmov 81   ;;  %1627 = vperm.xlu0 %2318, %v2796_v2  }
 0x144   : > { %v580_v59 = vadd.f32 %v579_v56, %v568_v52  ;;  %v596_v60 = vpop.permute.xlu1 %595  ;;  %v1906_v56 = vld [vmem:[%s2790_s5 + $0x2c] ss:$0 sm:$0xff] }
 0x145   : > { %v602_v61 = vsub.f32 %v596_v60, %v1895_v58 }
 0x146   : > { %v592_v63 = vadd.f32 %v591_v57, %v580_v59  ;;  %2271 = vset.pattern.permute.xlu1 %v2569_v0  ;;  %v728_v57 = vpop.permute.xlu0 %727 }
 0x147   : > { %v603_v1 = vand.u32 2147483647, %v602_v61  ;;  %1063 = vperm.xlu1 %2271, %v2796_v2   ;;  %v734_v62 = vsub.f32 %v728_v57, %v1906_v56  ;;  %v1916_v57 = vld [vmem:[%s2790_s5 + $0x36] ss:$0 sm:$0xff] }
 0x149   : > { %v604_v6 = vadd.f32 %v603_v1, %v592_v63  ;;  %v608_v7 = vpop.permute.xlu1 %607  ;;  %v2579_v63 = vmov 82   ;;  %v735_v5 = vand.u32 2147483647, %v734_v62  ;;  %v2589_v62 = vmov 93  }
 0x14a   : > { %v614_v8 = vsub.f32 %v608_v7, %v1896_v3  ;;  %v1907_v3 = vld [vmem:[%s2790_s5 + $0x2d] ss:$0 sm:$0xff] }
 0x14b   : > { %2272 = vset.pattern.permute.xlu1 %v2570_v10  ;;  %v2940_v10 = vld [vmem:[#allocation2] sm:$0xff] }
 0x14c   : > { %v615_v11 = vand.u32 2147483647, %v614_v8  ;;  %1075 = vperm.xlu1 %2272, %v2796_v2   ;;  %v2580_v8 = vmov 122  }
 0x14d   : > { %2321 = vset.pattern.permute.xlu0 %v2580_v8  ;;  %v2590_v8 = vmov 94  }
 0x14e   : > { %v616_v13 = vadd.f32 %v615_v11, %v604_v6  ;;  %v632_v15 = vpop.permute.xlu1 %631  ;;  %1663 = vperm.xlu0 %2321, %v2940_v10   ;;  %v1908_v11 = vld [vmem:[%s2790_s5 + $0x2e] ss:$0 sm:$0xff] }
 0x14f   : > { %v638_v16 = vsub.f32 %v632_v15, %v1898_v12  ;;  %v1909_v12 = vld [vmem:[%s2790_s5 + $0x2f] ss:$0 sm:$0xff] }
 0x150   : > { %2274 = vset.pattern.permute.xlu1 %v2572_v18  ;;  %v628_v22 = vadd.f32 %v627_v14, %v616_v13  ;;  %v764_v13 = vpop.permute.xlu0 %763  ;;  %v2582_v18 = vmov 85  }
 0x151   : > { %1099 = vperm.xlu1 %2274, %v2796_v2   ;;  %v639_v23 = vand.u32 2147483647, %v638_v16  ;;  %v770_v17 = vsub.f32 %v764_v13, %v1909_v12  ;;  %v1919_v12 = vld [vmem:[%s2790_s5 + $0x39] ss:$0 sm:$0xff] }
 0x152   : > { %2324 = vset.pattern.permute.xlu0 %v2583_v26 }
 0x153   : > { %v644_v24 = vpop.permute.xlu1 %643  ;;  %v640_v28 = vadd.f32 %v639_v23, %v628_v22  ;;  %v771_v23 = vand.u32 2147483647, %v770_v17  ;;  %1699 = vperm.xlu0 %2324, %v2940_v10   ;;  %v1920_v17 = vld [vmem:[%s2790_s5 + $0x3a] ss:$0 sm:$0xff] }
 0x154   : > { %v650_v25 = vsub.f32 %v644_v24, %v1899_v19 }
 0x155   : > { %2275 = vset.pattern.permute.xlu1 %v2573_v27  ;;  %v2584_v27 = vmov 87  }
 0x156   : > { %v651_v29 = vand.u32 2147483647, %v650_v25  ;;  %1111 = vperm.xlu1 %2275, %v2796_v2  }
 0x158   : > { %v652_v31 = vadd.f32 %v651_v29, %v640_v28  ;;  %v668_v33 = vpop.permute.xlu1 %667  ;;  %v1911_v28 = vld [vmem:[%s2790_s5 + $0x31] ss:$0 sm:$0xff]  ;;  %v1912_v29 = vld [vmem:[%s2790_s5 + $0x32] ss:$0 sm:$0xff] }
 0x159   : > { %v674_v34 = vsub.f32 %v668_v33, %v1901_v30  ;;  %v800_v30 = vpop.permute.xlu0 %799 }
 0x15a   : > { %2277 = vset.pattern.permute.xlu1 %v2575_v36  ;;  %v664_v40 = vadd.f32 %v663_v32, %v652_v31  ;;  %v806_v35 = vsub.f32 %v800_v30, %v1912_v29  ;;  %v2585_v36 = vmov 88  }
 0x15b   : > { %1135 = vperm.xlu1 %2277, %v2796_v2   ;;  %v675_v41 = vand.u32 2147483647, %v674_v34 }
 0x15d   : > { %v680_v42 = vpop.permute.xlu1 %679  ;;  %v676_v46 = vadd.f32 %v675_v41, %v664_v40  ;;  %v2586_v40 = vmov 127  }
 0x15e   : > { %v686_v43 = vsub.f32 %v680_v42, %v1902_v37  ;;  %2327 = vset.pattern.permute.xlu0 %v2586_v40  ;;  %v807_v42 = vand.u32 2147483647, %v806_v35  ;;  %v1924_v35 = vld [vmem:[%s2790_s5 + $0x3e] ss:$0 sm:$0xff] }
 0x15f   : > { %2278 = vset.pattern.permute.xlu1 %v2576_v45  ;;  %v2587_v45 = vmov 90  }
 0x160   : > { %v687_v47 = vand.u32 2147483647, %v686_v43  ;;  %1147 = vperm.xlu1 %2278, %v2796_v2  }
 0x162   : > { %v688_v49 = vadd.f32 %v687_v47, %v676_v46  ;;  %v704_v51 = vpop.permute.xlu1 %703  ;;  %v1914_v46 = vld [vmem:[%s2790_s5 + $0x34] ss:$0 sm:$0xff]  ;;  %v1915_v47 = vld [vmem:[%s2790_s5 + $0x35] ss:$0 sm:$0xff] }
 0x163   : > { %v710_v52 = vsub.f32 %v704_v51, %v1904_v48  ;;  %v836_v48 = vpop.permute.xlu0 %835 }
 0x164   : > { %2280 = vset.pattern.permute.xlu1 %v2578_v54  ;;  %v700_v58 = vadd.f32 %v699_v50, %v688_v49  ;;  %v842_v53 = vsub.f32 %v836_v48, %v1915_v47  ;;  %v2588_v54 = vmov 91  }
 0x165   : > { %1171 = vperm.xlu1 %2280, %v2796_v2   ;;  %v711_v59 = vand.u32 2147483647, %v710_v52 }
 0x167   : > { %v716_v60 = vpop.permute.xlu1 %715  ;;  %v712_v0 = vadd.f32 %v711_v59, %v700_v58  ;;  %v843_v59 = vand.u32 2147483647, %v842_v53  ;;  %v1927_v53 = vld [vmem:[%s2790_s5 + $0x41] ss:$0 sm:$0xff] }
 0x168   : > { %v722_v61 = vsub.f32 %v716_v60, %v1905_v55 }
 0x169   : > { %2281 = vset.pattern.permute.xlu1 %v2579_v63  ;;  %v1917_v63 = vld [vmem:[%s2790_s5 + $0x37] ss:$0 sm:$0xff] }
 0x16a   : > { %v723_v1 = vand.u32 2147483647, %v722_v61  ;;  %1183 = vperm.xlu1 %2281, %v2796_v2  }
 0x16c   : > { %v724_v4 = vadd.f32 %v723_v1, %v712_v0  ;;  %v740_v6 = vpop.permute.xlu1 %739  ;;  %v1918_v0 = vld [vmem:[%s2790_s5 + $0x38] ss:$0 sm:$0xff]  ;;  %v872_v1 = vpop.permute.xlu0 %871 }
 0x16d   : > { %v746_v7 = vsub.f32 %v740_v6, %v1907_v3 }
 0x16e   : > { %2283 = vset.pattern.permute.xlu1 %v2581_v9  ;;  %v736_v2 = vadd.f32 %v735_v5, %v724_v4 }
 0x16f   : > { %1207 = vperm.xlu1 %2283, %v2940_v10   ;;  %v747_v14 = vand.u32 2147483647, %v746_v7  ;;  %v878_v7 = vsub.f32 %v872_v1, %v1918_v0 }
 0x171   : > { %v752_v15 = vpop.permute.xlu1 %751  ;;  %v748_v19 = vadd.f32 %v747_v14, %v736_v2  ;;  %v879_v2 = vand.u32 2147483647, %v878_v7  ;;  %v1930_v7 = vld [vmem:[%s2790_s5 + $0x44] ss:$0 sm:$0xff] }
 0x172   : > { %v758_v16 = vsub.f32 %v752_v15, %v1908_v11 }
 0x173   : > { %2284 = vset.pattern.permute.xlu1 %v2582_v18  ;;  %v1921_v18 = vld [vmem:[%s2790_s5 + $0x3b] ss:$0 sm:$0xff] }
 0x174   : > { %v759_v20 = vand.u32 2147483647, %v758_v16  ;;  %1219 = vperm.xlu1 %2284, %v2940_v10   ;;  %v2591_v16 = vmov 96  }
 0x176   : > { %v760_v22 = vadd.f32 %v759_v20, %v748_v19  ;;  %v776_v24 = vpop.permute.xlu1 %775  ;;  %v908_v19 = vpop.permute.xlu0 %907 }
 0x177   : > { %v782_v25 = vsub.f32 %v776_v24, %v1910_v21  ;;  %v914_v24 = vsub.f32 %v908_v19, %v1921_v18 }
 0x178   : > { %2286 = vset.pattern.permute.xlu1 %v2584_v27  ;;  %v772_v31 = vadd.f32 %v771_v23, %v760_v22 }
 0x179   : > { %1243 = vperm.xlu1 %2286, %v2940_v10   ;;  %v783_v32 = vand.u32 2147483647, %v782_v25  ;;  %v2592_v25 = vmov 97   ;;  %v915_v30 = vand.u32 2147483647, %v914_v24 }
 0x17a   : > { %v1933_v24 = vld [vmem:[%s2790_s5 + $0x47] ss:$0 sm:$0xff] }
 0x17b   : > { %v788_v33 = vpop.permute.xlu1 %787  ;;  %v784_v37 = vadd.f32 %v783_v32, %v772_v31 }
 0x17c   : > { %v794_v34 = vsub.f32 %v788_v33, %v1911_v28  ;;  %v1922_v28 = vld [vmem:[%s2790_s5 + $0x3c] ss:$0 sm:$0xff]  ;;  %v2593_v33 = vmov 99  }
 0x17d   : > { %2287 = vset.pattern.permute.xlu1 %v2585_v36  ;;  %v944_v36 = vpop.permute.xlu0 %943 }
 0x17e   : > { %v795_v38 = vand.u32 2147483647, %v794_v34  ;;  %1255 = vperm.xlu1 %2287, %v2940_v10   ;;  %v1923_v34 = vld [vmem:[%s2790_s5 + $0x3d] ss:$0 sm:$0xff] }
 0x180   : > { %v796_v41 = vadd.f32 %v795_v38, %v784_v37  ;;  %v812_v43 = vpop.permute.xlu1 %811 }
 0x181   : > { %v818_v44 = vsub.f32 %v812_v43, %v1913_v39  ;;  %v2594_v43 = vmov 100  }
 0x182   : > { %2289 = vset.pattern.permute.xlu1 %v2587_v45  ;;  %v808_v49 = vadd.f32 %v807_v42, %v796_v41  ;;  %v950_v42 = vsub.f32 %v944_v36, %v1924_v35 }
 0x183   : > { %1279 = vperm.xlu1 %2289, %v2940_v10   ;;  %v819_v50 = vand.u32 2147483647, %v818_v44 }
 0x184   : > { %v951_v48 = vand.u32 2147483647, %v950_v42  ;;  %v1936_v42 = vld [vmem:[%s2790_s5 + $0x4a] ss:$0 sm:$0xff] }
 0x185   : > { %v824_v51 = vpop.permute.xlu1 %823  ;;  %v820_v55 = vadd.f32 %v819_v50, %v808_v49 }
 0x186   : > { %v830_v52 = vsub.f32 %v824_v51, %v1914_v46  ;;  %v1925_v46 = vld [vmem:[%s2790_s5 + $0x3f] ss:$0 sm:$0xff]  ;;  %v2595_v51 = vmov 102  }
 0x187   : > { %2290 = vset.pattern.permute.xlu1 %v2588_v54  ;;  %v980_v54 = vpop.permute.xlu0 %979 }
 0x188   : > { %v831_v56 = vand.u32 2147483647, %v830_v52  ;;  %1291 = vperm.xlu1 %2290, %v2940_v10   ;;  %v1926_v52 = vld [vmem:[%s2790_s5 + $0x40] ss:$0 sm:$0xff] }
 0x18a   : > { %v832_v58 = vadd.f32 %v831_v56, %v820_v55  ;;  %v848_v60 = vpop.permute.xlu1 %847 }
 0x18b   : > { %v854_v61 = vsub.f32 %v848_v60, %v1916_v57  ;;  %v2596_v60 = vmov 103  }
 0x18c   : > { %2292 = vset.pattern.permute.xlu1 %v2589_v62  ;;  %v844_v3 = vadd.f32 %v843_v59, %v832_v58  ;;  %v986_v59 = vsub.f32 %v980_v54, %v1927_v53 }
 0x18d   : > { %1315 = vperm.xlu1 %2292, %v2940_v10   ;;  %v855_v4 = vand.u32 2147483647, %v854_v61 }
 0x18e   : > { %v987_v1 = vand.u32 2147483647, %v986_v59  ;;  %v1939_v59 = vld [vmem:[%s2790_s5 + $0x4d] ss:$0 sm:$0xff] }
 0x18f   : > { %v860_v5 = vpop.permute.xlu1 %859  ;;  %v856_v9 = vadd.f32 %v855_v4, %v844_v3 }
 0x190   : > { %v866_v6 = vsub.f32 %v860_v5, %v1917_v63  ;;  %v1928_v63 = vld [vmem:[%s2790_s5 + $0x42] ss:$0 sm:$0xff]  ;;  %v2597_v5 = vmov 105  }
 0x191   : > { %2293 = vset.pattern.permute.xlu1 %v2590_v8  ;;  %v1016_v8 = vpop.permute.xlu0 %1015 }
 0x192   : > { %v867_v11 = vand.u32 2147483647, %v866_v6  ;;  %1327 = vperm.xlu1 %2293, %v2940_v10   ;;  %v1929_v6 = vld [vmem:[%s2790_s5 + $0x43] ss:$0 sm:$0xff] }
 0x194   : > { %v868_v13 = vadd.f32 %v867_v11, %v856_v9  ;;  %v884_v14 = vpop.permute.xlu1 %883 }
 0x195   : > { %v890_v15 = vsub.f32 %v884_v14, %v1919_v12  ;;  %v2598_v14 = vmov 106  }
 0x196   : > { %2295 = vset.pattern.permute.xlu1 %v2591_v16  ;;  %v880_v20 = vadd.f32 %v879_v2, %v868_v13  ;;  %v1022_v2 = vsub.f32 %v1016_v8, %v1930_v7 }
 0x197   : > { %1351 = vperm.xlu1 %2295, %v2940_v10   ;;  %v891_v21 = vand.u32 2147483647, %v890_v15 }
 0x198   : > { %v1023_v19 = vand.u32 2147483647, %v1022_v2  ;;  %v1942_v2 = vld [vmem:[%s2790_s5 + $0x50] ss:$0 sm:$0xff] }
 0x199   : > { %v896_v22 = vpop.permute.xlu1 %895  ;;  %v892_v26 = vadd.f32 %v891_v21, %v880_v20 }
 0x19a   : > { %v902_v23 = vsub.f32 %v896_v22, %v1920_v17  ;;  %v1931_v17 = vld [vmem:[%s2790_s5 + $0x45] ss:$0 sm:$0xff]  ;;  %v2599_v22 = vmov 108  }
 0x19b   : > { %2296 = vset.pattern.permute.xlu1 %v2592_v25  ;;  %v1052_v25 = vpop.permute.xlu0 %1051 }
 0x19c   : > { %v903_v27 = vand.u32 2147483647, %v902_v23  ;;  %1363 = vperm.xlu1 %2296, %v2940_v10   ;;  %v1932_v23 = vld [vmem:[%s2790_s5 + $0x46] ss:$0 sm:$0xff] }
 0x19e   : > { %v904_v29 = vadd.f32 %v903_v27, %v892_v26  ;;  %v920_v31 = vpop.permute.xlu1 %919 }
 0x19f   : > { %v926_v32 = vsub.f32 %v920_v31, %v1922_v28  ;;  %v2600_v31 = vmov 109  }
 0x1a0   : > { %2298 = vset.pattern.permute.xlu1 %v2593_v33  ;;  %v916_v37 = vadd.f32 %v915_v30, %v904_v29  ;;  %v1058_v30 = vsub.f32 %v1052_v25, %v1933_v24 }
 0x1a1   : > { %1387 = vperm.xlu1 %2298, %v2940_v10   ;;  %v927_v38 = vand.u32 2147483647, %v926_v32 }
 0x1a2   : > { %v1059_v36 = vand.u32 2147483647, %v1058_v30  ;;  %v1945_v30 = vld [vmem:[%s2790_s5 + $0x53] ss:$0 sm:$0xff] }
 0x1a3   : > { %v932_v39 = vpop.permute.xlu1 %931  ;;  %v928_v44 = vadd.f32 %v927_v38, %v916_v37 }
 0x1a4   : > { %v938_v41 = vsub.f32 %v932_v39, %v1923_v34  ;;  %v1934_v34 = vld [vmem:[%s2790_s5 + $0x48] ss:$0 sm:$0xff]  ;;  %v2601_v39 = vmov 111  }
 0x1a5   : > { %2299 = vset.pattern.permute.xlu1 %v2594_v43  ;;  %v1088_v43 = vpop.permute.xlu0 %1087 }
 0x1a6   : > { %v939_v45 = vand.u32 2147483647, %v938_v41  ;;  %1399 = vperm.xlu1 %2299, %v2940_v10   ;;  %v1935_v41 = vld [vmem:[%s2790_s5 + $0x49] ss:$0 sm:$0xff] }
 0x1a8   : > { %v940_v47 = vadd.f32 %v939_v45, %v928_v44  ;;  %v956_v49 = vpop.permute.xlu1 %955 }
 0x1a9   : > { %v962_v50 = vsub.f32 %v956_v49, %v1925_v46  ;;  %v2602_v49 = vmov 112  }
 0x1aa   : > { %2301 = vset.pattern.permute.xlu1 %v2595_v51  ;;  %v952_v55 = vadd.f32 %v951_v48, %v940_v47  ;;  %v1094_v48 = vsub.f32 %v1088_v43, %v1936_v42 }
 0x1ab   : > { %1423 = vperm.xlu1 %2301, %v2940_v10   ;;  %v963_v56 = vand.u32 2147483647, %v962_v50 }
 0x1ac   : > { %v1095_v54 = vand.u32 2147483647, %v1094_v48  ;;  %v1948_v48 = vld [vmem:[%s2790_s5 + $0x56] ss:$0 sm:$0xff] }
 0x1ad   : > { %v968_v57 = vpop.permute.xlu1 %967  ;;  %v964_v61 = vadd.f32 %v963_v56, %v952_v55 }
 0x1ae   : > { %v974_v58 = vsub.f32 %v968_v57, %v1926_v52  ;;  %v1937_v52 = vld [vmem:[%s2790_s5 + $0x4b] ss:$0 sm:$0xff]  ;;  %v2603_v57 = vmov 114  }
 0x1af   : > { %2302 = vset.pattern.permute.xlu1 %v2596_v60  ;;  %v1124_v60 = vpop.permute.xlu0 %1123 }
 0x1b0   : > { %v975_v62 = vand.u32 2147483647, %v974_v58  ;;  %1435 = vperm.xlu1 %2302, %v2940_v10   ;;  %v1938_v58 = vld [vmem:[%s2790_s5 + $0x4c] ss:$0 sm:$0xff] }
 0x1b2   : > { %v976_v0 = vadd.f32 %v975_v62, %v964_v61  ;;  %v992_v3 = vpop.permute.xlu1 %991 }
 0x1b3   : > { %v998_v4 = vsub.f32 %v992_v3, %v1928_v63  ;;  %v2604_v3 = vmov 115  }
 0x1b4   : > { %2304 = vset.pattern.permute.xlu1 %v2597_v5  ;;  %v988_v9 = vadd.f32 %v987_v1, %v976_v0  ;;  %v1130_v1 = vsub.f32 %v1124_v60, %v1939_v59 }
 0x1b5   : > { %1459 = vperm.xlu1 %2304, %v2940_v10   ;;  %v999_v11 = vand.u32 2147483647, %v998_v4 }
 0x1b6   : > { %v1131_v8 = vand.u32 2147483647, %v1130_v1  ;;  %v1951_v1 = vld [vmem:[%s2790_s5 + $0x59] ss:$0 sm:$0xff] }
 0x1b7   : > { %v1004_v12 = vpop.permute.xlu1 %1003  ;;  %v1000_v15 = vadd.f32 %v999_v11, %v988_v9 }
 0x1b8   : > { %v1010_v13 = vsub.f32 %v1004_v12, %v1929_v6  ;;  %v1940_v6 = vld [vmem:[%s2790_s5 + $0x4e] ss:$0 sm:$0xff]  ;;  %v2605_v12 = vmov 117  }
 0x1b9   : > { %2305 = vset.pattern.permute.xlu1 %v2598_v14  ;;  %v1160_v14 = vpop.permute.xlu0 %1159 }
 0x1ba   : > { %v1011_v16 = vand.u32 2147483647, %v1010_v13  ;;  %1471 = vperm.xlu1 %2305, %v2940_v10   ;;  %v1941_v13 = vld [vmem:[%s2790_s5 + $0x4f] ss:$0 sm:$0xff] }
 0x1bc   : > { %v1012_v18 = vadd.f32 %v1011_v16, %v1000_v15  ;;  %v1028_v20 = vpop.permute.xlu1 %1027 }
 0x1bd   : > { %v1034_v21 = vsub.f32 %v1028_v20, %v1931_v17  ;;  %v2606_v20 = vmov 118  }
 0x1be   : > { %2307 = vset.pattern.permute.xlu1 %v2599_v22  ;;  %v1024_v26 = vadd.f32 %v1023_v19, %v1012_v18  ;;  %v1166_v19 = vsub.f32 %v1160_v14, %v1942_v2 }
 0x1bf   : > { %1495 = vperm.xlu1 %2307, %v2940_v10   ;;  %v1035_v27 = vand.u32 2147483647, %v1034_v21 }
 0x1c0   : > { %v1167_v25 = vand.u32 2147483647, %v1166_v19 }
 0x1c1   : > { %v1040_v28 = vpop.permute.xlu1 %1039  ;;  %v1036_v32 = vadd.f32 %v1035_v27, %v1024_v26 }
 0x1c2   : > { %v1046_v29 = vsub.f32 %v1040_v28, %v1932_v23  ;;  %v1943_v23 = vld [vmem:[%s2790_s5 + $0x51] ss:$0 sm:$0xff]  ;;  %v2607_v28 = vmov 120  }
 0x1c3   : > { %2308 = vset.pattern.permute.xlu1 %v2600_v31  ;;  %v1196_v31 = vpop.permute.xlu0 %1195 }
 0x1c4   : > { %v1047_v33 = vand.u32 2147483647, %v1046_v29  ;;  %1507 = vperm.xlu1 %2308, %v2940_v10   ;;  %v1944_v29 = vld [vmem:[%s2790_s5 + $0x52] ss:$0 sm:$0xff] }
 0x1c6   : > { %v1048_v35 = vadd.f32 %v1047_v33, %v1036_v32  ;;  %v1064_v37 = vpop.permute.xlu1 %1063 }
 0x1c7   : > { %v1070_v38 = vsub.f32 %v1064_v37, %v1934_v34  ;;  %v2608_v37 = vmov 121  }
 0x1c8   : > { %2310 = vset.pattern.permute.xlu1 %v2601_v39  ;;  %v1060_v44 = vadd.f32 %v1059_v36, %v1048_v35  ;;  %v1202_v36 = vsub.f32 %v1196_v31, %v1945_v30  ;;  %v1957_v30 = vld [vmem:[%s2790_s5 + $0x5f] ss:$0 sm:$0xff] }
 0x1c9   : > { %1531 = vperm.xlu1 %2310, %v2940_v10   ;;  %v1071_v45 = vand.u32 2147483647, %v1070_v38 }
 0x1ca   : > { %v1203_v43 = vand.u32 2147483647, %v1202_v36 }
 0x1cb   : > { %v1076_v46 = vpop.permute.xlu1 %1075  ;;  %v1072_v50 = vadd.f32 %v1071_v45, %v1060_v44 }
 0x1cc   : > { %v1082_v47 = vsub.f32 %v1076_v46, %v1935_v41  ;;  %v1946_v41 = vld [vmem:[%s2790_s5 + $0x54] ss:$0 sm:$0xff]  ;;  %v2609_v46 = vmov 123  }
 0x1cd   : > { %2311 = vset.pattern.permute.xlu1 %v2602_v49  ;;  %v1232_v49 = vpop.permute.xlu0 %1231 }
 0x1ce   : > { %v1083_v51 = vand.u32 2147483647, %v1082_v47  ;;  %1543 = vperm.xlu1 %2311, %v2940_v10   ;;  %v1947_v47 = vld [vmem:[%s2790_s5 + $0x55] ss:$0 sm:$0xff] }
 0x1d0   : > { %v1084_v53 = vadd.f32 %v1083_v51, %v1072_v50  ;;  %v1100_v55 = vpop.permute.xlu1 %1099 }
 0x1d1   : > { %v1106_v56 = vsub.f32 %v1100_v55, %v1937_v52  ;;  %v2610_v55 = vmov 124  }
 0x1d2   : > { %2313 = vset.pattern.permute.xlu1 %v2603_v57  ;;  %v1096_v61 = vadd.f32 %v1095_v54, %v1084_v53  ;;  %v1238_v54 = vsub.f32 %v1232_v49, %v1948_v48 }
 0x1d3   : > { %1567 = vperm.xlu1 %2313, %v2940_v10   ;;  %v1107_v62 = vand.u32 2147483647, %v1106_v56 }
 0x1d4   : > { %v1239_v60 = vand.u32 2147483647, %v1238_v54 }
 0x1d5   : > { %v1112_v63 = vpop.permute.xlu1 %1111  ;;  %v1108_v4 = vadd.f32 %v1107_v62, %v1096_v61 }
 0x1d6   : > { %v1118_v0 = vsub.f32 %v1112_v63, %v1938_v58  ;;  %v1949_v58 = vld [vmem:[%s2790_s5 + $0x57] ss:$0 sm:$0xff]  ;;  %v2611_v63 = vmov 126  }
 0x1d7   : > { %2314 = vset.pattern.permute.xlu1 %v2604_v3  ;;  %v1268_v3 = vpop.permute.xlu0 %1267 }
 0x1d8   : > { %v1119_v5 = vand.u32 2147483647, %v1118_v0  ;;  %1579 = vperm.xlu1 %2314, %v2940_v10   ;;  %v1950_v0 = vld [vmem:[%s2790_s5 + $0x58] ss:$0 sm:$0xff] }
 0x1da   : > { %v1120_v7 = vadd.f32 %v1119_v5, %v1108_v4  ;;  %v1136_v9 = vpop.permute.xlu1 %1135 }
 0x1db   : > { %v1142_v11 = vsub.f32 %v1136_v9, %v1940_v6 }
 0x1dc   : > { %2316 = vset.pattern.permute.xlu1 %v2605_v12  ;;  %v1132_v15 = vadd.f32 %v1131_v8, %v1120_v7  ;;  %v1274_v8 = vsub.f32 %v1268_v3, %v1951_v1  ;;  %v1952_v12 = vld [vmem:[%s2790_s5 + $0x5a] ss:$0 sm:$0xff] }
 0x1dd   : > { %1603 = vperm.xlu1 %2316, %v2940_v10   ;;  %v1143_v16 = vand.u32 2147483647, %v1142_v11 }
 0x1de   : > { %v1275_v2 = vand.u32 2147483647, %v1274_v8 }
 0x1df   : > { %v1148_v17 = vpop.permute.xlu1 %1147  ;;  %v1144_v21 = vadd.f32 %v1143_v16, %v1132_v15  ;;  %v1953_v16 = vld [vmem:[%s2790_s5 + $0x5b] ss:$0 sm:$0xff] }
 0x1e0   : > { %v1154_v18 = vsub.f32 %v1148_v17, %v1941_v13  ;;  %v1954_v17 = vld [vmem:[%s2790_s5 + $0x5c] ss:$0 sm:$0xff] }
 0x1e1   : > { %2317 = vset.pattern.permute.xlu1 %v2606_v20 }
 0x1e2   : > { %v1155_v22 = vand.u32 2147483647, %v1154_v18  ;;  %1615 = vperm.xlu1 %2317, %v2940_v10   ;;  %v1304_v18 = vpop.permute.xlu0 %1303 }
 0x1e4   : > { %v1156_v24 = vadd.f32 %v1155_v22, %v1144_v21  ;;  %v1172_v26 = vpop.permute.xlu1 %1171 }
 0x1e5   : > { %v1178_v27 = vsub.f32 %v1172_v26, %v1943_v23 }
 0x1e6   : > { %2319 = vset.pattern.permute.xlu1 %v2607_v28  ;;  %v1168_v32 = vadd.f32 %v1167_v25, %v1156_v24  ;;  %v1340_v31 = vpop.permute.xlu0 %1339 }
 0x1e7   : > { %1639 = vperm.xlu1 %2319, %v2940_v10   ;;  %v1179_v33 = vand.u32 2147483647, %v1178_v27  ;;  %v1346_v36 = vsub.f32 %v1340_v31, %v1957_v30 }
 0x1e9   : > { %v1184_v34 = vpop.permute.xlu1 %1183  ;;  %v1180_v38 = vadd.f32 %v1179_v33, %v1168_v32 }
 0x1ea   : > { %v1190_v35 = vsub.f32 %v1184_v34, %v1944_v29  ;;  %v1956_v29 = vld [vmem:[%s2790_s5 + $0x5e] ss:$0 sm:$0xff] }
 0x1eb   : > { %2320 = vset.pattern.permute.xlu1 %v2608_v37 }
 0x1ec   : > { %v1191_v39 = vand.u32 2147483647, %v1190_v35  ;;  %1651 = vperm.xlu1 %2320, %v2940_v10  }
 0x1ee   : > { %v1192_v42 = vadd.f32 %v1191_v39, %v1180_v38  ;;  %v1208_v44 = vpop.permute.xlu1 %1207  ;;  %v1958_v39 = vld [vmem:[%s2790_s5 + $0x60] ss:$0 sm:$0xff] }
 0x1ef   : > { %v1214_v45 = vsub.f32 %v1208_v44, %v1946_v41 }
 0x1f0   : > { %2322 = vset.pattern.permute.xlu1 %v2609_v46  ;;  %v1204_v50 = vadd.f32 %v1203_v43, %v1192_v42  ;;  %v1347_v42 = vand.u32 2147483647, %v1346_v36  ;;  %v1960_v46 = vld [vmem:[%s2790_s5 + $0x62] ss:$0 sm:$0xff] }
 0x1f1   : > { %1675 = vperm.xlu1 %2322, %v2940_v10   ;;  %v1215_v51 = vand.u32 2147483647, %v1214_v45  ;;  %v1959_v45 = vld [vmem:[%s2790_s5 + $0x61] ss:$0 sm:$0xff] }
 0x1f3   : > { %v1220_v52 = vpop.permute.xlu1 %1219  ;;  %v1216_v56 = vadd.f32 %v1215_v51, %v1204_v50 }
 0x1f4   : > { %v1226_v53 = vsub.f32 %v1220_v52, %v1947_v47  ;;  %v1376_v47 = vpop.permute.xlu0 %1375 }
 0x1f5   : > { %2323 = vset.pattern.permute.xlu1 %v2610_v55  ;;  %v1382_v52 = vsub.f32 %v1376_v47, %v1960_v46  ;;  %v1961_v55 = vld [vmem:[%s2790_s5 + $0x63] ss:$0 sm:$0xff] }
 0x1f6   : > { %v1227_v57 = vand.u32 2147483647, %v1226_v53  ;;  %1687 = vperm.xlu1 %2323, %v2940_v10  }
 0x1f8   : > { %v1228_v59 = vadd.f32 %v1227_v57, %v1216_v56  ;;  %v1244_v61 = vpop.permute.xlu1 %1243  ;;  %v1383_v57 = vand.u32 2147483647, %v1382_v52 }
 0x1f9   : > { %v1250_v62 = vsub.f32 %v1244_v61, %v1949_v58  ;;  %v1963_v61 = vld [vmem:[%s2790_s5 + $0x65] ss:$0 sm:$0xff] }
 0x1fa   : > { %2325 = vset.pattern.permute.xlu1 %v2611_v63  ;;  %v1240_v4 = vadd.f32 %v1239_v60, %v1228_v59  ;;  %v1962_v60 = vld [vmem:[%s2790_s5 + $0x64] ss:$0 sm:$0xff] }
 0x1fb   : > { %1711 = vperm.xlu1 %2325, %v2940_v10   ;;  %v1251_v5 = vand.u32 2147483647, %v1250_v62  ;;  %v1412_v62 = vpop.permute.xlu0 %1411 }
 0x1fd   : > { %v1256_v6 = vpop.permute.xlu1 %1255  ;;  %v1252_v9 = vadd.f32 %v1251_v5, %v1240_v4  ;;  %v1418_v4 = vsub.f32 %v1412_v62, %v1963_v61 }
 0x1fe   : > { %v1262_v7 = vsub.f32 %v1256_v6, %v1950_v0 }
 0x1ff   : > { %2326 = vset.pattern.permute.xlu1 %v2586_v40  ;;  %v1310_v40 = vsub.f32 %v1304_v18, %v1954_v17 }
 0x200   : > { %v1263_v11 = vand.u32 2147483647, %v1262_v7  ;;  %1723 = vperm.xlu1 %2326, %v2940_v10   ;;  %v1955_v10 = vld [vmem:[%s2790_s5 + $0x5d] ss:$0 sm:$0xff]  ;;  %v1964_v7 = vld [vmem:[%s2790_s5 + $0x66] ss:$0 sm:$0xff] }
 0x201   : > { %v1311_v26 = vand.u32 2147483647, %v1310_v40 }
 0x202   : > { %v1264_v13 = vadd.f32 %v1263_v11, %v1252_v9  ;;  %v1280_v14 = vpop.permute.xlu1 %1279  ;;  %v1419_v9 = vand.u32 2147483647, %v1418_v4 }
 0x203   : > { %v1286_v15 = vsub.f32 %v1280_v14, %v1952_v12  ;;  %v1448_v14 = vpop.permute.xlu0 %1447 }
 0x204   : > { %v1276_v19 = vadd.f32 %v1275_v2, %v1264_v13  ;;  %v1965_v13 = vld [vmem:[%s2790_s5 + $0x67] ss:$0 sm:$0xff]  ;;  %v1966_v2 = vld [vmem:[%s2790_s5 + $0x68] ss:$0 sm:$0xff] }
 0x205   : > { %v1287_v20 = vand.u32 2147483647, %v1286_v15 }
 0x207   : > { %v1292_v21 = vpop.permute.xlu1 %1291  ;;  %v1288_v23 = vadd.f32 %v1287_v20, %v1276_v19  ;;  %v1454_v19 = vsub.f32 %v1448_v14, %v1966_v2 }
 0x208   : > { %v1298_v22 = vsub.f32 %v1292_v21, %v1953_v16 }
 0x20a   : > { %v1299_v24 = vand.u32 2147483647, %v1298_v22  ;;  %v1967_v22 = vld [vmem:[%s2790_s5 + $0x69] ss:$0 sm:$0xff] }
 0x20c   : > { %v1300_v25 = vadd.f32 %v1299_v24, %v1288_v23  ;;  %v1316_v27 = vpop.permute.xlu1 %1315  ;;  %v1455_v23 = vand.u32 2147483647, %v1454_v19 }
 0x20d   : > { %v1322_v28 = vsub.f32 %v1316_v27, %v1955_v10  ;;  %v1484_v27 = vpop.permute.xlu0 %1483 }
 0x20e   : > { %v1312_v32 = vadd.f32 %v1311_v26, %v1300_v25  ;;  %v1968_v25 = vld [vmem:[%s2790_s5 + $0x6a] ss:$0 sm:$0xff]  ;;  %v1969_v26 = vld [vmem:[%s2790_s5 + $0x6b] ss:$0 sm:$0xff] }
 0x20f   : > { %v1323_v33 = vand.u32 2147483647, %v1322_v28 }
 0x211   : > { %v1328_v34 = vpop.permute.xlu1 %1327  ;;  %v1324_v37 = vadd.f32 %v1323_v33, %v1312_v32  ;;  %v1490_v32 = vsub.f32 %v1484_v27, %v1969_v26 }
 0x212   : > { %v1334_v35 = vsub.f32 %v1328_v34, %v1956_v29 }
 0x214   : > { %v1335_v38 = vand.u32 2147483647, %v1334_v35  ;;  %v1970_v35 = vld [vmem:[%s2790_s5 + $0x6c] ss:$0 sm:$0xff] }
 0x216   : > { %v1336_v41 = vadd.f32 %v1335_v38, %v1324_v37  ;;  %v1352_v43 = vpop.permute.xlu1 %1351  ;;  %v1491_v37 = vand.u32 2147483647, %v1490_v32 }
 0x217   : > { %v1358_v44 = vsub.f32 %v1352_v43, %v1958_v39  ;;  %v1520_v43 = vpop.permute.xlu0 %1519 }
 0x218   : > { %v1348_v48 = vadd.f32 %v1347_v42, %v1336_v41  ;;  %v1971_v41 = vld [vmem:[%s2790_s5 + $0x6d] ss:$0 sm:$0xff]  ;;  %v1972_v42 = vld [vmem:[%s2790_s5 + $0x6e] ss:$0 sm:$0xff] }
 0x219   : > { %v1359_v49 = vand.u32 2147483647, %v1358_v44 }
 0x21b   : > { %v1364_v50 = vpop.permute.xlu1 %1363  ;;  %v1360_v53 = vadd.f32 %v1359_v49, %v1348_v48  ;;  %v1526_v48 = vsub.f32 %v1520_v43, %v1972_v42 }
 0x21c   : > { %v1370_v51 = vsub.f32 %v1364_v50, %v1959_v45 }
 0x21e   : > { %v1371_v54 = vand.u32 2147483647, %v1370_v51  ;;  %v1973_v51 = vld [vmem:[%s2790_s5 + $0x6f] ss:$0 sm:$0xff] }
 0x220   : > { %v1372_v56 = vadd.f32 %v1371_v54, %v1360_v53  ;;  %v1388_v58 = vpop.permute.xlu1 %1387  ;;  %v1527_v53 = vand.u32 2147483647, %v1526_v48 }
 0x221   : > { %v1394_v59 = vsub.f32 %v1388_v58, %v1961_v55  ;;  %v1556_v58 = vpop.permute.xlu0 %1555 }
 0x222   : > { %v1384_v63 = vadd.f32 %v1383_v57, %v1372_v56  ;;  %v1974_v56 = vld [vmem:[%s2790_s5 + $0x70] ss:$0 sm:$0xff]  ;;  %v1975_v57 = vld [vmem:[%s2790_s5 + $0x71] ss:$0 sm:$0xff] }
 0x223   : > { %v1395_v0 = vand.u32 2147483647, %v1394_v59 }
 0x225   : > { %v1400_v1 = vpop.permute.xlu1 %1399  ;;  %v1396_v5 = vadd.f32 %v1395_v0, %v1384_v63  ;;  %v1562_v63 = vsub.f32 %v1556_v58, %v1975_v57 }
 0x226   : > { %v1406_v3 = vsub.f32 %v1400_v1, %v1962_v60 }
 0x228   : > { %v1407_v6 = vand.u32 2147483647, %v1406_v3  ;;  %v1976_v3 = vld [vmem:[%s2790_s5 + $0x72] ss:$0 sm:$0xff] }
 0x22a   : > { %v1408_v8 = vadd.f32 %v1407_v6, %v1396_v5  ;;  %v1424_v11 = vpop.permute.xlu1 %1423  ;;  %v1563_v5 = vand.u32 2147483647, %v1562_v63 }
 0x22b   : > { %v1430_v12 = vsub.f32 %v1424_v11, %v1964_v7  ;;  %v1592_v11 = vpop.permute.xlu0 %1591 }
 0x22c   : > { %v1420_v15 = vadd.f32 %v1419_v9, %v1408_v8  ;;  %v1977_v8 = vld [vmem:[%s2790_s5 + $0x73] ss:$0 sm:$0xff]  ;;  %v1978_v9 = vld [vmem:[%s2790_s5 + $0x74] ss:$0 sm:$0xff] }
 0x22d   : > { %v1431_v16 = vand.u32 2147483647, %v1430_v12 }
 0x22f   : > { %v1436_v17 = vpop.permute.xlu1 %1435  ;;  %v1432_v20 = vadd.f32 %v1431_v16, %v1420_v15  ;;  %v1598_v15 = vsub.f32 %v1592_v11, %v1978_v9 }
 0x230   : > { %v1442_v18 = vsub.f32 %v1436_v17, %v1965_v13 }
 0x232   : > { %v1443_v21 = vand.u32 2147483647, %v1442_v18  ;;  %v1979_v18 = vld [vmem:[%s2790_s5 + $0x75] ss:$0 sm:$0xff] }
 0x234   : > { %v1444_v40 = vadd.f32 %v1443_v21, %v1432_v20  ;;  %v1460_v24 = vpop.permute.xlu1 %1459  ;;  %v1599_v20 = vand.u32 2147483647, %v1598_v15 }
 0x235   : > { %v1466_v10 = vsub.f32 %v1460_v24, %v1967_v22  ;;  %v1628_v24 = vpop.permute.xlu0 %1627 }
 0x236   : > { %v1456_v28 = vadd.f32 %v1455_v23, %v1444_v40  ;;  %v1980_v40 = vld [vmem:[%s2790_s5 + $0x76] ss:$0 sm:$0xff]  ;;  %v1981_v23 = vld [vmem:[%s2790_s5 + $0x77] ss:$0 sm:$0xff] }
 0x237   : > { %v1467_v29 = vand.u32 2147483647, %v1466_v10 }
 0x239   : > { %v1472_v30 = vpop.permute.xlu1 %1471  ;;  %v1468_v33 = vadd.f32 %v1467_v29, %v1456_v28  ;;  %v1634_v28 = vsub.f32 %v1628_v24, %v1981_v23 }
 0x23a   : > { %v1478_v31 = vsub.f32 %v1472_v30, %v1968_v25 }
 0x23c   : > { %v1479_v34 = vand.u32 2147483647, %v1478_v31  ;;  %v1982_v31 = vld [vmem:[%s2790_s5 + $0x78] ss:$0 sm:$0xff] }
 0x23e   : > { %v1480_v36 = vadd.f32 %v1479_v34, %v1468_v33  ;;  %v1496_v38 = vpop.permute.xlu1 %1495  ;;  %v1635_v33 = vand.u32 2147483647, %v1634_v28 }
 0x23f   : > { %v1502_v39 = vsub.f32 %v1496_v38, %v1970_v35  ;;  %v1664_v38 = vpop.permute.xlu0 %1663 }
 0x240   : > { %v1492_v44 = vadd.f32 %v1491_v37, %v1480_v36  ;;  %v1983_v36 = vld [vmem:[%s2790_s5 + $0x79] ss:$0 sm:$0xff]  ;;  %v1984_v37 = vld [vmem:[%s2790_s5 + $0x7a] ss:$0 sm:$0xff] }
 0x241   : > { %v1503_v45 = vand.u32 2147483647, %v1502_v39 }
 0x243   : > { %v1508_v46 = vpop.permute.xlu1 %1507  ;;  %v1504_v49 = vadd.f32 %v1503_v45, %v1492_v44  ;;  %v1670_v44 = vsub.f32 %v1664_v38, %v1984_v37 }
 0x244   : > { %v1514_v47 = vsub.f32 %v1508_v46, %v1971_v41 }
 0x246   : > { %v1515_v50 = vand.u32 2147483647, %v1514_v47  ;;  %v1985_v47 = vld [vmem:[%s2790_s5 + $0x7b] ss:$0 sm:$0xff] }
 0x248   : > { %v1516_v52 = vadd.f32 %v1515_v50, %v1504_v49  ;;  %v1532_v54 = vpop.permute.xlu1 %1531  ;;  %v1671_v49 = vand.u32 2147483647, %v1670_v44 }
 0x249   : > { %v1538_v55 = vsub.f32 %v1532_v54, %v1973_v51  ;;  %v1700_v54 = vpop.permute.xlu0 %1699 }
 0x24a   : > { %v1528_v59 = vadd.f32 %v1527_v53, %v1516_v52  ;;  %v1986_v52 = vld [vmem:[%s2790_s5 + $0x7c] ss:$0 sm:$0xff]  ;;  %v1987_v53 = vld [vmem:[%s2790_s5 + $0x7d] ss:$0 sm:$0xff] }
 0x24b   : > { %v1539_v60 = vand.u32 2147483647, %v1538_v55 }
 0x24d   : > { %v1544_v61 = vpop.permute.xlu1 %1543  ;;  %v1540_v0 = vadd.f32 %v1539_v60, %v1528_v59  ;;  %v1706_v59 = vsub.f32 %v1700_v54, %v1987_v53 }
 0x24e   : > { %v1550_v62 = vsub.f32 %v1544_v61, %v1974_v56 }
 0x250   : > { %v1551_v1 = vand.u32 2147483647, %v1550_v62  ;;  %v1988_v62 = vld [vmem:[%s2790_s5 + $0x7e] ss:$0 sm:$0xff] }
 0x252   : > { %v1552_v4 = vadd.f32 %v1551_v1, %v1540_v0  ;;  %v1568_v6 = vpop.permute.xlu1 %1567  ;;  %v1707_v0 = vand.u32 2147483647, %v1706_v59 }
 0x253   : > { %v1574_v7 = vsub.f32 %v1568_v6, %v1976_v3 }
 0x254   : > { %v1564_v12 = vadd.f32 %v1563_v5, %v1552_v4  ;;  %v1989_v4 = vld [vmem:[%s2790_s5 + $0x7f] ss:$0 sm:$0xff] }
 0x255   : > { %v1575_v13 = vand.u32 2147483647, %v1574_v7 }
 0x257   : > { %v1580_v2 = vpop.permute.xlu1 %1579  ;;  %v1576_v16 = vadd.f32 %v1575_v13, %v1564_v12 }
 0x258   : > { %v1586_v14 = vsub.f32 %v1580_v2, %v1977_v8 }
 0x25a   : > { %v1587_v17 = vand.u32 2147483647, %v1586_v14 }
 0x25c   : > { %v1588_v19 = vadd.f32 %v1587_v17, %v1576_v16  ;;  %v1604_v21 = vpop.permute.xlu1 %1603 }
 0x25d   : > { %v1610_v22 = vsub.f32 %v1604_v21, %v1979_v18 }
 0x25e   : > { %v1600_v10 = vadd.f32 %v1599_v20, %v1588_v19 }
 0x25f   : > { %v1611_v25 = vand.u32 2147483647, %v1610_v22 }
 0x261   : > { %v1616_v26 = vpop.permute.xlu1 %1615  ;;  %v1612_v29 = vadd.f32 %v1611_v25, %v1600_v10 }
 0x262   : > { %v1622_v27 = vsub.f32 %v1616_v26, %v1980_v40 }
 0x264   : > { %v1623_v30 = vand.u32 2147483647, %v1622_v27 }
 0x266   : > { %v1624_v32 = vadd.f32 %v1623_v30, %v1612_v29  ;;  %v1640_v34 = vpop.permute.xlu1 %1639 }
 0x267   : > { %v1646_v35 = vsub.f32 %v1640_v34, %v1982_v31 }
 0x268   : > { %v1636_v39 = vadd.f32 %v1635_v33, %v1624_v32 }
 0x269   : > { %v1647_v41 = vand.u32 2147483647, %v1646_v35 }
 0x26b   : > { %v1652_v42 = vpop.permute.xlu1 %1651  ;;  %v1648_v45 = vadd.f32 %v1647_v41, %v1636_v39 }
 0x26c   : > { %v1658_v43 = vsub.f32 %v1652_v42, %v1983_v36 }
 0x26e   : > { %v1659_v46 = vand.u32 2147483647, %v1658_v43 }
 0x270   : > { %v1660_v48 = vadd.f32 %v1659_v46, %v1648_v45  ;;  %v1676_v50 = vpop.permute.xlu1 %1675 }
 0x271   : > { %v1682_v51 = vsub.f32 %v1676_v50, %v1985_v47 }
 0x272   : > { %v1672_v55 = vadd.f32 %v1671_v49, %v1660_v48 }
 0x273   : > { %v1683_v56 = vand.u32 2147483647, %v1682_v51 }
 0x275   : > { %v1688_v57 = vpop.permute.xlu1 %1687  ;;  %v1684_v60 = vadd.f32 %v1683_v56, %v1672_v55 }
 0x276   : > { %v1694_v58 = vsub.f32 %v1688_v57, %v1986_v52 }
 0x278   : > { %v1695_v61 = vand.u32 2147483647, %v1694_v58 }
 0x27a   : > { %v1696_v63 = vadd.f32 %v1695_v61, %v1684_v60  ;;  %v1712_v1 = vpop.permute.xlu1 %1711 }
 0x27b   : > { %v1718_v3 = vsub.f32 %v1712_v1, %v1988_v62 }
 0x27c   : > { %v1708_v5 = vadd.f32 %v1707_v0, %v1696_v63 }
 0x27d   : > { %v1719_v6 = vand.u32 2147483647, %v1718_v3 }
 0x27f   : > { %v1724_v7 = vpop.permute.xlu1 %1723  ;;  %v1720_v9 = vadd.f32 %v1719_v6, %v1708_v5 }
 0x280   : > { %v1730_v8 = vsub.f32 %v1724_v7, %v1989_v4 }
 0x282   : > { %v1731_v11 = vand.u32 2147483647, %v1730_v8 }
 0x284   : > { %v1732_v12 = vadd.f32 %v1731_v11, %v1720_v9 }
 0x286   : > { %v1733_v13 = vsub.f32 9.0, %v1732_v12 }
 0x288   : > { %v1990_v2 = vmul.f32 -1.442695, %v1733_v13 }
 0x28a   : > { %2328 = vpow2.f32 %v1990_v2 }
 0x294   : > { %v2329_v14 = vpop.eup %2328 }
 0x295   : > { %v1737_v15 = vadd.f32 1.0, %v2329_v14 }
 0x297   : > { %2330 = vrcp.f32 %v1737_v15 }
 0x2a1   : > { %v2331_v16 = vpop.eup %2330 }
 0x2a2   : > { %1740 = vst [vmem:[%s194_s23] sm:$0xff] %v2331_v16 }
 0x2a3   : > { %2404 = shalt.err (!%p2401_p7)
}
 0x2a4   : > { %s2405_s8 = scalar_lea.hbm %s3063_s29, 128  ;;  %s2409_s24 = scalar_lea.hbm %s3114_s2, 256 }
 0x2a5   : > { %p2406_p13 = scmp.ne.s32.totalorder %s3063_s29, %s2405_s8  ;;  %p2410_p12 = scmp.lt.u32.totalorder %s3063_s29, %s3114_s2 }
 0x2a6   : > { %p2411_p4 = scmp.lt.u32.totalorder %s2409_s24, %s2405_s8  ;;  %p2413_p5 = scmp.lt.u32.totalorder %s2405_s8, %s3063_s29 }
 0x2a7   : > { %p2407_p2 = pnand %p2406_p13, %p3135_p10 }
 0x2a8   : > { %p2412_p8 = por %p2411_p4, %p2410_p12 }
 0x2a9   : > { %p2408_p6 = pneg %p2407_p2 }
 0x2aa   : > { %p2414_p11 = por %p2413_p5, %p2412_p8 }
 0x2ac   : > { %p2415_p1 = pnand %p2414_p11, %p2408_p6 }
 0x2ae   : > { %2418 = shalt.err (!%p2415_p1)
}
 0x2af   : > { %2001 = dma.vmem_to_hbm [thread:$0]  (%p3135_p10), %s3065_s26, 128, %s3063_s29, %s1742_s17  }
 0x2b0 PF: > { %s1769_s5 = sand.u32 1, %s2457_s9   ;;  %p3136_p0 = scmp.ne.s32.totalorder %s3125_s22, 0 }
 0x2b1   : > { %p3137_p9 = scmp.ge.s32.totalorder %s2477_s14, 2  ;;  %s1770_s18 = scalar_lea.sflag [#allocation4], %s1769_s5 }
 0x2b3   : > { %p2012_p3 = pnand %p3137_p9, %p3136_p0 }
 0x2b5   : > { %2452 = dma.done.wait (!%p2012_p3), %s1770_s18, 128  }
 0x2b6   : > { %2454 = vsyncadd (!%p2012_p3), %s1770_s18, 4294967168  ;;  %s19_s14 = sadd.s32 1, %s2477_s14   ;;  %s3138_s9 = smov %s2461_s10 }
 0x2b7   : > { %p16_p7 = scmp.ge.s32.totalorder %s19_s14, 4   ;;  %s3139_s10 = smov %s2465_s11 }
 0x2b8   : > { %s3140_s11 = smov %s2747_s25  ;;  %s3141_s12 = smov %s2473_s13 }
 0x2b9   : > { %s3142_s13 = smov %s3144_s28  ;;  %18 = sbr.rel (!%p16_p7) target bundleno = 7 (0x7), region = 79 }
 0x2c0   :  { %1775 = vsyncpa [#allocation3], 1 }
 0x2c1   :  { %1777 = vsyncpa [#allocation3 + $0x1], 1 }
 0x2c2   :  { %1778 = vsyncpa [#allocation6], 1 }
 0x2c3   :  { %1780 = vsyncpa [#allocation6 + $0x1], 1 }
 0x2c4   :  { %1781 = vsyncpa [#allocation4], 1 }
 0x2c5   :  { %1783 = vsyncpa [#allocation4 + $0x1], 1 }

</bundles_post_ra>
